<compile_context>
chip_gen: v7x
topology: tpu7x:2x2x1
jax: 0.10.0
libtpu: 0.0.40
codegen_flags: <defaults>
</compile_context>

<pallas_src>
import functools
from types import SimpleNamespace

import jax
import jax.numpy as jnp
from jax.experimental import pallas as pl
from jax.experimental.pallas import tpu as pltpu

H = 1024            # hidden size (RNN(1024, 24*3, 1024))
NUM_JOINTS = 24
GN_GROUPS = 16
LIN2_PAD = 128      # lin2 output lane-padded 72 -> 128 for unmasked stores
_SMPL_PARENTS = (-1, 0, 0, 0, 1, 2, 3, 4, 5, 6, 7, 8, 9, 9, 9, 12,
                 13, 14, 16, 17, 18, 19, 20, 21)


def _frames_per_block(M):
    # block must satisfy (8,128)-rule: either divisible by 8 or equal to the full dim
    return 8 if (M % 8 == 0 and M > 8) else M


# ------------------------------------------------------------------ #
# fused PointNet: per-frame MLP 3->64->128->1024 (+ReLU) + max-pool over points
# ------------------------------------------------------------------ #
def _pointnet_kernel(pts_ref, w1_ref, b1_ref, w2_ref, b2_ref, w3_ref, b3_ref, o_ref):
    bf, n, _ = pts_ref.shape
    pts = pts_ref[...].reshape(bf * n, 3)
    h = jnp.dot(pts, w1_ref[...], preferred_element_type=jnp.float32) + b1_ref[...]
    h = jnp.maximum(h, 0.0)
    h = jnp.dot(h.astype(jnp.bfloat16), w2_ref[...],
                preferred_element_type=jnp.float32) + b2_ref[...]
    h = jnp.maximum(h, 0.0)
    h = jnp.dot(h.astype(jnp.bfloat16), w3_ref[...],
                preferred_element_type=jnp.float32) + b3_ref[...]
    h = jnp.maximum(h, 0.0)
    o_ref[...] = jnp.max(h.reshape(bf, n, -1), axis=1)          # (bf, 1024)


def pointnet_encode(pp, pts):                 # (M, N, 3) -> (M, 1024)
    M, N, _ = pts.shape
    bf = _frames_per_block(M)
    return pl.pallas_call(
        _pointnet_kernel,
        out_shape=jax.ShapeDtypeStruct((M, H), jnp.float32),
        grid_spec=pltpu.PrefetchScalarGridSpec(
            num_scalar_prefetch=0, grid=(M // bf,),
            in_specs=[
                pl.BlockSpec((bf, N, 3), lambda i: (i, 0, 0)),
                pl.BlockSpec((3, 64), lambda i: (0, 0)),
                pl.BlockSpec((1, 64), lambda i: (0, 0)),
                pl.BlockSpec((64, 128), lambda i: (0, 0)),
                pl.BlockSpec((1, 128), lambda i: (0, 0)),
                pl.BlockSpec((128, H), lambda i: (0, 0)),
                pl.BlockSpec((1, H), lambda i: (0, 0)),
            ],
            out_specs=pl.BlockSpec((bf, H), lambda i: (i, 0)),
        ),
        compiler_params=pltpu.CompilerParams(dimension_semantics=("parallel",)),
    )(pts, pp["w1"], pp["b1"], pp["w2"], pp["b2"], pp["w3"], pp["b3"])


# ------------------------------------------------------------------ #
# fused background branch: conv1(2048->1024) + GroupNorm(16)+ReLU + conv2(1024->1024)
# split-matmul: feat = x @ W1[:1024] + back @ W1[1024:]  (no 2048-wide concat)
# ------------------------------------------------------------------ #
def _bg_fuse_kernel(x_ref, back_ref, w1x_ref, w1b_ref, b1_ref, oh_ref, oht_ref,
                    g_ref, be_ref, w2_ref, b2_ref, o_ref, *, count, eps):
    x = x_ref[0]                                                       # (T, C)
    bk = back_ref[...]                                                 # (1, C)
    f = (jnp.dot(x.astype(jnp.bfloat16), w1x_ref[...], preferred_element_type=jnp.float32)
         + jnp.dot(bk.astype(jnp.bfloat16), w1b_ref[...], preferred_element_type=jnp.float32)
         + b1_ref[...])                                                # (T, C)
    s = jnp.sum(f, axis=0, keepdims=True)                              # (1, C)
    ss = jnp.sum(f * f, axis=0, keepdims=True)                         # (1, C)
    gs = jnp.dot(s, oh_ref[...], preferred_element_type=jnp.float32)   # (1, G)
    gss = jnp.dot(ss, oh_ref[...], preferred_element_type=jnp.float32)
    mean_g = gs / count
    var_g = jnp.maximum(gss / count - mean_g * mean_g, 0.0)            # clamp cancellation
    mean_c = jnp.dot(mean_g, oht_ref[...], preferred_element_type=jnp.float32)  # (1, C)
    var_c = jnp.dot(var_g, oht_ref[...], preferred_element_type=jnp.float32)
    inv = jax.lax.rsqrt(var_c + eps)
    y = jnp.maximum((f - mean_c) * inv * g_ref[...] + be_ref[...], 0.0)
    o_ref[0] = (jnp.dot(y.astype(jnp.bfloat16), w2_ref[...],
                        preferred_element_type=jnp.float32) + b2_ref[...])


def background_fuse(x, back_x, p, groups=GN_GROUPS, eps=1e-5):
    B, T, C = x.shape
    group_ids = jnp.arange(C) // (C // groups)
    onehot = jax.nn.one_hot(group_ids, groups, dtype=jnp.float32)       # (C, G)
    count = float(T * (C // groups))
    return pl.pallas_call(
        functools.partial(_bg_fuse_kernel, count=count, eps=eps),
        out_shape=jax.ShapeDtypeStruct((B, T, C), jnp.float32),
        grid_spec=pltpu.PrefetchScalarGridSpec(
            num_scalar_prefetch=0, grid=(B,),
            in_specs=[
                pl.BlockSpec((1, T, C), lambda b: (b, 0, 0)),
                pl.BlockSpec((1, C), lambda b: (b, 0)),
                pl.BlockSpec((C, C), lambda b: (0, 0)),          # conv1 (x half)   bf16
                pl.BlockSpec((C, C), lambda b: (0, 0)),          # conv1 (back half) bf16
                pl.BlockSpec((1, C), lambda b: (0, 0)),          # conv1 bias
                pl.BlockSpec((C, groups), lambda b: (0, 0)),     # one-hot (C,G)
                pl.BlockSpec((groups, C), lambda b: (0, 0)),     # one-hot.T
                pl.BlockSpec((1, C), lambda b: (0, 0)),          # gamma
                pl.BlockSpec((1, C), lambda b: (0, 0)),          # beta
                pl.BlockSpec((C, C), lambda b: (0, 0)),          # conv2 bf16
                pl.BlockSpec((1, C), lambda b: (0, 0)),          # conv2 bias
            ],
            out_specs=pl.BlockSpec((1, T, C), lambda b: (b, 0, 0)),
        ),
        compiler_params=pltpu.CompilerParams(
            dimension_semantics=("parallel",),
            vmem_limit_bytes=48 * 1024 * 1024,
        ),
    )(x, back_x, p["conv1_wx"], p["conv1_wb"], p["conv1_b"],
      onehot, onehot.T, p["gn_gamma"], p["gn_beta"], p["conv2_w"], p["conv2_b"])


# ------------------------------------------------------------------ #
# RNN input path: lin1 + ReLU fused with merged [W_ih_f | W_ih_b] projection
# ------------------------------------------------------------------ #
def _rnn_in_kernel(x_ref, w1_ref, b1_ref, w2_ref, b2_ref, o_ref):
    x = x_ref[...].astype(jnp.bfloat16)
    h = jnp.maximum(jnp.dot(x, w1_ref[...], preferred_element_type=jnp.float32)
                    + b1_ref[...], 0.0)                                   # dropout = identity
    o_ref[...] = (jnp.dot(h.astype(jnp.bfloat16), w2_ref[...],
                          preferred_element_type=jnp.float32) + b2_ref[...])


def rnn_input_proj(x, w1, b1, w2, b2):
    M, K = x.shape
    N = w2.shape[1]
    return pl.pallas_call(
        _rnn_in_kernel,
        out_shape=jax.ShapeDtypeStruct((M, N), jnp.float32),
        grid_spec=pltpu.PrefetchScalarGridSpec(
            num_scalar_prefetch=0, grid=(1,),
            in_specs=[
                pl.BlockSpec((M, K), lambda i: (0, 0)),
                pl.BlockSpec((K, K), lambda i: (0, 0)),
                pl.BlockSpec((1, K), lambda i: (0, 0)),
                pl.BlockSpec((K, N), lambda i: (0, 0)),
                pl.BlockSpec((1, N), lambda i: (0, 0)),
            ],
            out_specs=pl.BlockSpec((M, N), lambda i: (0, 0)),
        ),
        compiler_params=pltpu.CompilerParams(
            dimension_semantics=("arbitrary",),
            vmem_limit_bytes=48 * 1024 * 1024,     # bf16 weights: 2 + 12 MiB, fits v7x 64 MiB
        ),
    )(x, w1, b1, w2, b2)


# ------------------------------------------------------------------ #
# bidirectional GRU recurrence fused with lin2 head.
# grid over direction ("parallel" -> 2 TCs on v7x); all B rows batched on the MXU M dim.
# The backward direction's time reversal is handled in-kernel (t_nat = T-1-t), so there are
# no jnp.flip / stack / transpose HBM round-trips; each direction writes its lin2 partial
# at the natural time index. Hidden sequence lives in VMEM scratch, lin2 applied as ONE
# (T*B, 1024) @ (1024, 128) matmul per direction (72 lanes zero-padded to 128).
# ------------------------------------------------------------------ #
def _gru_lin2_kernel(gates_ref, whh_ref, bhh_ref, w2_ref, o_ref, h_ref, hseq_ref):
    # gates_ref: (T, B, 3H) f32 (this direction's input gates, natural time order)
    # whh_ref: (H, 3H) bf16 ; bhh_ref: (1, 3H) f32 ; w2_ref: (H, P) f32 lin2 half
    # o_ref: (T, B, P) partial lin2 output ; h_ref: (B, H) ; hseq_ref: (T, B, H)
    d = pl.program_id(0)
    T = gates_ref.shape[0]
    B = h_ref.shape[0]
    hidden = whh_ref.shape[0]
    h_ref[...] = jnp.zeros_like(h_ref)

    @pl.loop(0, T)
    def _(t):
        t_nat = jnp.where(d == 0, t, T - 1 - t)          # backward dir scans reversed time
        g = gates_ref[pl.ds(t_nat, 1)][0]                # (B, 3H)
        h = h_ref[...]                                   # (B, H)
        hh = jnp.dot(h.astype(jnp.bfloat16), whh_ref[...],
                     preferred_element_type=jnp.float32) + bhh_ref[...]  # (B, 3H)
        r = jax.nn.sigmoid(g[:, :hidden] + hh[:, :hidden])
        z = jax.nn.sigmoid(g[:, hidden:2 * hidden] + hh[:, hidden:2 * hidden])
        n = jnp.tanh(g[:, 2 * hidden:] + r * hh[:, 2 * hidden:])
        h_new = (1.0 - z) * n + z * h
        h_ref[...] = h_new
        hseq_ref[pl.ds(t_nat, 1)] = h_new[None]          # store at natural time

    hseq = hseq_ref[...].reshape(T * B, hidden)
    o_ref[...] = jnp.dot(hseq, w2_ref[...],
                         preferred_element_type=jnp.float32).reshape(o_ref.shape)


def bigru_lin2(gates_tb, whh, bhh, w2_stack):
    # gates_tb: (T, B, 6H) f32 [fwd | bwd]; whh: (2, H, 3H) bf16; bhh: (2, 1, 3H) f32
    # w2_stack: (2, H, P) f32 (lin2 halves, lane-padded). returns (2, T, B, P) partials.
    T, B, G6 = gates_tb.shape
    G3 = G6 // 2
    hidden = G3 // 3
    P = w2_stack.shape[-1]
    return pl.pallas_call(
        _gru_lin2_kernel,
        out_shape=jax.ShapeDtypeStruct((2, T, B, P), jnp.float32),
        grid_spec=pltpu.PrefetchScalarGridSpec(
            num_scalar_prefetch=0, grid=(2,),
            in_specs=[
                pl.BlockSpec((T, B, G3), lambda d: (0, 0, d)),       # direction half of gates
                pl.BlockSpec((None, hidden, G3), lambda d: (d, 0, 0)),
                pl.BlockSpec((None, 1, G3), lambda d: (d, 0, 0)),
                pl.BlockSpec((None, hidden, P), lambda d: (d, 0, 0)),
            ],
            out_specs=pl.BlockSpec((None, T, B, P), lambda d: (d, 0, 0, 0)),
            scratch_shapes=[pltpu.VMEM((B, hidden), jnp.float32),
                            pltpu.VMEM((T, B, hidden), jnp.float32)],
        ),
        compiler_params=pltpu.CompilerParams(dimension_semantics=("parallel",)),
    )(gates_tb, whh, bhh, w2_stack)


def rnn_pose_s1(p, x):                       # (B, T, 1024) -> (B, T, 72)
    B, T, D = x.shape
    x_tb = x.transpose(1, 0, 2).reshape(T * B, D)        # time-major for the GRU scan
    gi = rnn_input_proj(x_tb, p["lin1_w"], p["lin1_b"],
                        p["wih_cat"], p["bih_cat"])                       # (T*B, 6H)
    gates_tb = gi.reshape(T, B, 6 * H)
    y2 = bigru_lin2(gates_tb, p["whh"], p["bhh"], p["lin2_w_pad"])        # (2, T, B, 128)
    y = (y2[0] + y2[1]).transpose(1, 0, 2)[..., :NUM_JOINTS * 3] + p["lin2_b"]
    return y                                                              # (B, T, 72)


# ------------------------------------------------------------------ #
# STGCN (simplified): spatial graph conv over 24 joints + 6D head, 8 frames / grid step
# First matmul split: joints(24,3)@W1[:3] + x(1024)@W1[3:] broadcast over joints.
# Adjacency applied as one block-diagonal (fb*24, fb*24) matmul.
# ------------------------------------------------------------------ #
def _stgcn_kernel(j_ref, x_ref, a_ref, w1j_ref, w1x_ref, b1_ref, w2_ref, b2_ref, o_ref):
    fb, nj, _ = j_ref.shape
    x = x_ref[...]                                                        # (fb, 1024)
    j = j_ref[...].reshape(fb * nj, 3)
    hx = jnp.dot(x.astype(jnp.bfloat16), w1x_ref[...],
                 preferred_element_type=jnp.float32)                      # (fb, 64)
    hj = jnp.dot(j, w1j_ref[...], preferred_element_type=jnp.float32)     # (fb*24, 64)
    h = hj.reshape(fb, nj, -1) + hx[:, None, :] + b1_ref[...]             # (fb, 24, 64)
    h = h.reshape(fb * nj, -1)
    h = jnp.maximum(jnp.dot(a_ref[...], h, preferred_element_type=jnp.float32), 0.0)
    o = jnp.dot(h, w2_ref[...], preferred_element_type=jnp.float32) + b2_ref[...]
    o_ref[...] = o.reshape(fb, nj, -1)


def stgcn_forward(joints, x, p):
    M, J, _ = joints.shape
    fb = _frames_per_block(M)
    a_bd = jnp.kron(jnp.eye(fb, dtype=jnp.float32), p["a_hat"])           # (fb*J, fb*J)
    C = p["gcn_w1x"].shape[0]
    Hd = p["gcn_w1x"].shape[1]
    Cout = p["gcn_w2"].shape[1]
    return pl.pallas_call(
        _stgcn_kernel,
        out_shape=jax.ShapeDtypeStruct((M, J, Cout), jnp.float32),
        grid_spec=pltpu.PrefetchScalarGridSpec(
            num_scalar_prefetch=0, grid=(M // fb,),
            in_specs=[
                pl.BlockSpec((fb, J, 3), lambda i: (i, 0, 0)),
                pl.BlockSpec((fb, C), lambda i: (i, 0)),
                pl.BlockSpec((fb * J, fb * J), lambda i: (0, 0)),
                pl.BlockSpec((3, Hd), lambda i: (0, 0)),
                pl.BlockSpec((C, Hd), lambda i: (0, 0)),
                pl.BlockSpec((1, Hd), lambda i: (0, 0)),
                pl.BlockSpec((Hd, Cout), lambda i: (0, 0)),
                pl.BlockSpec((1, Cout), lambda i: (0, 0)),
            ],
            out_specs=pl.BlockSpec((fb, J, Cout), lambda i: (i, 0, 0)),
        ),
        compiler_params=pltpu.CompilerParams(dimension_semantics=("parallel",)),
    )(joints, x, a_bd, p["gcn_w1j"], p["gcn_w1x"], p["gcn_b1"], p["gcn_w2"], p["gcn_b2"])


# ------------------------------------------------------------------ #
# plain-JAX glue
# ------------------------------------------------------------------ #
def rot6d_to_rotmat(x):                      # (M, 6) -> (M, 3, 3), HMR convention
    x = x.reshape(-1, 3, 2)
    a1, a2 = x[..., 0], x[..., 1]
    b1 = a1 / jnp.maximum(jnp.linalg.norm(a1, axis=-1, keepdims=True), 1e-8)
    d = jnp.sum(b1 * a2, axis=-1, keepdims=True)
    b2u = a2 - d * b1
    b2 = b2u / jnp.maximum(jnp.linalg.norm(b2u, axis=-1, keepdims=True), 1e-8)
    b3 = jnp.cross(b1, b2)
    return jnp.stack([b1, b2, b3], axis=-1)


def build_adjacency():
    a = [[0.0] * NUM_JOINTS for _ in range(NUM_JOINTS)]
    for j in range(NUM_JOINTS):
        a[j][j] = 1.0
        pa = _SMPL_PARENTS[j]
        if pa >= 0:
            a[j][pa] = 1.0
            a[pa][j] = 1.0
    a = jnp.asarray(a, jnp.float32)
    return a / jnp.sum(a, axis=1, keepdims=True)


def init_params(key):
    keys = iter(jax.random.split(key, 64))
    bf16 = jnp.bfloat16

    def dense(fi, fo):
        kw, kb = jax.random.split(next(keys))
        w = jax.random.normal(kw, (fi, fo), jnp.float32) / jnp.sqrt(float(fi))
        b = 0.01 * jax.random.normal(kb, (fo,), jnp.float32)
        return w, b

    p = {}
    # MinkowskiPointNet encoders (dense per-point MLP 3 -> 64 -> 128 -> 1024 + max pool)
    for name in ("enc", "back_enc"):
        w1, b1 = dense(3, 64)
        w2, b2 = dense(64, 128)
        w3, b3 = dense(128, H)
        p[name] = dict(w1=w1, b1=b1.reshape(1, -1),
                       w2=w2.astype(bf16), b2=b2.reshape(1, -1),
                       w3=w3.astype(bf16), b3=b3.reshape(1, -1))
    # background fusion: Conv1d(2048,1024,1), GroupNorm(16,1024), Conv1d(1024,1024,1)
    c1w, c1b = dense(2 * H, H)
    c2w, c2b = dense(H, H)
    p["conv1_wx"] = c1w[:H].astype(bf16)       # applies to x
    p["conv1_wb"] = c1w[H:].astype(bf16)       # applies to background feature
    p["conv1_b"] = c1b.reshape(1, -1)
    p["conv2_w"] = c2w.astype(bf16)
    p["conv2_b"] = c2b.reshape(1, -1)
    p["gn_gamma"] = jnp.ones((1, H), jnp.float32)
    p["gn_beta"] = jnp.zeros((1, H), jnp.float32)
    # pose_s1 RNN(1024, 72, 1024): linear1 -> bidirectional GRU -> linear2
    l1w, l1b = dense(H, H)
    p["lin1_w"] = l1w.astype(bf16)
    p["lin1_b"] = l1b.reshape(1, -1)
    wih_f, bih_f = dense(H, 3 * H)
    wih_b, bih_b = dense(H, 3 * H)
    p["wih_cat"] = jnp.concatenate([wih_f, wih_b], axis=1).astype(bf16)   # (H, 6H)
    p["bih_cat"] = jnp.concatenate([bih_f, bih_b]).reshape(1, 6 * H)
    whh_f, bhh_f = dense(H, 3 * H)
    whh_b, bhh_b = dense(H, 3 * H)
    p["whh"] = jnp.stack([whh_f, whh_b], axis=0).astype(bf16)             # (2, H, 3H)
    p["bhh"] = jnp.stack([bhh_f, bhh_b], axis=0).reshape(2, 1, 3 * H)
    l2w, l2b = dense(2 * H, NUM_JOINTS * 3)
    l2w_pad = jnp.pad(l2w, ((0, 0), (0, LIN2_PAD - NUM_JOINTS * 3)))      # 72 -> 128 lanes
    p["lin2_w_pad"] = jnp.stack([l2w_pad[:H], l2w_pad[H:]], axis=0)       # (2, H, 128)
    p["lin2_b"] = l2b.reshape(1, -1)
    # pose_s2 STGCN(3 + 1024)
    g1w, g1b = dense(3 + H, 64)
    p["gcn_w1j"] = g1w[:3]                     # joints part
    p["gcn_w1x"] = g1w[3:].astype(bf16)        # global-feature part
    p["gcn_b1"] = g1b.reshape(1, -1)
    g2w, g2b = dense(64, 6)
    p["gcn_w2"] = g2w
    p["gcn_b2"] = g2b.reshape(1, -1)
    p["a_hat"] = build_adjacency()
    return p


def minkow_net_forward(params, data, cfg):
    B, T, N, _ = data["human_points"].shape
    x = pointnet_encode(params["enc"], data["features"])                  # (B*T, 1024)
    if cfg.MODEL.use_background:
        back_x = pointnet_encode(params["back_enc"],
                                 data["background_features"])             # (B, 1024)
        x = background_fuse(x.reshape(B, T, H), back_x, params)           # (B, T, 1024)
        x = x.reshape(B * T, H)
    x_bt = x.reshape(B, T, H)
    full_joints = rnn_pose_s1(params, x_bt)                               # (B, T, 72)
    rot6ds = stgcn_forward(full_joints.reshape(B * T, NUM_JOINTS, 3),
                           x, params)                                     # (B*T, 24, 6)
    rotmats = rot6d_to_rotmat(rot6ds.reshape(-1, 6)).reshape(-1, 3, 3)
    pred = dict(data)
    pred["pred_rotmats"] = rotmats.reshape(B, T, NUM_JOINTS, 3, 3)
    pred["pred_full_joints"] = full_joints.reshape(B, T, NUM_JOINTS, 3)
    return pred


if __name__ == "__main__":
    cfg = SimpleNamespace(MODEL=SimpleNamespace(use_background=True))
    B, T, N, Nb = 2, 8, 64, 64
    key = jax.random.PRNGKey(0)
    kp, kh, kbg = jax.random.split(key, 3)
    params = init_params(kp)

    human_points = jax.random.normal(kh, (B, T, N, 3), jnp.float32)
    background_points = jax.random.normal(kbg, (B, Nb, 3), jnp.float32)
    data = {
        "human_points": human_points,
        "features": human_points.reshape(B * T, N, 3),
        "coordinates": jnp.floor(human_points.reshape(B * T, N, 3) / 0.05),
        "background_features": background_points,
        "background_coordinates": jnp.floor(background_points / 0.05),
    }

    pred = minkow_net_forward(params, data, cfg)
    jax.block_until_ready((pred["pred_rotmats"], pred["pred_full_joints"]))
    assert pred["pred_rotmats"].shape == (B, T, NUM_JOINTS, 3, 3)
    assert pred["pred_full_joints"].shape == (B, T, NUM_JOINTS, 3)
    assert bool(jnp.all(jnp.isfinite(pred["pred_rotmats"])))
    assert bool(jnp.all(jnp.isfinite(pred["pred_full_joints"])))
    print("KERNEL_OK")
</pallas_src>

<mosaic_0001>
module attributes {stable_mosaic.version = 11 : i64} {
  func.func @_pointnet_kernel(%arg0: i32, %arg1: memref<8x64x3xf32, #tpu.memory_space<vmem>>, %arg2: memref<3x64xf32, #tpu.memory_space<vmem>>, %arg3: memref<1x64xf32, #tpu.memory_space<vmem>>, %arg4: memref<64x128xbf16, #tpu.memory_space<vmem>>, %arg5: memref<1x128xf32, #tpu.memory_space<vmem>>, %arg6: memref<128x1024xbf16, #tpu.memory_space<vmem>>, %arg7: memref<1x1024xf32, #tpu.memory_space<vmem>>, %arg8: memref<8x1024xf32, #tpu.memory_space<vmem>>) attributes {dimension_semantics = [#tpu.dimension_semantics<parallel>], iteration_bounds = array<i64: 2>, scalar_prefetch = 0 : i64, scratch_operands = 0 : i64, tpu.core_type = #tpu.core_type<tc>, window_params = [{transform_indices = @transform_0, window_bounds = array<i64: 8, 64, 3>}, {pipeline_mode = #tpu.pipeline_mode<synchronous>, transform_indices = @transform_1, window_bounds = array<i64: 3, 64>}, {pipeline_mode = #tpu.pipeline_mode<synchronous>, transform_indices = @transform_2, window_bounds = array<i64: 1, 64>}, {pipeline_mode = #tpu.pipeline_mode<synchronous>, transform_indices = @transform_3, window_bounds = array<i64: 64, 128>}, {pipeline_mode = #tpu.pipeline_mode<synchronous>, transform_indices = @transform_4, window_bounds = array<i64: 1, 128>}, {pipeline_mode = #tpu.pipeline_mode<synchronous>, transform_indices = @transform_5, window_bounds = array<i64: 128, 1024>}, {pipeline_mode = #tpu.pipeline_mode<synchronous>, transform_indices = @transform_6, window_bounds = array<i64: 1, 1024>}, {transform_indices = @transform_7, window_bounds = array<i64: 8, 1024>}]} {
    %c0 = arith.constant 0 : index
    %c0_0 = arith.constant 0 : index
    %c0_1 = arith.constant 0 : index
    %0 = vector.load %arg1[%c0, %c0_0, %c0_1] : memref<8x64x3xf32, #tpu.memory_space<vmem>>, vector<8x64x3xf32>
    %1 = vector.shape_cast %0 : vector<8x64x3xf32> to vector<512x3xf32>
    %c0_2 = arith.constant 0 : index
    %c0_3 = arith.constant 0 : index
    %2 = vector.load %arg2[%c0_2, %c0_3] : memref<3x64xf32, #tpu.memory_space<vmem>>, vector<3x64xf32>
    %cst = arith.constant dense<0.000000e+00> : vector<512x64xf32>
    %3 = tpu.matmul %1, %2, %cst {dimension_numbers = #tpu.dot_dimension_numbers<[1], [0], [0], [1], [0, 0, 1, 1], [], []>} : vector<512x3xf32>, vector<3x64xf32>, vector<512x64xf32> -> vector<512x64xf32>
    %c0_4 = arith.constant 0 : index
    %c0_5 = arith.constant 0 : index
    %4 = vector.load %arg3[%c0_4, %c0_5] : memref<1x64xf32, #tpu.memory_space<vmem>>, vector<1x64xf32>
    %5 = vector.broadcast %4 : vector<1x64xf32> to vector<512x64xf32>
    %6 = arith.addf %3, %5 : vector<512x64xf32>
    %cst_6 = arith.constant 0.000000e+00 : f32
    %7 = vector.broadcast %cst_6 : f32 to vector<512x64xf32>
    %8 = arith.maximumf %6, %7 : vector<512x64xf32>
    %9 = arith.truncf %8 : vector<512x64xf32> to vector<512x64xbf16>
    %c0_7 = arith.constant 0 : index
    %c0_8 = arith.constant 0 : index
    %10 = vector.load %arg4[%c0_7, %c0_8] : memref<64x128xbf16, #tpu.memory_space<vmem>>, vector<64x128xbf16>
    %cst_9 = arith.constant dense<0.000000e+00> : vector<512x128xf32>
    %11 = tpu.matmul %9, %10, %cst_9 {dimension_numbers = #tpu.dot_dimension_numbers<[1], [0], [0], [1], [0, 0, 1, 1], [], []>} : vector<512x64xbf16>, vector<64x128xbf16>, vector<512x128xf32> -> vector<512x128xf32>
    %c0_10 = arith.constant 0 : index
    %c0_11 = arith.constant 0 : index
    %12 = vector.load %arg5[%c0_10, %c0_11] : memref<1x128xf32, #tpu.memory_space<vmem>>, vector<1x128xf32>
    %13 = vector.broadcast %12 : vector<1x128xf32> to vector<512x128xf32>
    %14 = arith.addf %11, %13 : vector<512x128xf32>
    %cst_12 = arith.constant 0.000000e+00 : f32
    %15 = vector.broadcast %cst_12 : f32 to vector<512x128xf32>
    %16 = arith.maximumf %14, %15 : vector<512x128xf32>
    %17 = arith.truncf %16 : vector<512x128xf32> to vector<512x128xbf16>
    %c0_13 = arith.constant 0 : index
    %c0_14 = arith.constant 0 : index
    %18 = vector.load %arg6[%c0_13, %c0_14] : memref<128x1024xbf16, #tpu.memory_space<vmem>>, vector<128x1024xbf16>
    %cst_15 = arith.constant dense<0.000000e+00> : vector<512x1024xf32>
    %19 = tpu.matmul %17, %18, %cst_15 {dimension_numbers = #tpu.dot_dimension_numbers<[1], [0], [0], [1], [0, 0, 1, 1], [], []>} : vector<512x128xbf16>, vector<128x1024xbf16>, vector<512x1024xf32> -> vector<512x1024xf32>
    %c0_16 = arith.constant 0 : index
    %c0_17 = arith.constant 0 : index
    %20 = vector.load %arg7[%c0_16, %c0_17] : memref<1x1024xf32, #tpu.memory_space<vmem>>, vector<1x1024xf32>
    %21 = vector.broadcast %20 : vector<1x1024xf32> to vector<512x1024xf32>
    %22 = arith.addf %19, %21 : vector<512x1024xf32>
    %cst_18 = arith.constant 0.000000e+00 : f32
    %23 = vector.broadcast %cst_18 : f32 to vector<512x1024xf32>
    %24 = arith.maximumf %22, %23 : vector<512x1024xf32>
    %25 = vector.shape_cast %24 : vector<512x1024xf32> to vector<8x64x1024xf32>
    %cst_19 = arith.constant dense<0xFF800000> : vector<8x1024xf32>
    %26 = vector.multi_reduction <maximumf>, %25, %cst_19 [1] : vector<8x64x1024xf32> to vector<8x1024xf32>
    %c0_20 = arith.constant 0 : index
    %c0_21 = arith.constant 0 : index
    %27 = vector.load %arg8[%c0_20, %c0_21] : memref<8x1024xf32, #tpu.memory_space<vmem>>, vector<8x1024xf32>
    tpu.vector_store %arg8[%c0_20, %c0_21], %26 {strides = array<i32>} : memref<8x1024xf32, #tpu.memory_space<vmem>>, vector<8x1024xf32>,
    return
  }
  func.func @transform_0(%arg0: i32) -> (i32, i32, i32) {
    %c0_i32 = arith.constant 0 : i32
    %c0_i32_0 = arith.constant 0 : i32
    %c0_i32_1 = arith.constant 0 : i32
    return %arg0, %c0_i32, %c0_i32_0 : i32, i32, i32
  }
  func.func @transform_1(%arg0: i32) -> (i32, i32) {
    %c0_i32 = arith.constant 0 : i32
    %c0_i32_0 = arith.constant 0 : i32
    %c0_i32_1 = arith.constant 0 : i32
    return %c0_i32, %c0_i32_0 : i32, i32
  }
  func.func @transform_2(%arg0: i32) -> (i32, i32) {
    %c0_i32 = arith.constant 0 : i32
    %c0_i32_0 = arith.constant 0 : i32
    %c0_i32_1 = arith.constant 0 : i32
    return %c0_i32, %c0_i32_0 : i32, i32
  }
  func.func @transform_3(%arg0: i32) -> (i32, i32) {
    %c0_i32 = arith.constant 0 : i32
    %c0_i32_0 = arith.constant 0 : i32
    %c0_i32_1 = arith.constant 0 : i32
    return %c0_i32, %c0_i32_0 : i32, i32
  }
  func.func @transform_4(%arg0: i32) -> (i32, i32) {
    %c0_i32 = arith.constant 0 : i32
    %c0_i32_0 = arith.constant 0 : i32
    %c0_i32_1 = arith.constant 0 : i32
    return %c0_i32, %c0_i32_0 : i32, i32
  }
  func.func @transform_5(%arg0: i32) -> (i32, i32) {
    %c0_i32 = arith.constant 0 : i32
    %c0_i32_0 = arith.constant 0 : i32
    %c0_i32_1 = arith.constant 0 : i32
    return %c0_i32, %c0_i32_0 : i32, i32
  }
  func.func @transform_6(%arg0: i32) -> (i32, i32) {
    %c0_i32 = arith.constant 0 : i32
    %c0_i32_0 = arith.constant 0 : i32
    %c0_i32_1 = arith.constant 0 : i32
    return %c0_i32, %c0_i32_0 : i32, i32
  }
  func.func @transform_7(%arg0: i32) -> (i32, i32) {
    %c0_i32 = arith.constant 0 : i32
    %c0_i32_0 = arith.constant 0 : i32
    return %arg0, %c0_i32 : i32, i32
  }
}

</mosaic_0001>

<bundles_post_ra>
// kernel: tpu_custom_call.1
= control target key start
LH: loop header
LB: loop body
LE: loop exit
PB: predicated region body
PF: predicated region fallthrough
CT: control target
= control target key end

     0   :  { %12 = vsyncpa [#allocation3], 0  ;;  %s7338_s0 = inlined_call_operand.vmem [shape: f32[16,64,3], index: 0, kind: input, shape index: {}]   ;;  %s7339_s1 = inlined_call_operand.vmem [shape: f32[3,64], index: 1, kind: input, shape index: {}]   ;;  %s7340_s2 = inlined_call_operand.vmem [shape: f32[1,64], index: 2, kind: input, shape index: {}]   ;;  %s7341_s3 = inlined_call_operand.vmem [shape: bf16[64,128], index: 3, kind: input, shape index: {}]   ;;  %s7342_s4 = inlined_call_operand.vmem [shape: f32[1,128], index: 4, kind: input, shape index: {}]   ;;  %s7343_s5 = inlined_call_operand.vmem [shape: bf16[128,1024], index: 5, kind: input, shape index: {}]   ;;  %s7344_s6 = inlined_call_operand.vmem [shape: f32[1,1024], index: 6, kind: input, shape index: {}]   ;;  %s7345_s7 = inlined_call_operand.hbm [shape: f32[16,1024], index: 7, kind: output, shape index: {}]  }
   0x1   :  { %14 = vsyncpa [#allocation3 + $0x1], 0  ;;  %s5557_s24 = smov 0   ;;  %s5559_s25 = smov 0  }
   0x2   :  { %s5561_s26 = smov 0   ;;  %s5563_s27 = smov 0  }
   0x3 LB: > { %s5578_s28 = sadd.s32 4294967295, %s5513_s27   ;;  %s4953_s29 = sadd.s32 4294967294, %s5513_s27   ;;  %s5513_s27 = sphi %s5563_s27, %s7394_s27   ;;  %s5509_s26 = sphi %s5561_s26, %s7393_s26   ;;  %s5505_s25 = sphi %s5559_s25, %s7392_s25   ;;  %s5501_s24 = sphi %s5557_s24, %s7391_s24  }
   0x4   : > { %s5582_s30 = sadd.s32 1, %s5513_s27   ;;  %s179_s8 = sadd.s32 1, %s5509_s26 }
   0x5   : > { %s176_s9 = ssub.s32 %s5513_s27, %s5582_s30  ;;  %p189_p0 = scmp.ne.s32.totalorder %s5509_s26, %s5505_s25 }
   0x6   : > { %p177_p1 = scmp.eq.s32.totalorder %s176_s9, 0  ;;  %p190_p2 = scmp.eq.s32.totalorder %s5578_s28, 1 }
   0x7   : > { %p195_p3 = scmp.ne.s32.totalorder %s5505_s25, %s5501_s24  ;;  %p196_p4 = scmp.eq.s32.totalorder %s4953_s29, 1 }
   0x8   : > { %s5593_s10 = scalar_select %p177_p1, %s5509_s26, %s179_s8  }
   0x9   : > { %p5595_p5 = por %p190_p2, %p189_p0  ;;  %p5599_p6 = por %p196_p4, %p195_p3 }
   0xa   : > { %p4956_p7 = scmp.ge.s32.totalorder %s5513_s27, 1  ;;  %p242_p8 = scmp.lt.s32.totalorder %s5513_s27, 3 }
   0xc   : > { %p243_p9 = pnand %p4956_p7, %p242_p8 }
   0xe   : > { %246 = sbr.rel (%p243_p9) target bundleno = 1226 (0x4ca), region = 48 }
  0x15   : > { %v347_v0 = vld [vmem:[%s7339_s1] sm:$0x7]  ;;  %vm548_vm0 = vcmask 1042432   ;;  %s4958_s15 = sshll.u32 %s5578_s28, 3  ;;  %vm355_vm1 = vcmask 23552   ;;  %v5447_v46 = vld [vmem:[%s7341_s3 + $0x8] sm:$0xff]  }
  0x16   : > { %v5446_v1 = vld [vmem:[%s7341_s3] sm:$0xff]   ;;  %5236 = vmatprep.subr.msk.mxu0 %vm548_vm0, %v347_v0  ;;  %p276_p10 = scmp.lt.s32.totalorder %s4958_s15, 15  ;;  %v5448_v49 = vld [vmem:[%s7341_s3 + $0x10] sm:$0xff]   ;;  %v5449_v52 = vld [vmem:[%s7341_s3 + $0x18] sm:$0xff]   ;;  %vm1072_vm2 = vcmask 523264   ;;  %vm4800_vm3 = vcmask 1041409  }
  0x17   : > { %5237 = vmatpush3.msk.msra.mxu0 %vm548_vm0, %v347_v0  ;;  %5334 = vmatprep.subr.bf16.mxu1 %v5446_v1  ;;  %vm4802_vm4 = vcmask 1042434   ;;  %vm4804_vm5 = vcmask 1043459   ;;  %vm4806_vm6 = vcmask 1044484   ;;  %vm4808_vm7 = vcmask 1045509   ;;  %s272_s29 = sand.u32 1, %s5505_s25   ;;  %s5134_s13 = sshll.u32 %s5578_s28, 10 }
  0x18   : > { %s7396_s15 = smov (!%p276_p10, %s4958_s15), 15  ;;  %5335 = vmatpush3.bf16.msra.mxu1 %v5446_v1  ;;  %vm4810_vm8 = vcmask 1046534   ;;  %vm4812_vm9 = vcmask 1047559   ;;  %s6882_s8 = sshll.u32 %s272_s29, 6 }
  0x19   : > { %s5133_s18 = sshll.u32 %s7396_s15, 6  ;;  %5336 = vmatprep.subr.bf16.mxu1 %v5447_v46  ;;  %s6894_s9 = scalar_lea.vmem [#allocation2], %s6882_s8 }
  0x1a   : > { %s5615_s21 = scalar_lea.vmem %s7338_s0, %s5133_s18  ;;  %s4894_s14 = sshll.u32 %s6894_s9, 4  ;;  %s7291_s14 = int_to_ptr.vmem [resolvable:$true] %s4894_s14 }
  0x1b   : > { %v283_v2 = vld [vmem:[%s5615_s21] sm:$0xff]  ;;  %v284_v3 = vld [vmem:[%s5615_s21 + $0x8] sm:$0xff]  ;;  %v285_v4 = vld [vmem:[%s5615_s21 + $0x10] sm:$0xff]  ;;  %s7289_s17 = scalar_lea.hbm %s7345_s7, %s5134_s13  ;;  %s4880_s28 = scalar_lea.sflag [#allocation3], %s272_s29 }
  0x1c   : > { %5238 = vmatprep.mubr.msk.f32.mxu0 %vm355_vm1, %v283_v2  ;;  %v286_v5 = vld [vmem:[%s5615_s21 + $0x18] sm:$0xff]  ;;  %v287_v6 = vld [vmem:[%s5615_s21 + $0x20] sm:$0xff]  ;;  %v288_v7 = vld [vmem:[%s5615_s21 + $0x28] sm:$0xff]  ;;  %5337 = vmatpush3.bf16.msra.mxu1 %v5447_v46  ;;  %s5451_s18 = scalar_lea.vmem %s7291_s14, 1024  ;;  %s5516_s19 = smov [#allocation2]  }
  0x1d   : > { %5239 = vmatmul.mubr.msk.f32.vlgmr.msra.gmra.mrb[0].mxu0 %vm355_vm1, %v284_v3  ;;  %v289_v8 = vld [vmem:[%s5615_s21 + $0x30] sm:$0xff]  ;;  %v290_v9 = vld [vmem:[%s5615_s21 + $0x38] sm:$0xff]  ;;  %v291_v10 = vld [vmem:[%s5615_s21 + $0x40] sm:$0xff]  ;;  %5338 = vmatprep.subr.bf16.mxu1 %v5448_v49  ;;  %p5452_p11 = scmp.ne.s32.totalorder %s7291_s14, %s5451_s18  ;;  %s5455_s20 = sshll.u32 %s5516_s19, 4  ;;  %s5456_s20 = int_to_ptr.vmem [resolvable:$false] %s5455_s20 }
  0x1e   : > { %5241 = vmatprep.mubr.msk.f32.mxu0 %vm355_vm1, %v285_v4  ;;  %v292_v11 = vld [vmem:[%s5615_s21 + $0x48] sm:$0xff]  ;;  %v293_v12 = vld [vmem:[%s5615_s21 + $0x50] sm:$0xff]  ;;  %v294_v13 = vld [vmem:[%s5615_s21 + $0x58] sm:$0xff]  ;;  %s5457_s22 = scalar_lea.vmem %s5456_s20, 2048  ;;  %p5458_p0 = scmp.lt.s32.totalorder %s7291_s14, %s5456_s20 }
  0x1f   : > { %v295_v14 = vld [vmem:[%s5615_s21 + $0x60] sm:$0xff]  ;;  %v296_v15 = vld [vmem:[%s5615_s21 + $0x68] sm:$0xff]  ;;  %v297_v16 = vld [vmem:[%s5615_s21 + $0x70] sm:$0xff]  ;;  %p5453_p12 = pnand %p5452_p11, %p5595_p5  ;;  %p5459_p1 = scmp.lt.s32.totalorder %s5457_s22, %s5451_s18 }
  0x20   : > { %v298_v17 = vld [vmem:[%s5615_s21 + $0x78] sm:$0xff]  ;;  %v299_v18 = vld [vmem:[%s5615_s21 + $0x80] sm:$0xff]  ;;  %v300_v19 = vld [vmem:[%s5615_s21 + $0x88] sm:$0xff]  ;;  %5339 = vmatpush3.bf16.msra.mxu1 %v5448_v49 }
  0x21   : > { %5242 = vmatmul.mubr.msk.f32.gmra.mrb[2].mxu0 %vm355_vm1, %v286_v5  ;;  %v301_v20 = vld [vmem:[%s5615_s21 + $0x90] sm:$0xff]  ;;  %v302_v21 = vld [vmem:[%s5615_s21 + $0x98] sm:$0xff]  ;;  %v303_v22 = vld [vmem:[%s5615_s21 + $0xa0] sm:$0xff]  ;;  %5340 = vmatprep.subr.bf16.mxu1 %v5449_v52  ;;  %p5454_p13 = pneg %p5453_p12  ;;  %p5460_p2 = por %p5459_p1, %p5458_p0 }
  0x22   : > { %5244 = vmatprep.mubr.msk.f32.mxu0 %vm355_vm1, %v287_v6  ;;  %v304_v23 = vld [vmem:[%s5615_s21 + $0xa8] sm:$0xff]  ;;  %v305_v24 = vld [vmem:[%s5615_s21 + $0xb0] sm:$0xff]  ;;  %v306_v25 = vld [vmem:[%s5615_s21 + $0xb8] sm:$0xff] }
  0x23   : > { %v307_v26 = vld [vmem:[%s5615_s21 + $0xc0] sm:$0xff]  ;;  %v308_v27 = vld [vmem:[%s5615_s21 + $0xc8] sm:$0xff]  ;;  %v309_v28 = vld [vmem:[%s5615_s21 + $0xd0] sm:$0xff]  ;;  %p5461_p3 = pnand %p5460_p2, %p5454_p13 }
  0x24   : > { %v310_v29 = vld [vmem:[%s5615_s21 + $0xd8] sm:$0xff]  ;;  %v311_v30 = vld [vmem:[%s5615_s21 + $0xe0] sm:$0xff]  ;;  %v312_v31 = vld [vmem:[%s5615_s21 + $0xe8] sm:$0xff]  ;;  %5341 = vmatpush3.bf16.msra.mxu1 %v5449_v52 }
  0x25   : > { %5245 = vmatmul.mubr.msk.f32.gmra.mrb[4].mxu0 %vm355_vm1, %v288_v7  ;;  %v313_v32 = vld [vmem:[%s5615_s21 + $0xf0] sm:$0xff]  ;;  %v314_v33 = vld [vmem:[%s5615_s21 + $0xf8] sm:$0xff]  ;;  %v315_v34 = vld [vmem:[%s5615_s21 + $0x100] sm:$0xff] }
  0x26   : > { %5247 = vmatprep.mubr.msk.f32.mxu0 %vm355_vm1, %v289_v8  ;;  %v316_v35 = vld [vmem:[%s5615_s21 + $0x108] sm:$0xff]  ;;  %v317_v36 = vld [vmem:[%s5615_s21 + $0x110] sm:$0xff]  ;;  %v318_v37 = vld [vmem:[%s5615_s21 + $0x118] sm:$0xff] }
  0x27   : > { %v319_v38 = vld [vmem:[%s5615_s21 + $0x120] sm:$0xff]  ;;  %v320_v39 = vld [vmem:[%s5615_s21 + $0x128] sm:$0xff]  ;;  %v321_v40 = vld [vmem:[%s5615_s21 + $0x130] sm:$0xff] }
  0x28   : > { %v322_v41 = vld [vmem:[%s5615_s21 + $0x138] sm:$0xff]  ;;  %v323_v42 = vld [vmem:[%s5615_s21 + $0x140] sm:$0xff]  ;;  %v324_v43 = vld [vmem:[%s5615_s21 + $0x148] sm:$0xff] }
  0x29   : > { %5248 = vmatmul.mubr.msk.f32.gmra.mrb[6].mxu0 %vm355_vm1, %v290_v9  ;;  %v325_v44 = vld [vmem:[%s5615_s21 + $0x150] sm:$0xff]  ;;  %v326_v45 = vld [vmem:[%s5615_s21 + $0x158] sm:$0xff]  ;;  %v327_v47 = vld [vmem:[%s5615_s21 + $0x160] sm:$0xff] }
  0x2a   : > { %5250 = vmatprep.mubr.msk.f32.mxu0 %vm355_vm1, %v291_v10  ;;  %v328_v48 = vld [vmem:[%s5615_s21 + $0x168] sm:$0xff]  ;;  %v329_v50 = vld [vmem:[%s5615_s21 + $0x170] sm:$0xff]  ;;  %v330_v51 = vld [vmem:[%s5615_s21 + $0x178] sm:$0xff] }
  0x2b   : > { %v331_v53 = vld [vmem:[%s5615_s21 + $0x180] sm:$0xff]  ;;  %v332_v54 = vld [vmem:[%s5615_s21 + $0x188] sm:$0xff]  ;;  %v333_v55 = vld [vmem:[%s5615_s21 + $0x190] sm:$0xff] }
  0x2c   : > { %v334_v56 = vld [vmem:[%s5615_s21 + $0x198] sm:$0xff]  ;;  %v335_v57 = vld [vmem:[%s5615_s21 + $0x1a0] sm:$0xff]  ;;  %v336_v58 = vld [vmem:[%s5615_s21 + $0x1a8] sm:$0xff] }
  0x2d   : > { %5251 = vmatmul.mubr.msk.f32.gmra.mrb[8].mxu0 %vm355_vm1, %v292_v11  ;;  %v337_v59 = vld [vmem:[%s5615_s21 + $0x1b0] sm:$0xff]  ;;  %v338_v60 = vld [vmem:[%s5615_s21 + $0x1b8] sm:$0xff]  ;;  %v339_v61 = vld [vmem:[%s5615_s21 + $0x1c0] sm:$0xff] }
  0x2e   : > { %5253 = vmatprep.mubr.msk.f32.mxu0 %vm355_vm1, %v293_v12  ;;  %v340_v62 = vld [vmem:[%s5615_s21 + $0x1c8] sm:$0xff]  ;;  %v341_v63 = vld [vmem:[%s5615_s21 + $0x1d0] sm:$0xff]  ;;  %v342_v0 = vld [vmem:[%s5615_s21 + $0x1d8] sm:$0xff] }
  0x2f   : > { %v343_v1 = vld [vmem:[%s5615_s21 + $0x1e0] sm:$0xff]  ;;  %v344_v2 = vld [vmem:[%s5615_s21 + $0x1e8] sm:$0xff]  ;;  %v345_v3 = vld [vmem:[%s5615_s21 + $0x1f0] sm:$0xff] }
  0x30   : > { %v346_v4 = vld [vmem:[%s5615_s21 + $0x1f8] sm:$0xff]  ;;  %v1554_v5 = vld [vmem:[%s7343_s5] sm:$0xff]  ;;  %v5763_v7 = vld [vmem:[%s7343_s5 + $0x8] sm:$0xff] }
  0x31   : > { %5254 = vmatmul.mubr.msk.f32.gmra.mrb[10].mxu0 %vm355_vm1, %v294_v13  ;;  %v1558_v6 = vld [vmem:[%s7343_s5 + $0x20] sm:$0xff]  ;;  %v5768_v10 = vld [vmem:[%s7343_s5 + $0x28] sm:$0xff] }
  0x32   : > { %5256 = vmatprep.mubr.msk.f32.mxu0 %vm355_vm1, %v295_v14  ;;  %v5064_v8 = vcombine.low %v1554_v5, %v1558_v6  ;;  %v5065_v9 = vcombine.high %v1554_v5, %v1558_v6  ;;  %v5066_v11 = vcombine.low %v5763_v7, %v5768_v10  ;;  %v5067_v12 = vcombine.high %v5763_v7, %v5768_v10  ;;  %v1562_v13 = vld [vmem:[%s7343_s5 + $0x40] sm:$0xff] }
  0x33   : > { %v1566_v14 = vld [vmem:[%s7343_s5 + $0x60] sm:$0xff] }
  0x34   : > { %1980 = vmatprep.subr.bf16.mxu0 %v5065_v9  ;;  %2333 = vmatprep.subr.bf16.mxu1 %v5067_v12 }
  0x35   : > { %5257 = vmatmul.mubr.msk.f32.gmra.mrb[12].mxu0 %vm355_vm1, %v296_v15  ;;  %v5072_v15 = vcombine.low %v1562_v13, %v1566_v14 }
  0x36   : > { %5259 = vmatprep.mubr.msk.f32.mxu0 %vm355_vm1, %v297_v16  ;;  %1981 = vmatpush1.bf16.msra.mxu0 %v5064_v8  ;;  %v5073_v16 = vcombine.high %v1562_v13, %v1566_v14  ;;  %v1579_v14 = vld [vmem:[%s7343_s5 + $0xc8] sm:$0xff] }
  0x38   : > { %1982 = vmatprep.subr.bf16.mxu0 %v5073_v16 }
  0x39   : > { %5260 = vmatmul.mubr.msk.f32.gmra.mrb[14].mxu0 %vm355_vm1, %v298_v17  ;;  %v1570_v17 = vld [vmem:[%s7343_s5 + $0x80] sm:$0xff] }
  0x3a   : > { %5262 = vmatprep.mubr.msk.f32.mxu0 %vm355_vm1, %v299_v18  ;;  %1983 = vmatpush1.bf16.msra.mxu0 %v5072_v15  ;;  %v1574_v18 = vld [vmem:[%s7343_s5 + $0xa0] sm:$0xff]  ;;  %v1583_v15 = vld [vmem:[%s7343_s5 + $0xe8] sm:$0xff] }
  0x3d   : > { %5263 = vmatmul.mubr.msk.f32.gmra.mrb[16].mxu0 %vm355_vm1, %v300_v19  ;;  %v5080_v19 = vcombine.low %v1570_v17, %v1574_v18 }
  0x3e   : > { %5265 = vmatprep.mubr.msk.f32.mxu0 %vm355_vm1, %v301_v20  ;;  %v5081_v20 = vcombine.high %v1570_v17, %v1574_v18 }
  0x40   : > { %1984 = vmatprep.subr.bf16.mxu0 %v5081_v20  ;;  %v5091_v20 = vcombine.high %v1579_v14, %v1583_v15 }
  0x41   : > { %5266 = vmatmul.mubr.msk.f32.gmra.mrb[18].mxu0 %vm355_vm1, %v302_v21  ;;  %v1578_v21 = vld [vmem:[%s7343_s5 + $0xc0] sm:$0xff] }
  0x42   : > { %5268 = vmatprep.mubr.msk.f32.mxu0 %vm355_vm1, %v303_v22  ;;  %1985 = vmatpush1.bf16.msra.mxu0 %v5080_v19  ;;  %v1582_v22 = vld [vmem:[%s7343_s5 + $0xe0] sm:$0xff] }
  0x45   : > { %5269 = vmatmul.mubr.msk.f32.gmra.mrb[20].mxu0 %vm355_vm1, %v304_v23  ;;  %v5088_v23 = vcombine.low %v1578_v21, %v1582_v22 }
  0x46   : > { %5271 = vmatprep.mubr.msk.f32.mxu0 %vm355_vm1, %v305_v24  ;;  %v5089_v24 = vcombine.high %v1578_v21, %v1582_v22  ;;  %v1587_v22 = vld [vmem:[%s7343_s5 + $0x108] sm:$0xff] }
  0x48   : > { %1986 = vmatprep.subr.bf16.mxu0 %v5089_v24 }
  0x49   : > { %5272 = vmatmul.mubr.msk.f32.gmra.mrb[22].mxu0 %vm355_vm1, %v306_v25  ;;  %v1586_v25 = vld [vmem:[%s7343_s5 + $0x100] sm:$0xff] }
  0x4a   : > { %5274 = vmatprep.mubr.msk.f32.mxu0 %vm355_vm1, %v307_v26  ;;  %1987 = vmatpush1.bf16.msra.mxu0 %v5088_v23  ;;  %v1590_v26 = vld [vmem:[%s7343_s5 + $0x120] sm:$0xff]  ;;  %v1591_v23 = vld [vmem:[%s7343_s5 + $0x128] sm:$0xff] }
  0x4d   : > { %5275 = vmatmul.mubr.msk.f32.gmra.mrb[24].mxu0 %vm355_vm1, %v308_v27  ;;  %v5096_v27 = vcombine.low %v1586_v25, %v1590_v26 }
  0x4e   : > { %5277 = vmatprep.mubr.msk.f32.mxu0 %vm355_vm1, %v309_v28  ;;  %v5097_v28 = vcombine.high %v1586_v25, %v1590_v26 }
  0x50   : > { %1988 = vmatprep.subr.bf16.mxu0 %v5097_v28  ;;  %v5090_v28 = vcombine.low %v1579_v14, %v1583_v15 }
  0x51   : > { %5278 = vmatmul.mubr.msk.f32.gmra.mrb[26].mxu0 %vm355_vm1, %v310_v29  ;;  %v1594_v29 = vld [vmem:[%s7343_s5 + $0x140] sm:$0xff] }
  0x52   : > { %5280 = vmatprep.mubr.msk.f32.mxu0 %vm355_vm1, %v311_v30  ;;  %1989 = vmatpush1.bf16.msra.mxu0 %v5096_v27  ;;  %v1598_v30 = vld [vmem:[%s7343_s5 + $0x160] sm:$0xff] }
  0x55   : > { %5281 = vmatmul.mubr.msk.f32.gmra.mrb[28].mxu0 %vm355_vm1, %v312_v31  ;;  %v5104_v31 = vcombine.low %v1594_v29, %v1598_v30 }
  0x56   : > { %5283 = vmatprep.mubr.msk.f32.mxu0 %vm355_vm1, %v313_v32  ;;  %v5105_v32 = vcombine.high %v1594_v29, %v1598_v30 }
  0x58   : > { %1990 = vmatprep.subr.bf16.mxu0 %v5105_v32 }
  0x59   : > { %5284 = vmatmul.mubr.msk.f32.gmra.mrb[30].mxu0 %vm355_vm1, %v314_v33  ;;  %v1602_v33 = vld [vmem:[%s7343_s5 + $0x180] sm:$0xff] }
  0x5a   : > { %5286 = vmatprep.mubr.msk.f32.mxu0 %vm355_vm1, %v315_v34  ;;  %1991 = vmatpush1.bf16.msra.mxu0 %v5104_v31  ;;  %v1606_v34 = vld [vmem:[%s7343_s5 + $0x1a0] sm:$0xff]  ;;  %v5099_v31 = vcombine.high %v1587_v22, %v1591_v23 }
  0x5d   : > { %5287 = vmatmul.mubr.msk.f32.gmra.mrb[32].mxu0 %vm355_vm1, %v316_v35  ;;  %v5112_v35 = vcombine.low %v1602_v33, %v1606_v34 }
  0x5e   : > { %5289 = vmatprep.mubr.msk.f32.mxu0 %vm355_vm1, %v317_v36  ;;  %v5113_v36 = vcombine.high %v1602_v33, %v1606_v34  ;;  %v1595_v33 = vld [vmem:[%s7343_s5 + $0x148] sm:$0xff] }
  0x5f   : > { %v1599_v34 = vld [vmem:[%s7343_s5 + $0x168] sm:$0xff] }
  0x60   : > { %1992 = vmatprep.subr.bf16.mxu0 %v5113_v36 }
  0x61   : > { %5290 = vmatmul.mubr.msk.f32.gmra.mrb[34].mxu0 %vm355_vm1, %v318_v37  ;;  %v5813_v37 = vld [vmem:[%s7340_s2] ss:$0 sm:$0xff] }
  0x62   : > { %5292 = vmatprep.mubr.msk.f32.mxu0 %vm355_vm1, %v319_v38  ;;  %1993 = vmatpush1.bf16.msra.mxu0 %v5112_v35 }
  0x65   : > { %5293 = vmatmul.mubr.msk.f32.gmra.mrb[36].mxu0 %vm355_vm1, %v320_v39 }
  0x66   : > { %5295 = vmatprep.mubr.msk.f32.mxu0 %vm355_vm1, %v321_v40 }
  0x69   : > { %5296 = vmatmul.mubr.msk.f32.gmra.mrb[38].mxu0 %vm355_vm1, %v322_v41 }
  0x6a   : > { %5298 = vmatprep.mubr.msk.f32.mxu0 %vm355_vm1, %v323_v42  ;;  %v1610_v42 = vld [vmem:[%s7343_s5 + $0x1c0] sm:$0xff] }
  0x6d   : > { %5299 = vmatmul.mubr.msk.f32.gmra.mrb[40].mxu0 %vm355_vm1, %v324_v43  ;;  %v1614_v43 = vld [vmem:[%s7343_s5 + $0x1e0] sm:$0xff] }
  0x6e   : > { %5301 = vmatprep.mubr.msk.f32.mxu0 %vm355_vm1, %v325_v44  ;;  %v5121_v46 = vcombine.high %v1610_v42, %v1614_v43 }
  0x70   : > { %1994 = vmatprep.subr.bf16.mxu0 %v5121_v46  ;;  %v1607_v46 = vld [vmem:[%s7343_s5 + $0x1a8] sm:$0xff] }
  0x71   : > { %5302 = vmatmul.mubr.msk.f32.gmra.mrb[42].mxu0 %vm355_vm1, %v326_v45  ;;  %v5120_v45 = vcombine.low %v1610_v42, %v1614_v43  ;;  %v5107_v43 = vcombine.high %v1595_v33, %v1599_v34 }
  0x72   : > { %5304 = vmatprep.mubr.msk.f32.mxu0 %vm355_vm1, %v327_v47 }
  0x73   : > { %1995 = vmatpush1.bf16.msra.mxu0 %v5120_v45  ;;  %v1603_v45 = vld [vmem:[%s7343_s5 + $0x188] sm:$0xff] }
  0x75   : > { %5305 = vmatmul.mubr.msk.f32.gmra.mrb[44].mxu0 %vm355_vm1, %v328_v48 }
  0x76   : > { %5307 = vmatprep.mubr.msk.f32.mxu0 %vm355_vm1, %v329_v50 }
  0x79   : > { %5308 = vmatmul.mubr.msk.f32.gmra.mrb[46].mxu0 %vm355_vm1, %v330_v51 }
  0x7a   : > { %5310 = vmatprep.mubr.msk.f32.mxu0 %vm355_vm1, %v331_v53 }
  0x7d   : > { %5311 = vmatmul.mubr.msk.f32.gmra.mrb[48].mxu0 %vm355_vm1, %v332_v54  ;;  %v1563_v54 = vld [vmem:[%s7343_s5 + $0x48] sm:$0xff] }
  0x7e   : > { %5313 = vmatprep.mubr.msk.f32.mxu0 %vm355_vm1, %v333_v55  ;;  %v1567_v55 = vld [vmem:[%s7343_s5 + $0x68] sm:$0xff] }
  0x7f   : > { %v5074_v6 = vcombine.low %v1563_v54, %v1567_v55 }
  0x81   : > { %5314 = vmatmul.mubr.msk.f32.gmra.mrb[50].mxu0 %vm355_vm1, %v334_v56 }
  0x82   : > { %5316 = vmatprep.mubr.msk.f32.mxu0 %vm355_vm1, %v335_v57 }
  0x85   : > { %5317 = vmatmul.mubr.msk.f32.gmra.mrb[52].mxu0 %vm355_vm1, %v336_v58 }
  0x86   : > { %5319 = vmatprep.mubr.msk.f32.mxu0 %vm355_vm1, %v337_v59 }
  0x89   : > { %5320 = vmatmul.mubr.msk.f32.gmra.mrb[54].mxu0 %vm355_vm1, %v338_v60 }
  0x8a   : > { %5322 = vmatprep.mubr.msk.f32.mxu0 %vm355_vm1, %v339_v61 }
  0x8d   : > { %5323 = vmatmul.mubr.msk.f32.gmra.mrb[56].mxu0 %vm355_vm1, %v340_v62  ;;  %v5075_v62 = vcombine.high %v1563_v54, %v1567_v55  ;;  %v5115_v54 = vcombine.high %v1603_v45, %v1607_v46 }
  0x8e   : > { %5325 = vmatprep.mubr.msk.f32.mxu0 %vm355_vm1, %v341_v63 }
  0x91   : > { %5326 = vmatmul.mubr.msk.f32.gmra.mrb[58].mxu0 %vm355_vm1, %v342_v0  ;;  %v1571_v0 = vld [vmem:[%s7343_s5 + $0x88] sm:$0xff] }
  0x92   : > { %5328 = vmatprep.mubr.msk.f32.mxu0 %vm355_vm1, %v343_v1  ;;  %v1575_v1 = vld [vmem:[%s7343_s5 + $0xa8] sm:$0xff] }
  0x93   : > { %v5083_v12 = vcombine.high %v1571_v0, %v1575_v1  ;;  %v5082_v17 = vcombine.low %v1571_v0, %v1575_v1 }
  0x95   : > { %5329 = vmatmul.mubr.msk.f32.gmra.mrb[60].mxu0 %vm355_vm1, %v344_v2 }
  0x96   : > { %5331 = vmatprep.mubr.msk.f32.mxu0 %vm355_vm1, %v345_v3 }
  0x99   : > { %5332 = vmatmul.mubr.msk.f32.gmra.mrb[62].mxu0 %vm355_vm1, %v346_v4 }
  0xf0   : > { %v5240_v38 = vpop.f32.mrb[0].mxu0 }
  0xf1   : > { %v624_v39 = vadd.f32 %v5240_v38, %v5813_v37  ;;  %v618_v40 = vpop.f32.mrb[1].mxu0 }
  0xf2   : > { %v619_v41 = vadd.f32 %v5813_v37, %v618_v40  ;;  %v5098_v40 = vcombine.low %v1587_v22, %v1591_v23 }
  0xf3   : > { %v938_v44 = vmax.f32 %v624_v39, 0.0 }
  0xf4   : > { %v5243_v47 = vpop.f32.mrb[2].mxu0  ;;  %v937_v48 = vmax.f32 %v619_v41, 0.0 }
  0xf5   : > { %v634_v49 = vadd.f32 %v5243_v47, %v5813_v37  ;;  %v628_v50 = vpop.f32.mrb[3].mxu0 }
  0xf6   : > { %v629_v51 = vadd.f32 %v5813_v37, %v628_v50  ;;  %v1001_v52 = vpack.c.bf16 %v938_v44, %v937_v48 }
  0xf7   : > { %v940_v53 = vmax.f32 %v634_v49, 0.0 }
  0xf8   : > { %v939_v56 = vmax.f32 %v629_v51, 0.0  ;;  %5342 = vmatprep.mubr.msk.bf16.mxu1 %vm1072_vm2, %v1001_v52  ;;  %v5246_v57 = vpop.f32.mrb[4].mxu0  ;;  %v5106_v51 = vcombine.low %v1595_v33, %v1599_v34 }
  0xf9   : > { %v644_v58 = vadd.f32 %v5246_v57, %v5813_v37  ;;  %v638_v59 = vpop.f32.mrb[5].mxu0  ;;  %v1615_v57 = vld [vmem:[%s7343_s5 + $0x1e8] sm:$0xff] }
  0xfa   : > { %v1002_v60 = vpack.c.bf16 %v940_v53, %v939_v56  ;;  %v639_v61 = vadd.f32 %v5813_v37, %v638_v59  ;;  %v1611_v56 = vld [vmem:[%s7343_s5 + $0x1c8] sm:$0xff] }
  0xfb   : > { %v942_v63 = vmax.f32 %v644_v58, 0.0  ;;  %v5123_v1 = vcombine.high %v1611_v56, %v1615_v57 }
  0xfc   : > { %5343 = vmatmul.mubr.msk.bf16.vlgmr.msra.gmra.mrb[0].mxu1 %vm1072_vm2, %v1002_v60  ;;  %v941_v2 = vmax.f32 %v639_v61, 0.0  ;;  %v5249_v3 = vpop.f32.mrb[6].mxu0 }
  0xfd   : > { %v654_v4 = vadd.f32 %v5249_v3, %v5813_v37  ;;  %v648_v5 = vpop.f32.mrb[7].mxu0  ;;  %2334 = vmatpush1.bf16.msra.mxu1 %v5066_v11 }
  0xfe   : > { %v1003_v8 = vpack.c.bf16 %v942_v63, %v941_v2  ;;  %v649_v9 = vadd.f32 %v5813_v37, %v648_v5  ;;  %2335 = vmatprep.subr.bf16.mxu1 %v5075_v62  ;;  %v5114_v62 = vcombine.low %v1603_v45, %v1607_v46 }
  0xff   : > { %v944_v13 = vmax.f32 %v654_v4, 0.0 }
 0x100   : > { %v943_v16 = vmax.f32 %v649_v9, 0.0  ;;  %5346 = vmatprep.mubr.msk.bf16.mxu1 %vm1072_vm2, %v1003_v8  ;;  %v5252_v7 = vpop.f32.mrb[8].mxu0  ;;  %v5122_v8 = vcombine.low %v1611_v56, %v1615_v57 }
 0x101   : > { %v664_v10 = vadd.f32 %v5252_v7, %v5813_v37  ;;  %v658_v11 = vpop.f32.mrb[9].mxu0  ;;  %2336 = vmatpush1.bf16.msra.mxu1 %v5074_v6 }
 0x102   : > { %v1004_v18 = vpack.c.bf16 %v944_v13, %v943_v16  ;;  %v659_v19 = vadd.f32 %v5813_v37, %v658_v11  ;;  %2337 = vmatprep.subr.bf16.mxu1 %v5083_v12 }
 0x103   : > { %v946_v21 = vmax.f32 %v664_v10, 0.0 }
 0x104   : > { %5347 = vmatmul.mubr.msk.bf16.gmra.mrb[4].mxu1 %vm1072_vm2, %v1004_v18  ;;  %v945_v24 = vmax.f32 %v659_v19, 0.0  ;;  %v5255_v25 = vpop.f32.mrb[10].mxu0 }
 0x105   : > { %v674_v26 = vadd.f32 %v5255_v25, %v5813_v37  ;;  %v668_v27 = vpop.f32.mrb[11].mxu0  ;;  %2338 = vmatpush1.bf16.msra.mxu1 %v5082_v17 }
 0x106   : > { %v1005_v29 = vpack.c.bf16 %v946_v21, %v945_v24  ;;  %v669_v30 = vadd.f32 %v5813_v37, %v668_v27  ;;  %2339 = vmatprep.subr.bf16.mxu1 %v5091_v20 }
 0x107   : > { %v948_v32 = vmax.f32 %v674_v26, 0.0 }
 0x108   : > { %v947_v35 = vmax.f32 %v669_v30, 0.0  ;;  %5350 = vmatprep.mubr.msk.bf16.mxu1 %vm1072_vm2, %v1005_v29  ;;  %v5258_v36 = vpop.f32.mrb[12].mxu0 }
 0x109   : > { %v684_v38 = vadd.f32 %v5258_v36, %v5813_v37  ;;  %v678_v39 = vpop.f32.mrb[13].mxu0  ;;  %2340 = vmatpush1.bf16.msra.mxu1 %v5090_v28 }
 0x10a   : > { %v1006_v41 = vpack.c.bf16 %v948_v32, %v947_v35  ;;  %v679_v42 = vadd.f32 %v5813_v37, %v678_v39  ;;  %2341 = vmatprep.subr.bf16.mxu1 %v5099_v31 }
 0x10b   : > { %v950_v44 = vmax.f32 %v684_v38, 0.0 }
 0x10c   : > { %5351 = vmatmul.mubr.msk.bf16.gmra.mrb[8].mxu1 %vm1072_vm2, %v1006_v41  ;;  %v949_v47 = vmax.f32 %v679_v42, 0.0  ;;  %v5261_v48 = vpop.f32.mrb[14].mxu0 }
 0x10d   : > { %v694_v49 = vadd.f32 %v5261_v48, %v5813_v37  ;;  %v688_v50 = vpop.f32.mrb[15].mxu0  ;;  %2342 = vmatpush1.bf16.msra.mxu1 %v5098_v40 }
 0x10e   : > { %v1007_v52 = vpack.c.bf16 %v950_v44, %v949_v47  ;;  %v689_v53 = vadd.f32 %v5813_v37, %v688_v50  ;;  %2343 = vmatprep.subr.bf16.mxu1 %v5107_v43 }
 0x10f   : > { %v952_v55 = vmax.f32 %v694_v49, 0.0 }
 0x110   : > { %v951_v58 = vmax.f32 %v689_v53, 0.0  ;;  %5354 = vmatprep.mubr.msk.bf16.mxu1 %vm1072_vm2, %v1007_v52  ;;  %v5264_v59 = vpop.f32.mrb[16].mxu0 }
 0x111   : > { %v704_v60 = vadd.f32 %v5264_v59, %v5813_v37  ;;  %v698_v61 = vpop.f32.mrb[17].mxu0  ;;  %2344 = vmatpush1.bf16.msra.mxu1 %v5106_v51 }
 0x112   : > { %v1008_v63 = vpack.c.bf16 %v952_v55, %v951_v58  ;;  %v699_v0 = vadd.f32 %v5813_v37, %v698_v61  ;;  %2345 = vmatprep.subr.bf16.mxu1 %v5115_v54 }
 0x113   : > { %v954_v2 = vmax.f32 %v704_v60, 0.0 }
 0x114   : > { %5355 = vmatmul.mubr.msk.bf16.gmra.mrb[12].mxu1 %vm1072_vm2, %v1008_v63  ;;  %v953_v3 = vmax.f32 %v699_v0, 0.0  ;;  %v5267_v4 = vpop.f32.mrb[18].mxu0 }
 0x115   : > { %v714_v5 = vadd.f32 %v5267_v4, %v5813_v37  ;;  %v708_v6 = vpop.f32.mrb[19].mxu0  ;;  %2346 = vmatpush1.bf16.msra.mxu1 %v5114_v62 }
 0x116   : > { %v1009_v9 = vpack.c.bf16 %v954_v2, %v953_v3  ;;  %v709_v12 = vadd.f32 %v5813_v37, %v708_v6  ;;  %2347 = vmatprep.subr.bf16.mxu1 %v5123_v1 }
 0x117   : > { %v956_v13 = vmax.f32 %v714_v5, 0.0 }
 0x118   : > { %v955_v14 = vmax.f32 %v709_v12, 0.0  ;;  %5358 = vmatprep.mubr.msk.bf16.mxu1 %vm1072_vm2, %v1009_v9  ;;  %v5270_v15 = vpop.f32.mrb[20].mxu0 }
 0x119   : > { %v724_v16 = vadd.f32 %v5270_v15, %v5813_v37  ;;  %v718_v7 = vpop.f32.mrb[21].mxu0  ;;  %2348 = vmatpush1.bf16.msra.mxu1 %v5122_v8 }
 0x11a   : > { %v1010_v10 = vpack.c.bf16 %v956_v13, %v955_v14  ;;  %v719_v11 = vadd.f32 %v5813_v37, %v718_v7 }
 0x11b   : > { %v958_v17 = vmax.f32 %v724_v16, 0.0 }
 0x11c   : > { %5359 = vmatmul.mubr.msk.bf16.gmra.mrb[16].mxu1 %vm1072_vm2, %v1010_v10  ;;  %v957_v18 = vmax.f32 %v719_v11, 0.0  ;;  %v5273_v19 = vpop.f32.mrb[22].mxu0 }
 0x11d   : > { %v734_v20 = vadd.f32 %v5273_v19, %v5813_v37  ;;  %v728_v21 = vpop.f32.mrb[23].mxu0 }
 0x11e   : > { %v1011_v22 = vpack.c.bf16 %v958_v17, %v957_v18  ;;  %v729_v23 = vadd.f32 %v5813_v37, %v728_v21 }
 0x11f   : > { %v960_v24 = vmax.f32 %v734_v20, 0.0 }
 0x120   : > { %v959_v25 = vmax.f32 %v729_v23, 0.0  ;;  %5362 = vmatprep.mubr.msk.bf16.mxu1 %vm1072_vm2, %v1011_v22  ;;  %v5276_v26 = vpop.f32.mrb[24].mxu0 }
 0x121   : > { %v744_v27 = vadd.f32 %v5276_v26, %v5813_v37  ;;  %v738_v28 = vpop.f32.mrb[25].mxu0 }
 0x122   : > { %v1012_v29 = vpack.c.bf16 %v960_v24, %v959_v25  ;;  %v739_v30 = vadd.f32 %v5813_v37, %v738_v28 }
 0x123   : > { %v962_v31 = vmax.f32 %v744_v27, 0.0 }
 0x124   : > { %5363 = vmatmul.mubr.msk.bf16.gmra.mrb[20].mxu1 %vm1072_vm2, %v1012_v29  ;;  %v961_v32 = vmax.f32 %v739_v30, 0.0  ;;  %v5279_v33 = vpop.f32.mrb[26].mxu0 }
 0x125   : > { %v754_v34 = vadd.f32 %v5279_v33, %v5813_v37  ;;  %v748_v35 = vpop.f32.mrb[27].mxu0 }
 0x126   : > { %v1013_v36 = vpack.c.bf16 %v962_v31, %v961_v32  ;;  %v749_v38 = vadd.f32 %v5813_v37, %v748_v35 }
 0x127   : > { %v964_v39 = vmax.f32 %v754_v34, 0.0 }
 0x128   : > { %v963_v40 = vmax.f32 %v749_v38, 0.0  ;;  %5366 = vmatprep.mubr.msk.bf16.mxu1 %vm1072_vm2, %v1013_v36  ;;  %v5282_v41 = vpop.f32.mrb[28].mxu0 }
 0x129   : > { %v764_v42 = vadd.f32 %v5282_v41, %v5813_v37  ;;  %v758_v43 = vpop.f32.mrb[29].mxu0 }
 0x12a   : > { %v1014_v44 = vpack.c.bf16 %v964_v39, %v963_v40  ;;  %v759_v45 = vadd.f32 %v5813_v37, %v758_v43 }
 0x12b   : > { %v966_v46 = vmax.f32 %v764_v42, 0.0 }
 0x12c   : > { %5367 = vmatmul.mubr.msk.bf16.gmra.mrb[24].mxu1 %vm1072_vm2, %v1014_v44  ;;  %v965_v47 = vmax.f32 %v759_v45, 0.0  ;;  %v5285_v48 = vpop.f32.mrb[30].mxu0 }
 0x12d   : > { %v774_v49 = vadd.f32 %v5285_v48, %v5813_v37  ;;  %v768_v50 = vpop.f32.mrb[31].mxu0 }
 0x12e   : > { %v1015_v51 = vpack.c.bf16 %v966_v46, %v965_v47  ;;  %v769_v52 = vadd.f32 %v5813_v37, %v768_v50 }
 0x12f   : > { %v968_v53 = vmax.f32 %v774_v49, 0.0 }
 0x130   : > { %v967_v54 = vmax.f32 %v769_v52, 0.0  ;;  %5370 = vmatprep.mubr.msk.bf16.mxu1 %vm1072_vm2, %v1015_v51  ;;  %v5288_v55 = vpop.f32.mrb[32].mxu0 }
 0x131   : > { %v784_v56 = vadd.f32 %v5288_v55, %v5813_v37  ;;  %v778_v57 = vpop.f32.mrb[33].mxu0 }
 0x132   : > { %v1016_v58 = vpack.c.bf16 %v968_v53, %v967_v54  ;;  %v779_v59 = vadd.f32 %v5813_v37, %v778_v57 }
 0x133   : > { %v970_v60 = vmax.f32 %v784_v56, 0.0 }
 0x134   : > { %5371 = vmatmul.mubr.msk.bf16.gmra.mrb[28].mxu1 %vm1072_vm2, %v1016_v58  ;;  %v969_v61 = vmax.f32 %v779_v59, 0.0  ;;  %v5291_v62 = vpop.f32.mrb[34].mxu0 }
 0x135   : > { %v794_v63 = vadd.f32 %v5291_v62, %v5813_v37  ;;  %v788_v0 = vpop.f32.mrb[35].mxu0  ;;  %v5950_v62 = vld [vmem:[%s7343_s5 + $0x30] sm:$0xff] }
 0x136   : > { %v1017_v1 = vpack.c.bf16 %v970_v60, %v969_v61  ;;  %v789_v2 = vadd.f32 %v5813_v37, %v788_v0  ;;  %v5945_v61 = vld [vmem:[%s7343_s5 + $0x10] sm:$0xff] }
 0x137   : > { %v972_v3 = vmax.f32 %v794_v63, 0.0  ;;  %v5955_v63 = vld [vmem:[%s7343_s5 + $0x18] sm:$0xff] }
 0x138   : > { %v971_v4 = vmax.f32 %v789_v2, 0.0  ;;  %5374 = vmatprep.mubr.msk.bf16.mxu1 %vm1072_vm2, %v1017_v1  ;;  %v5294_v5 = vpop.f32.mrb[36].mxu0  ;;  %v7346_v2 = vmov 0  }
 0x139   : > { %v804_v6 = vadd.f32 %v5294_v5, %v5813_v37  ;;  %v798_v8 = vpop.f32.mrb[37].mxu0  ;;  %2012 = vmatprep.mubr.bf16.mxu0 %v7346_v2  ;;  %v5966_v5 = vld [vmem:[%s7343_s5 + $0x38] sm:$0xff] }
 0x13a   : > { %v1018_v9 = vpack.c.bf16 %v972_v3, %v971_v4  ;;  %v799_v12 = vadd.f32 %v5813_v37, %v798_v8  ;;  %v5068_v3 = vcombine.low %v5945_v61, %v5950_v62  ;;  %v5069_v4 = vcombine.high %v5945_v61, %v5950_v62 }
 0x13b   : > { %v974_v13 = vmax.f32 %v804_v6, 0.0 }
 0x13c   : > { %5375 = vmatmul.mubr.msk.bf16.gmra.mrb[32].mxu1 %vm1072_vm2, %v1018_v9  ;;  %v973_v14 = vmax.f32 %v799_v12, 0.0  ;;  %v5297_v15 = vpop.f32.mrb[38].mxu0  ;;  %v5070_v9 = vcombine.low %v5955_v63, %v5966_v5  ;;  %v5071_v12 = vcombine.high %v5955_v63, %v5966_v5  ;;  %2686 = vmatprep.subr.bf16.mxu0 %v5069_v4  ;;  %v1580_v63 = vld [vmem:[%s7343_s5 + $0xd0] sm:$0xff] }
 0x13d   : > { %v814_v16 = vadd.f32 %v5297_v15, %v5813_v37  ;;  %v808_v7 = vpop.f32.mrb[39].mxu0  ;;  %v1584_v5 = vld [vmem:[%s7343_s5 + $0xf0] sm:$0xff] }
 0x13e   : > { %v1019_v10 = vpack.c.bf16 %v974_v13, %v973_v14  ;;  %v809_v11 = vadd.f32 %v5813_v37, %v808_v7  ;;  %3039 = vmatprep.subr.bf16.mxu1 %v5071_v12  ;;  %v1569_v12 = vld [vmem:[%s7343_s5 + $0x78] sm:$0xff] }
 0x13f   : > { %v976_v17 = vmax.f32 %v814_v16, 0.0 }
 0x140   : > { %v975_v18 = vmax.f32 %v809_v11, 0.0  ;;  %5378 = vmatprep.mubr.msk.bf16.mxu1 %vm1072_vm2, %v1019_v10  ;;  %v5300_v19 = vpop.f32.mrb[40].mxu0 }
 0x141   : > { %v824_v20 = vadd.f32 %v5300_v19, %v5813_v37  ;;  %v818_v21 = vpop.f32.mrb[41].mxu0 }
 0x142   : > { %v1020_v22 = vpack.c.bf16 %v976_v17, %v975_v18  ;;  %v819_v23 = vadd.f32 %v5813_v37, %v818_v21 }
 0x143   : > { %v978_v24 = vmax.f32 %v824_v20, 0.0 }
 0x144   : > { %5379 = vmatmul.mubr.msk.bf16.gmra.mrb[36].mxu1 %vm1072_vm2, %v1020_v22  ;;  %v977_v25 = vmax.f32 %v819_v23, 0.0  ;;  %v5303_v26 = vpop.f32.mrb[42].mxu0 }
 0x145   : > { %v834_v27 = vadd.f32 %v5303_v26, %v5813_v37  ;;  %v828_v28 = vpop.f32.mrb[43].mxu0 }
 0x146   : > { %v1021_v29 = vpack.c.bf16 %v978_v24, %v977_v25  ;;  %v829_v30 = vadd.f32 %v5813_v37, %v828_v28 }
 0x147   : > { %v980_v31 = vmax.f32 %v834_v27, 0.0 }
 0x148   : > { %v979_v32 = vmax.f32 %v829_v30, 0.0  ;;  %5382 = vmatprep.mubr.msk.bf16.mxu1 %vm1072_vm2, %v1021_v29  ;;  %v5306_v33 = vpop.f32.mrb[44].mxu0 }
 0x149   : > { %v844_v34 = vadd.f32 %v5306_v33, %v5813_v37  ;;  %v838_v35 = vpop.f32.mrb[45].mxu0 }
 0x14a   : > { %v1022_v36 = vpack.c.bf16 %v980_v31, %v979_v32  ;;  %v839_v38 = vadd.f32 %v5813_v37, %v838_v35 }
 0x14b   : > { %v982_v39 = vmax.f32 %v844_v34, 0.0 }
 0x14c   : > { %5383 = vmatmul.mubr.msk.bf16.gmra.mrb[40].mxu1 %vm1072_vm2, %v1022_v36  ;;  %v981_v40 = vmax.f32 %v839_v38, 0.0  ;;  %v5309_v41 = vpop.f32.mrb[46].mxu0 }
 0x14d   : > { %v854_v42 = vadd.f32 %v5309_v41, %v5813_v37  ;;  %v848_v43 = vpop.f32.mrb[47].mxu0 }
 0x14e   : > { %v1023_v44 = vpack.c.bf16 %v982_v39, %v981_v40  ;;  %v849_v45 = vadd.f32 %v5813_v37, %v848_v43 }
 0x14f   : > { %v984_v46 = vmax.f32 %v854_v42, 0.0 }
 0x150   : > { %v983_v47 = vmax.f32 %v849_v45, 0.0  ;;  %5386 = vmatprep.mubr.msk.bf16.mxu1 %vm1072_vm2, %v1023_v44  ;;  %v5312_v48 = vpop.f32.mrb[48].mxu0 }
 0x151   : > { %v864_v49 = vadd.f32 %v5312_v48, %v5813_v37  ;;  %v858_v50 = vpop.f32.mrb[49].mxu0 }
 0x152   : > { %v1024_v51 = vpack.c.bf16 %v984_v46, %v983_v47  ;;  %v859_v52 = vadd.f32 %v5813_v37, %v858_v50 }
 0x153   : > { %v986_v53 = vmax.f32 %v864_v49, 0.0 }
 0x154   : > { %5387 = vmatmul.mubr.msk.bf16.gmra.mrb[44].mxu1 %vm1072_vm2, %v1024_v51  ;;  %v985_v54 = vmax.f32 %v859_v52, 0.0  ;;  %v5315_v55 = vpop.f32.mrb[50].mxu0  ;;  %v5995_v51 = vld [vmem:[%s7342_s4] ss:$0 sm:$0xff] }
 0x155   : > { %v874_v56 = vadd.f32 %v5315_v55, %v5813_v37  ;;  %v868_v57 = vpop.f32.mrb[51].mxu0 }
 0x156   : > { %v1025_v58 = vpack.c.bf16 %v986_v53, %v985_v54  ;;  %v869_v59 = vadd.f32 %v5813_v37, %v868_v57 }
 0x157   : > { %v988_v60 = vmax.f32 %v874_v56, 0.0 }
 0x158   : > { %v987_v0 = vmax.f32 %v869_v59, 0.0  ;;  %v5318_v1 = vpop.f32.mrb[52].mxu0  ;;  %5390 = vmatprep.mubr.msk.bf16.mxu1 %vm1072_vm2, %v1025_v58 }
 0x159   : > { %v884_v6 = vadd.f32 %v5318_v1, %v5813_v37  ;;  %v878_v8 = vpop.f32.mrb[53].mxu0 }
 0x15a   : > { %v1026_v13 = vpack.c.bf16 %v988_v60, %v987_v0  ;;  %v879_v14 = vadd.f32 %v5813_v37, %v878_v8  ;;  %v1564_v0 = vld [vmem:[%s7343_s5 + $0x50] sm:$0xff]  ;;  %v1565_v8 = vld [vmem:[%s7343_s5 + $0x58] sm:$0xff] }
 0x15b   : > { %v990_v15 = vmax.f32 %v884_v6, 0.0  ;;  %v1568_v6 = vld [vmem:[%s7343_s5 + $0x70] sm:$0xff] }
 0x15c   : > { %v989_v16 = vmax.f32 %v879_v14, 0.0  ;;  %v5321_v7 = vpop.f32.mrb[54].mxu0  ;;  %5391 = vmatmul.mubr.msk.bf16.gmra.mrb[48].mxu1 %vm1072_vm2, %v1026_v13 }
 0x15d   : > { %v894_v10 = vadd.f32 %v5321_v7, %v5813_v37  ;;  %v888_v11 = vpop.f32.mrb[55].mxu0 }
 0x15e   : > { %v1027_v17 = vpack.c.bf16 %v990_v15, %v989_v16  ;;  %v889_v18 = vadd.f32 %v5813_v37, %v888_v11  ;;  %v1572_v16 = vld [vmem:[%s7343_s5 + $0x90] sm:$0xff]  ;;  %v5077_v11 = vcombine.high %v1564_v0, %v1568_v6 }
 0x15f   : > { %v992_v19 = vmax.f32 %v894_v10, 0.0 }
 0x160   : > { %v991_v20 = vmax.f32 %v889_v18, 0.0  ;;  %v5324_v21 = vpop.f32.mrb[56].mxu0  ;;  %5394 = vmatprep.mubr.msk.bf16.mxu1 %vm1072_vm2, %v1027_v17  ;;  %v5079_v17 = vcombine.high %v1565_v8, %v1569_v12  ;;  %v1576_v18 = vld [vmem:[%s7343_s5 + $0xb0] sm:$0xff] }
 0x161   : > { %v904_v22 = vadd.f32 %v5324_v21, %v5813_v37  ;;  %v898_v23 = vpop.f32.mrb[57].mxu0 }
 0x162   : > { %v1028_v24 = vpack.c.bf16 %v992_v19, %v991_v20  ;;  %v899_v25 = vadd.f32 %v5813_v37, %v898_v23  ;;  %v1573_v19 = vld [vmem:[%s7343_s5 + $0x98] sm:$0xff] }
 0x163   : > { %v994_v26 = vmax.f32 %v904_v22, 0.0  ;;  %v1577_v20 = vld [vmem:[%s7343_s5 + $0xb8] sm:$0xff] }
 0x164   : > { %v993_v27 = vmax.f32 %v899_v25, 0.0  ;;  %v5327_v28 = vpop.f32.mrb[58].mxu0  ;;  %5395 = vmatmul.mubr.msk.bf16.gmra.mrb[52].mxu1 %vm1072_vm2, %v1028_v24  ;;  %v5087_v61 = vcombine.high %v1573_v19, %v1577_v20 }
 0x165   : > { %v914_v29 = vadd.f32 %v5327_v28, %v5813_v37  ;;  %v908_v30 = vpop.f32.mrb[59].mxu0 }
 0x166   : > { %v1029_v31 = vpack.c.bf16 %v994_v26, %v993_v27  ;;  %v909_v32 = vadd.f32 %v5813_v37, %v908_v30  ;;  %v5076_v26 = vcombine.low %v1564_v0, %v1568_v6  ;;  %v5078_v27 = vcombine.low %v1565_v8, %v1569_v12 }
 0x167   : > { %v996_v33 = vmax.f32 %v914_v29, 0.0  ;;  %v5085_v30 = vcombine.high %v1572_v16, %v1576_v18 }
 0x168   : > { %v995_v34 = vmax.f32 %v909_v32, 0.0  ;;  %v5330_v35 = vpop.f32.mrb[60].mxu0  ;;  %5398 = vmatprep.mubr.msk.bf16.mxu1 %vm1072_vm2, %v1029_v31  ;;  %v1585_v31 = vld [vmem:[%s7343_s5 + $0xf8] sm:$0xff] }
 0x169   : > { %v924_v36 = vadd.f32 %v5330_v35, %v5813_v37  ;;  %v918_v38 = vpop.f32.mrb[61].mxu0  ;;  %v5084_v35 = vcombine.low %v1572_v16, %v1576_v18 }
 0x16a   : > { %v1030_v39 = vpack.c.bf16 %v996_v33, %v995_v34  ;;  %v919_v40 = vadd.f32 %v5813_v37, %v918_v38 }
 0x16b   : > { %v998_v41 = vmax.f32 %v924_v36, 0.0  ;;  %v5086_v36 = vcombine.low %v1573_v19, %v1577_v20 }
 0x16c   : > { %v997_v42 = vmax.f32 %v919_v40, 0.0  ;;  %v5333_v43 = vpop.f32.mrb[62].mxu0  ;;  %5399 = vmatmul.mubr.msk.bf16.gmra.mrb[56].mxu1 %vm1072_vm2, %v1030_v39  ;;  %v5093_v40 = vcombine.high %v1580_v63, %v1584_v5 }
 0x16d   : > { %v934_v44 = vadd.f32 %v5333_v43, %v5813_v37  ;;  %v928_v45 = vpop.f32.mrb[63].mxu0 }
 0x16e   : > { %v1031_v46 = vpack.c.bf16 %v998_v41, %v997_v42  ;;  %v929_v47 = vadd.f32 %v5813_v37, %v928_v45  ;;  %v1588_v42 = vld [vmem:[%s7343_s5 + $0x110] sm:$0xff] }
 0x16f   : > { %v1000_v48 = vmax.f32 %v934_v44, 0.0  ;;  %v1592_v45 = vld [vmem:[%s7343_s5 + $0x130] sm:$0xff] }
 0x170   : > { %v999_v49 = vmax.f32 %v929_v47, 0.0  ;;  %5402 = vmatprep.mubr.msk.bf16.mxu1 %vm1072_vm2, %v1031_v46  ;;  %v1589_v46 = vld [vmem:[%s7343_s5 + $0x118] sm:$0xff] }
 0x171   : > { %v1593_v47 = vld [vmem:[%s7343_s5 + $0x138] sm:$0xff] }
 0x172   : > { %v1032_v50 = vpack.c.bf16 %v1000_v48, %v999_v49 }
 0x174   : > { %5403 = vmatmul.mubr.msk.bf16.gmra.mrb[60].mxu1 %vm1072_vm2, %v1032_v50 }
 0x175   : > { %2365 = vmatprep.mubr.bf16.mxu1 %v7346_v2 }
 0x1cf   : > { %v5344_v52 = vpop.f32.mrb[0].mxu1 }
 0x1d0   : > { %v1212_v53 = vadd.f32 %v5344_v52, %v5995_v51  ;;  %v1203_v54 = vpop.f32.mrb[1].mxu1 }
 0x1d1   : > { %v1204_v37 = vadd.f32 %v5995_v51, %v1203_v54  ;;  %v5345_v55 = vpop.f32.mrb[2].mxu1  ;;  %v5092_v54 = vcombine.low %v1580_v63, %v1584_v5 }
 0x1d2   : > { %v1215_v56 = vadd.f32 %v5345_v55, %v5995_v51  ;;  %v1206_v57 = vpop.f32.mrb[3].mxu1  ;;  %v1460_v59 = vmax.f32 %v1212_v53, 0.0 }
 0x1d3   : > { %v1207_v58 = vadd.f32 %v5995_v51, %v1206_v57  ;;  %v1458_v1 = vmax.f32 %v1204_v37, 0.0  ;;  %v5103_v57 = vcombine.high %v1589_v46, %v1593_v47 }
 0x1d4   : > { %v1461_v60 = vmax.f32 %v1215_v56, 0.0  ;;  %v5101_v56 = vcombine.high %v1588_v42, %v1592_v45 }
 0x1d5   : > { %v1459_v4 = vmax.f32 %v1207_v58, 0.0 }
 0x1d6   : > { %v6013_v13 = vpack.c.bf16 %v1461_v60, %v1460_v59 }
 0x1d7   : > { %v6015_v14 = vpack.c.bf16 %v1459_v4, %v1458_v1  ;;  %v5348_v15 = vpop.f32.mrb[4].mxu1  ;;  %v5100_v1 = vcombine.low %v1588_v42, %v1592_v45  ;;  %v5102_v4 = vcombine.low %v1589_v46, %v1593_v47 }
 0x1d8   : > { %v1228_v7 = vadd.f32 %v5348_v15, %v5995_v51  ;;  %v1219_v10 = vpop.f32.mrb[5].mxu1 }
 0x1d9   : > { %2013 = vmatmul.mubr.bf16.vlgmr.msra.gmra.mrb[64].mxu0 %v6015_v14  ;;  %2366 = vmatmul.mubr.bf16.vlgmr.msra.gmra.mrb[64].mxu1 %v6015_v14  ;;  %v1220_v21 = vadd.f32 %v5995_v51, %v1219_v10  ;;  %v5349_v22 = vpop.f32.mrb[6].mxu1 }
 0x1da   : > { %2687 = vmatpush1.bf16.msra.mxu0 %v5068_v3  ;;  %3040 = vmatpush1.bf16.msra.mxu1 %v5070_v9  ;;  %v1464_v23 = vmax.f32 %v1228_v7, 0.0  ;;  %v1231_v24 = vadd.f32 %v5349_v22, %v5995_v51  ;;  %v1222_v25 = vpop.f32.mrb[7].mxu1  ;;  %v1581_v9 = vld [vmem:[%s7343_s5 + $0xd8] sm:$0xff] }
 0x1db   : > { %v1462_v28 = vmax.f32 %v1220_v21, 0.0  ;;  %v1223_v29 = vadd.f32 %v5995_v51, %v1222_v25  ;;  %2022 = vmatprep.mubr.bf16.mxu0 %v7346_v2  ;;  %2375 = vmatprep.mubr.bf16.mxu1 %v7346_v2  ;;  %v5095_v41 = vcombine.high %v1581_v9, %v1585_v31  ;;  %v5094_v37 = vcombine.low %v1581_v9, %v1585_v31  ;;  %v1601_v31 = vld [vmem:[%s7343_s5 + $0x178] sm:$0xff] }
 0x1dc   : > { %v1465_v62 = vmax.f32 %v1231_v24, 0.0  ;;  %2688 = vmatprep.subr.bf16.mxu0 %v5077_v11  ;;  %3041 = vmatprep.subr.bf16.mxu1 %v5079_v17 }
 0x1dd   : > { %v1463_v3 = vmax.f32 %v1223_v29, 0.0 }
 0x1de   : > { %v6055_v32 = vpack.c.bf16 %v1465_v62, %v1464_v23  ;;  %2689 = vmatpush1.bf16.msra.mxu0 %v5076_v26  ;;  %3042 = vmatpush1.bf16.msra.mxu1 %v5078_v27  ;;  %v1597_v62 = vld [vmem:[%s7343_s5 + $0x158] sm:$0xff] }
 0x1df   : > { %v6057_v33 = vpack.c.bf16 %v1463_v3, %v1462_v28  ;;  %v5352_v34 = vpop.f32.mrb[8].mxu1  ;;  %2690 = vmatprep.subr.bf16.mxu0 %v5085_v30  ;;  %3043 = vmatprep.subr.bf16.mxu1 %v5087_v61  ;;  %v1596_v30 = vld [vmem:[%s7343_s5 + $0x150] sm:$0xff] }
 0x1e0   : > { %v1244_v38 = vadd.f32 %v5352_v34, %v5995_v51  ;;  %v1235_v39 = vpop.f32.mrb[9].mxu1  ;;  %v1600_v61 = vld [vmem:[%s7343_s5 + $0x170] sm:$0xff] }
 0x1e1   : > { %2023 = vmatmul.mubr.bf16.gmra.mrb[68].mxu0 %v6013_v13  ;;  %2376 = vmatmul.mubr.bf16.gmra.mrb[68].mxu1 %v6013_v13  ;;  %v1236_v43 = vadd.f32 %v5995_v51, %v1235_v39  ;;  %v5353_v44 = vpop.f32.mrb[10].mxu1  ;;  %v5108_v5 = vcombine.low %v1596_v30, %v1600_v61  ;;  %v5109_v9 = vcombine.high %v1596_v30, %v1600_v61 }
 0x1e2   : > { %2032 = vmatprep.mubr.bf16.mxu0 %v7346_v2  ;;  %2385 = vmatprep.mubr.bf16.mxu1 %v7346_v2  ;;  %v1468_v48 = vmax.f32 %v1244_v38, 0.0  ;;  %v1247_v49 = vadd.f32 %v5353_v44, %v5995_v51  ;;  %v1238_v50 = vpop.f32.mrb[11].mxu1 }
 0x1e3   : > { %v1466_v52 = vmax.f32 %v1236_v43, 0.0  ;;  %v1239_v53 = vadd.f32 %v5995_v51, %v1238_v50  ;;  %2691 = vmatpush1.bf16.msra.mxu0 %v5084_v35  ;;  %3044 = vmatpush1.bf16.msra.mxu1 %v5086_v36  ;;  %v5110_v35 = vcombine.low %v1597_v62, %v1601_v31  ;;  %v5111_v36 = vcombine.high %v1597_v62, %v1601_v31 }
 0x1e4   : > { %v1469_v55 = vmax.f32 %v1247_v49, 0.0  ;;  %2692 = vmatprep.subr.bf16.mxu0 %v5093_v40  ;;  %3045 = vmatprep.subr.bf16.mxu1 %v5095_v41 }
 0x1e5   : > { %v1467_v58 = vmax.f32 %v1239_v53, 0.0 }
 0x1e6   : > { %v6079_v59 = vpack.c.bf16 %v1469_v55, %v1468_v48 }
 0x1e7   : > { %v6081_v60 = vpack.c.bf16 %v1467_v58, %v1466_v52  ;;  %v5356_v0 = vpop.f32.mrb[12].mxu1  ;;  %2693 = vmatpush1.bf16.msra.mxu0 %v5092_v54  ;;  %3046 = vmatpush1.bf16.msra.mxu1 %v5094_v37 }
 0x1e8   : > { %v1260_v6 = vadd.f32 %v5356_v0, %v5995_v51  ;;  %v1251_v8 = vpop.f32.mrb[13].mxu1  ;;  %2694 = vmatprep.subr.bf16.mxu0 %v5101_v56  ;;  %3047 = vmatprep.subr.bf16.mxu1 %v5103_v57 }
 0x1e9   : > { %2033 = vmatmul.mubr.bf16.gmra.mrb[72].mxu0 %v6057_v33  ;;  %2386 = vmatmul.mubr.bf16.gmra.mrb[72].mxu1 %v6057_v33  ;;  %v1252_v12 = vadd.f32 %v5995_v51, %v1251_v8  ;;  %v5357_v15 = vpop.f32.mrb[14].mxu1 }
 0x1ea   : > { %2042 = vmatprep.mubr.bf16.mxu0 %v7346_v2  ;;  %2395 = vmatprep.mubr.bf16.mxu1 %v7346_v2  ;;  %v1472_v16 = vmax.f32 %v1260_v6, 0.0  ;;  %v1263_v7 = vadd.f32 %v5357_v15, %v5995_v51  ;;  %v1254_v10 = vpop.f32.mrb[15].mxu1 }
 0x1eb   : > { %v1470_v11 = vmax.f32 %v1252_v12, 0.0  ;;  %v1255_v17 = vadd.f32 %v5995_v51, %v1254_v10  ;;  %2695 = vmatpush1.bf16.msra.mxu0 %v5100_v1  ;;  %3048 = vmatpush1.bf16.msra.mxu1 %v5102_v4 }
 0x1ec   : > { %v1473_v18 = vmax.f32 %v1263_v7, 0.0  ;;  %2696 = vmatprep.subr.bf16.mxu0 %v5109_v9  ;;  %3049 = vmatprep.subr.bf16.mxu1 %v5111_v36  ;;  %v1604_v36 = vld [vmem:[%s7343_s5 + $0x190] sm:$0xff] }
 0x1ed   : > { %v1471_v19 = vmax.f32 %v1255_v17, 0.0 }
 0x1ee   : > { %v6091_v20 = vpack.c.bf16 %v1473_v18, %v1472_v16 }
 0x1ef   : > { %v6093_v21 = vpack.c.bf16 %v1471_v19, %v1470_v11  ;;  %v5360_v22 = vpop.f32.mrb[16].mxu1  ;;  %2697 = vmatpush1.bf16.msra.mxu0 %v5108_v5  ;;  %3050 = vmatpush1.bf16.msra.mxu1 %v5110_v35 }
 0x1f0   : > { %v1276_v23 = vadd.f32 %v5360_v22, %v5995_v51  ;;  %v1267_v24 = vpop.f32.mrb[17].mxu1 }
 0x1f1   : > { %2043 = vmatmul.mubr.bf16.gmra.mrb[76].mxu0 %v6055_v32  ;;  %2396 = vmatmul.mubr.bf16.gmra.mrb[76].mxu1 %v6055_v32  ;;  %v1268_v25 = vadd.f32 %v5995_v51, %v1267_v24  ;;  %v5361_v26 = vpop.f32.mrb[18].mxu1 }
 0x1f2   : > { %2052 = vmatprep.mubr.bf16.mxu0 %v7346_v2  ;;  %2405 = vmatprep.mubr.bf16.mxu1 %v7346_v2  ;;  %v1476_v27 = vmax.f32 %v1276_v23, 0.0  ;;  %v1279_v28 = vadd.f32 %v5361_v26, %v5995_v51  ;;  %v1270_v29 = vpop.f32.mrb[19].mxu1 }
 0x1f3   : > { %v1474_v63 = vmax.f32 %v1268_v25, 0.0  ;;  %v1271_v3 = vadd.f32 %v5995_v51, %v1270_v29 }
 0x1f4   : > { %v1477_v34 = vmax.f32 %v1279_v28, 0.0 }
 0x1f5   : > { %v1475_v38 = vmax.f32 %v1271_v3, 0.0 }
 0x1f6   : > { %v6115_v39 = vpack.c.bf16 %v1477_v34, %v1476_v27 }
 0x1f7   : > { %v6117_v40 = vpack.c.bf16 %v1475_v38, %v1474_v63  ;;  %v5364_v41 = vpop.f32.mrb[20].mxu1  ;;  %v1608_v38 = vld [vmem:[%s7343_s5 + $0x1b0] sm:$0xff] }
 0x1f8   : > { %v1292_v42 = vadd.f32 %v5364_v41, %v5995_v51  ;;  %v1283_v43 = vpop.f32.mrb[21].mxu1  ;;  %v1605_v41 = vld [vmem:[%s7343_s5 + $0x198] sm:$0xff] }
 0x1f9   : > { %2053 = vmatmul.mubr.bf16.gmra.mrb[80].mxu0 %v6081_v60  ;;  %2406 = vmatmul.mubr.bf16.gmra.mrb[80].mxu1 %v6081_v60  ;;  %v1284_v44 = vadd.f32 %v5995_v51, %v1283_v43  ;;  %v5365_v45 = vpop.f32.mrb[22].mxu1 }
 0x1fa   : > { %2062 = vmatprep.mubr.bf16.mxu0 %v7346_v2  ;;  %2415 = vmatprep.mubr.bf16.mxu1 %v7346_v2  ;;  %v1480_v46 = vmax.f32 %v1292_v42, 0.0  ;;  %v1295_v47 = vadd.f32 %v5365_v45, %v5995_v51  ;;  %v1286_v48 = vpop.f32.mrb[23].mxu1  ;;  %v5117_v45 = vcombine.high %v1604_v36, %v1608_v38 }
 0x1fb   : > { %v1478_v49 = vmax.f32 %v1284_v44, 0.0  ;;  %v1287_v50 = vadd.f32 %v5995_v51, %v1286_v48  ;;  %v5116_v44 = vcombine.low %v1604_v36, %v1608_v38 }
 0x1fc   : > { %v1481_v52 = vmax.f32 %v1295_v47, 0.0  ;;  %2698 = vmatprep.subr.bf16.mxu0 %v5117_v45 }
 0x1fd   : > { %v1479_v53 = vmax.f32 %v1287_v50, 0.0  ;;  %2699 = vmatpush1.bf16.msra.mxu0 %v5116_v44 }
 0x1fe   : > { %v6127_v54 = vpack.c.bf16 %v1481_v52, %v1480_v46  ;;  %v1609_v46 = vld [vmem:[%s7343_s5 + $0x1b8] sm:$0xff] }
 0x1ff   : > { %v6129_v37 = vpack.c.bf16 %v1479_v53, %v1478_v49  ;;  %v5368_v55 = vpop.f32.mrb[24].mxu1  ;;  %v5118_v48 = vcombine.low %v1605_v41, %v1609_v46  ;;  %v5119_v49 = vcombine.high %v1605_v41, %v1609_v46 }
 0x200   : > { %v1308_v56 = vadd.f32 %v5368_v55, %v5995_v51  ;;  %v1299_v57 = vpop.f32.mrb[25].mxu1 }
 0x201   : > { %2063 = vmatmul.mubr.bf16.gmra.mrb[84].mxu0 %v6079_v59  ;;  %2416 = vmatmul.mubr.bf16.gmra.mrb[84].mxu1 %v6079_v59  ;;  %v1300_v58 = vadd.f32 %v5995_v51, %v1299_v57  ;;  %v5369_v0 = vpop.f32.mrb[26].mxu1 }
 0x202   : > { %2072 = vmatprep.mubr.bf16.mxu0 %v7346_v2  ;;  %2425 = vmatprep.mubr.bf16.mxu1 %v7346_v2  ;;  %v1484_v1 = vmax.f32 %v1308_v56, 0.0  ;;  %v1311_v4 = vadd.f32 %v5369_v0, %v5995_v51  ;;  %v1302_v6 = vpop.f32.mrb[27].mxu1 }
 0x203   : > { %v1482_v8 = vmax.f32 %v1300_v58, 0.0  ;;  %v1303_v12 = vadd.f32 %v5995_v51, %v1302_v6  ;;  %3051 = vmatprep.subr.bf16.mxu1 %v5119_v49 }
 0x204   : > { %v1485_v15 = vmax.f32 %v1311_v4, 0.0  ;;  %3052 = vmatpush1.bf16.msra.mxu1 %v5118_v48 }
 0x205   : > { %v1483_v16 = vmax.f32 %v1303_v12, 0.0 }
 0x206   : > { %v6139_v7 = vpack.c.bf16 %v1485_v15, %v1484_v1 }
 0x207   : > { %v6141_v10 = vpack.c.bf16 %v1483_v16, %v1482_v8  ;;  %v5372_v11 = vpop.f32.mrb[28].mxu1 }
 0x208   : > { %v1324_v17 = vadd.f32 %v5372_v11, %v5995_v51  ;;  %v1315_v18 = vpop.f32.mrb[29].mxu1 }
 0x209   : > { %2073 = vmatmul.mubr.bf16.gmra.mrb[88].mxu0 %v6093_v21  ;;  %2426 = vmatmul.mubr.bf16.gmra.mrb[88].mxu1 %v6093_v21  ;;  %v1316_v19 = vadd.f32 %v5995_v51, %v1315_v18  ;;  %v5373_v22 = vpop.f32.mrb[30].mxu1 }
 0x20a   : > { %2082 = vmatprep.mubr.bf16.mxu0 %v7346_v2  ;;  %2435 = vmatprep.mubr.bf16.mxu1 %v7346_v2  ;;  %v1488_v23 = vmax.f32 %v1324_v17, 0.0  ;;  %v1327_v24 = vadd.f32 %v5373_v22, %v5995_v51  ;;  %v1318_v25 = vpop.f32.mrb[31].mxu1 }
 0x20b   : > { %v1486_v26 = vmax.f32 %v1316_v19, 0.0  ;;  %v1319_v27 = vadd.f32 %v5995_v51, %v1318_v25 }
 0x20c   : > { %v1489_v28 = vmax.f32 %v1327_v24, 0.0 }
 0x20d   : > { %v1487_v29 = vmax.f32 %v1319_v27, 0.0 }
 0x20e   : > { %v6151_v30 = vpack.c.bf16 %v1489_v28, %v1488_v23 }
 0x20f   : > { %v6153_v61 = vpack.c.bf16 %v1487_v29, %v1486_v26  ;;  %v5376_v62 = vpop.f32.mrb[32].mxu1 }
 0x210   : > { %v1340_v63 = vadd.f32 %v5376_v62, %v5995_v51  ;;  %v1331_v3 = vpop.f32.mrb[33].mxu1 }
 0x211   : > { %2083 = vmatmul.mubr.bf16.gmra.mrb[92].mxu0 %v6091_v20  ;;  %2436 = vmatmul.mubr.bf16.gmra.mrb[92].mxu1 %v6091_v20  ;;  %v1332_v5 = vadd.f32 %v5995_v51, %v1331_v3  ;;  %v5377_v9 = vpop.f32.mrb[34].mxu1 }
 0x212   : > { %2092 = vmatprep.mubr.bf16.mxu0 %v7346_v2  ;;  %2445 = vmatprep.mubr.bf16.mxu1 %v7346_v2  ;;  %v1492_v31 = vmax.f32 %v1340_v63, 0.0  ;;  %v1343_v34 = vadd.f32 %v5377_v9, %v5995_v51  ;;  %v1334_v35 = vpop.f32.mrb[35].mxu1 }
 0x213   : > { %v1490_v42 = vmax.f32 %v1332_v5, 0.0  ;;  %v1335_v43 = vadd.f32 %v5995_v51, %v1334_v35 }
 0x214   : > { %v1493_v47 = vmax.f32 %v1343_v34, 0.0 }
 0x215   : > { %v1491_v50 = vmax.f32 %v1335_v43, 0.0 }
 0x216   : > { %v6175_v52 = vpack.c.bf16 %v1493_v47, %v1492_v31 }
 0x217   : > { %v6177_v53 = vpack.c.bf16 %v1491_v50, %v1490_v42  ;;  %v5380_v55 = vpop.f32.mrb[36].mxu1 }
 0x218   : > { %v1356_v56 = vadd.f32 %v5380_v55, %v5995_v51  ;;  %v1347_v57 = vpop.f32.mrb[37].mxu1 }
 0x219   : > { %2093 = vmatmul.mubr.bf16.gmra.mrb[96].mxu0 %v6117_v40  ;;  %2446 = vmatmul.mubr.bf16.gmra.mrb[96].mxu1 %v6117_v40  ;;  %v1348_v58 = vadd.f32 %v5995_v51, %v1347_v57  ;;  %v5381_v0 = vpop.f32.mrb[38].mxu1 }
 0x21a   : > { %2102 = vmatprep.mubr.bf16.mxu0 %v7346_v2  ;;  %2455 = vmatprep.mubr.bf16.mxu1 %v7346_v2  ;;  %v1496_v1 = vmax.f32 %v1356_v56, 0.0  ;;  %v1359_v4 = vadd.f32 %v5381_v0, %v5995_v51  ;;  %v1350_v6 = vpop.f32.mrb[39].mxu1 }
 0x21b   : > { %v1494_v8 = vmax.f32 %v1348_v58, 0.0  ;;  %v1351_v12 = vadd.f32 %v5995_v51, %v1350_v6 }
 0x21c   : > { %v1497_v15 = vmax.f32 %v1359_v4, 0.0 }
 0x21d   : > { %v1495_v16 = vmax.f32 %v1351_v12, 0.0 }
 0x21e   : > { %v6187_v11 = vpack.c.bf16 %v1497_v15, %v1496_v1 }
 0x21f   : > { %v6189_v17 = vpack.c.bf16 %v1495_v16, %v1494_v8  ;;  %v5384_v18 = vpop.f32.mrb[40].mxu1 }
 0x220   : > { %v1372_v19 = vadd.f32 %v5384_v18, %v5995_v51  ;;  %v1363_v22 = vpop.f32.mrb[41].mxu1 }
 0x221   : > { %2103 = vmatmul.mubr.bf16.gmra.mrb[100].mxu0 %v6115_v39  ;;  %2456 = vmatmul.mubr.bf16.gmra.mrb[100].mxu1 %v6115_v39  ;;  %v1364_v23 = vadd.f32 %v5995_v51, %v1363_v22  ;;  %v5385_v24 = vpop.f32.mrb[42].mxu1 }
 0x222   : > { %2112 = vmatprep.mubr.bf16.mxu0 %v7346_v2  ;;  %2465 = vmatprep.mubr.bf16.mxu1 %v7346_v2  ;;  %v1500_v25 = vmax.f32 %v1372_v19, 0.0  ;;  %v1375_v26 = vadd.f32 %v5385_v24, %v5995_v51  ;;  %v1366_v27 = vpop.f32.mrb[43].mxu1 }
 0x223   : > { %v1498_v28 = vmax.f32 %v1364_v23, 0.0  ;;  %v1367_v29 = vadd.f32 %v5995_v51, %v1366_v27 }
 0x224   : > { %v1501_v62 = vmax.f32 %v1375_v26, 0.0 }
 0x225   : > { %v1499_v63 = vmax.f32 %v1367_v29, 0.0 }
 0x226   : > { %v6199_v3 = vpack.c.bf16 %v1501_v62, %v1500_v25 }
 0x227   : > { %v6201_v5 = vpack.c.bf16 %v1499_v63, %v1498_v28  ;;  %v5388_v9 = vpop.f32.mrb[44].mxu1  ;;  %v1612_v63 = vld [vmem:[%s7343_s5 + $0x1d0] sm:$0xff] }
 0x228   : > { %v1388_v31 = vadd.f32 %v5388_v9, %v5995_v51  ;;  %v1379_v34 = vpop.f32.mrb[45].mxu1  ;;  %v1616_v9 = vld [vmem:[%s7343_s5 + $0x1f0] sm:$0xff] }
 0x229   : > { %2113 = vmatmul.mubr.bf16.gmra.mrb[104].mxu0 %v6129_v37  ;;  %2466 = vmatmul.mubr.bf16.gmra.mrb[104].mxu1 %v6129_v37  ;;  %v1380_v35 = vadd.f32 %v5995_v51, %v1379_v34  ;;  %v5389_v36 = vpop.f32.mrb[46].mxu1 }
 0x22a   : > { %2122 = vmatprep.mubr.bf16.mxu0 %v7346_v2  ;;  %2475 = vmatprep.mubr.bf16.mxu1 %v7346_v2  ;;  %v1504_v38 = vmax.f32 %v1388_v31, 0.0  ;;  %v1391_v41 = vadd.f32 %v5389_v36, %v5995_v51  ;;  %v1382_v42 = vpop.f32.mrb[47].mxu1  ;;  %v1613_v31 = vld [vmem:[%s7343_s5 + $0x1d8] sm:$0xff]  ;;  %v5125_v36 = vcombine.high %v1612_v63, %v1616_v9 }
 0x22b   : > { %v1502_v43 = vmax.f32 %v1380_v35, 0.0  ;;  %v1383_v44 = vadd.f32 %v5995_v51, %v1382_v42  ;;  %v5124_v35 = vcombine.low %v1612_v63, %v1616_v9 }
 0x22c   : > { %v1505_v45 = vmax.f32 %v1391_v41, 0.0  ;;  %2700 = vmatprep.subr.bf16.mxu0 %v5125_v36 }
 0x22d   : > { %v1503_v46 = vmax.f32 %v1383_v44, 0.0  ;;  %2701 = vmatpush1.bf16.msra.mxu0 %v5124_v35 }
 0x22e   : > { %v6211_v47 = vpack.c.bf16 %v1505_v45, %v1504_v38  ;;  %v1617_v38 = vld [vmem:[%s7343_s5 + $0x1f8] sm:$0xff] }
 0x22f   : > { %v6213_v48 = vpack.c.bf16 %v1503_v46, %v1502_v43  ;;  %v5392_v49 = vpop.f32.mrb[48].mxu1  ;;  %v5127_v42 = vcombine.high %v1613_v31, %v1617_v38  ;;  %v5126_v45 = vcombine.low %v1613_v31, %v1617_v38  ;;  %v1618_v38 = vld [vmem:[%s7344_s6] sm:$0xff] }
 0x230   : > { %7370 = vst [vmem:[#allocation5_spill] sm:$0xff] %v6211_v47  ;;  %v1404_v50 = vadd.f32 %v5392_v49, %v5995_v51  ;;  %v1395_v55 = vpop.f32.mrb[49].mxu1 }
 0x231   : > { %2123 = vmatmul.mubr.bf16.gmra.mrb[108].mxu0 %v6127_v54  ;;  %2476 = vmatmul.mubr.bf16.gmra.mrb[108].mxu1 %v6127_v54  ;;  %v1396_v56 = vadd.f32 %v5995_v51, %v1395_v55  ;;  %v5393_v57 = vpop.f32.mrb[50].mxu1 }
 0x232   : > { %2132 = vmatprep.mubr.bf16.mxu0 %v7346_v2  ;;  %2485 = vmatprep.mubr.bf16.mxu1 %v7346_v2  ;;  %v1508_v58 = vmax.f32 %v1404_v50, 0.0  ;;  %v1407_v0 = vadd.f32 %v5393_v57, %v5995_v51  ;;  %v1398_v1 = vpop.f32.mrb[51].mxu1 }
 0x233   : > { %v1506_v4 = vmax.f32 %v1396_v56, 0.0  ;;  %v1399_v6 = vadd.f32 %v5995_v51, %v1398_v1  ;;  %3053 = vmatprep.subr.bf16.mxu1 %v5127_v42 }
 0x234   : > { %v1509_v8 = vmax.f32 %v1407_v0, 0.0  ;;  %3054 = vmatpush1.bf16.msra.mxu1 %v5126_v45 }
 0x235   : > { %v1507_v12 = vmax.f32 %v1399_v6, 0.0 }
 0x236   : > { %v6223_v15 = vpack.c.bf16 %v1509_v8, %v1508_v58 }
 0x237   : > { %v6225_v16 = vpack.c.bf16 %v1507_v12, %v1506_v4  ;;  %v5396_v18 = vpop.f32.mrb[52].mxu1 }
 0x238   : > { %7371 = vst [vmem:[#allocation6_spill] sm:$0xff] %v6223_v15  ;;  %v1420_v19 = vadd.f32 %v5396_v18, %v5995_v51  ;;  %v1411_v22 = vpop.f32.mrb[53].mxu1 }
 0x239   : > { %7372 = vst [vmem:[#allocation7_spill] sm:$0xff] %v6225_v16  ;;  %2133 = vmatmul.mubr.bf16.gmra.mrb[112].mxu0 %v6141_v10  ;;  %2486 = vmatmul.mubr.bf16.gmra.mrb[112].mxu1 %v6141_v10  ;;  %v1412_v23 = vadd.f32 %v5995_v51, %v1411_v22  ;;  %v5397_v24 = vpop.f32.mrb[54].mxu1 }
 0x23a   : > { %2142 = vmatprep.mubr.bf16.mxu0 %v7346_v2  ;;  %2495 = vmatprep.mubr.bf16.mxu1 %v7346_v2  ;;  %v1512_v25 = vmax.f32 %v1420_v19, 0.0  ;;  %v1423_v26 = vadd.f32 %v5397_v24, %v5995_v51  ;;  %v1414_v27 = vpop.f32.mrb[55].mxu1 }
 0x23b   : > { %v1510_v28 = vmax.f32 %v1412_v23, 0.0  ;;  %v1415_v29 = vadd.f32 %v5995_v51, %v1414_v27 }
 0x23c   : > { %v1513_v62 = vmax.f32 %v1423_v26, 0.0 }
 0x23d   : > { %v1511_v34 = vmax.f32 %v1415_v29, 0.0 }
 0x23e   : > { %v6247_v41 = vpack.c.bf16 %v1513_v62, %v1512_v25 }
 0x23f   : > { %v6249_v43 = vpack.c.bf16 %v1511_v34, %v1510_v28  ;;  %v5400_v44 = vpop.f32.mrb[56].mxu1 }
 0x240   : > { %7373 = vst [vmem:[#allocation8_spill] sm:$0xff] %v6247_v41  ;;  %v1436_v46 = vadd.f32 %v5400_v44, %v5995_v51  ;;  %v1427_v49 = vpop.f32.mrb[57].mxu1 }
 0x241   : > { %7374 = vst [vmem:[#allocation9_spill] sm:$0xff] %v6249_v43  ;;  %2143 = vmatmul.mubr.bf16.gmra.mrb[116].mxu0 %v6139_v7  ;;  %2496 = vmatmul.mubr.bf16.gmra.mrb[116].mxu1 %v6139_v7  ;;  %v1428_v50 = vadd.f32 %v5995_v51, %v1427_v49  ;;  %v5401_v55 = vpop.f32.mrb[58].mxu1 }
 0x242   : > { %2152 = vmatprep.mubr.bf16.mxu0 %v7346_v2  ;;  %2505 = vmatprep.mubr.bf16.mxu1 %v7346_v2  ;;  %v1516_v56 = vmax.f32 %v1436_v46, 0.0  ;;  %v1439_v57 = vadd.f32 %v5401_v55, %v5995_v51  ;;  %v1430_v58 = vpop.f32.mrb[59].mxu1 }
 0x243   : > { %v1514_v0 = vmax.f32 %v1428_v50, 0.0  ;;  %v1431_v1 = vadd.f32 %v5995_v51, %v1430_v58 }
 0x244   : > { %v1517_v4 = vmax.f32 %v1439_v57, 0.0 }
 0x245   : > { %v1515_v6 = vmax.f32 %v1431_v1, 0.0 }
 0x246   : > { %v6259_v8 = vpack.c.bf16 %v1517_v4, %v1516_v56 }
 0x247   : > { %v6261_v12 = vpack.c.bf16 %v1515_v6, %v1514_v0  ;;  %v5404_v18 = vpop.f32.mrb[60].mxu1 }
 0x248   : > { %7375 = vst [vmem:[#allocation10_spill] sm:$0xff] %v6259_v8  ;;  %v1452_v19 = vadd.f32 %v5404_v18, %v5995_v51  ;;  %v1443_v22 = vpop.f32.mrb[61].mxu1 }
 0x249   : > { %7376 = vst [vmem:[#allocation11_spill] sm:$0xff] %v6261_v12  ;;  %2153 = vmatmul.mubr.bf16.gmra.mrb[120].mxu0 %v6153_v61  ;;  %2506 = vmatmul.mubr.bf16.gmra.mrb[120].mxu1 %v6153_v61  ;;  %v1444_v23 = vadd.f32 %v5995_v51, %v1443_v22  ;;  %v5405_v24 = vpop.f32.mrb[62].mxu1 }
 0x24a   : > { %2162 = vmatprep.mubr.bf16.mxu0 %v7346_v2  ;;  %2515 = vmatprep.mubr.bf16.mxu1 %v7346_v2  ;;  %v1520_v25 = vmax.f32 %v1452_v19, 0.0  ;;  %v1455_v26 = vadd.f32 %v5405_v24, %v5995_v51  ;;  %v1446_v27 = vpop.f32.mrb[63].mxu1 }
 0x24b   : > { %v1518_v28 = vmax.f32 %v1444_v23, 0.0  ;;  %v1447_v29 = vadd.f32 %v5995_v51, %v1446_v27  ;;  %v1620_v51 = vlaneseq }
 0x24c   : > { %v1521_v62 = vmax.f32 %v1455_v26, 0.0 }
 0x24d   : > { %v1519_v63 = vmax.f32 %v1447_v29, 0.0  ;;  %v6317_v34 = vshrl.u32 %v1620_v51, 7 }
 0x24e   : > { %v6271_v9 = vpack.c.bf16 %v1521_v62, %v1520_v25 }
 0x24f   : > { %v6273_v31 = vpack.c.bf16 %v1519_v63, %v1518_v28  ;;  %7379 = vst [vmem:[#allocation14_spill] sm:$0xff] %v6317_v34  ;;  %v1622_v35 = vsub.s32 0, %v6317_v34  ;;  %v1630_v36 = vsub.s32 2, %v6317_v34  ;;  %v1626_v42 = vsub.s32 1, %v6317_v34 }
 0x250   : > { %7377 = vst [vmem:[#allocation12_spill] sm:$0xff] %v6271_v9  ;;  %v1634_v44 = vsub.s32 3, %v6317_v34 }
 0x251   : > { %7378 = vst [vmem:[#allocation13_spill] sm:$0xff] %v6273_v31  ;;  %2163 = vmatmul.mubr.bf16.gmra.mrb[124].mxu0 %v6151_v30  ;;  %2516 = vmatmul.mubr.bf16.gmra.mrb[124].mxu1 %v6151_v30  ;;  %v6330_v45 = vrot.slane %v1618_v38, %v1622_v35  ;;  %v6332_v46 = vrot.slane %v1618_v38, %v1630_v36 }
 0x252   : > { %2172 = vmatprep.mubr.bf16.mxu0 %v7346_v2  ;;  %2525 = vmatprep.mubr.bf16.mxu1 %v7346_v2  ;;  %v6334_v49 = vrot.slane %v1618_v38, %v1626_v42  ;;  %v6336_v50 = vrot.slane %v1618_v38, %v1634_v44 }
 0x259   : > { %2173 = vmatmul.mubr.bf16.gmra.mrb[128].mxu0 %v6177_v53  ;;  %2526 = vmatmul.mubr.bf16.gmra.mrb[128].mxu1 %v6177_v53 }
 0x25a   : > { %2182 = vmatprep.mubr.bf16.mxu0 %v7346_v2  ;;  %2535 = vmatprep.mubr.bf16.mxu1 %v7346_v2 }
 0x261   : > { %2183 = vmatmul.mubr.bf16.gmra.mrb[132].mxu0 %v6175_v52  ;;  %2536 = vmatmul.mubr.bf16.gmra.mrb[132].mxu1 %v6175_v52 }
 0x262   : > { %2192 = vmatprep.mubr.bf16.mxu0 %v7346_v2  ;;  %2545 = vmatprep.mubr.bf16.mxu1 %v7346_v2 }
 0x269   : > { %2193 = vmatmul.mubr.bf16.gmra.mrb[136].mxu0 %v6189_v17  ;;  %2546 = vmatmul.mubr.bf16.gmra.mrb[136].mxu1 %v6189_v17 }
 0x26a   : > { %2202 = vmatprep.mubr.bf16.mxu0 %v7346_v2  ;;  %2555 = vmatprep.mubr.bf16.mxu1 %v7346_v2 }
 0x271   : > { %2203 = vmatmul.mubr.bf16.gmra.mrb[140].mxu0 %v6187_v11  ;;  %2556 = vmatmul.mubr.bf16.gmra.mrb[140].mxu1 %v6187_v11 }
 0x272   : > { %2212 = vmatprep.mubr.bf16.mxu0 %v7346_v2  ;;  %2565 = vmatprep.mubr.bf16.mxu1 %v7346_v2 }
 0x279   : > { %2213 = vmatmul.mubr.bf16.gmra.mrb[144].mxu0 %v6201_v5  ;;  %2566 = vmatmul.mubr.bf16.gmra.mrb[144].mxu1 %v6201_v5 }
 0x27a   : > { %2222 = vmatprep.mubr.bf16.mxu0 %v7346_v2  ;;  %2575 = vmatprep.mubr.bf16.mxu1 %v7346_v2 }
 0x281   : > { %2223 = vmatmul.mubr.bf16.gmra.mrb[148].mxu0 %v6199_v3  ;;  %2576 = vmatmul.mubr.bf16.gmra.mrb[148].mxu1 %v6199_v3 }
 0x282   : > { %2232 = vmatprep.mubr.bf16.mxu0 %v7346_v2  ;;  %2585 = vmatprep.mubr.bf16.mxu1 %v7346_v2 }
 0x289   : > { %2233 = vmatmul.mubr.bf16.gmra.mrb[152].mxu0 %v6213_v48  ;;  %2586 = vmatmul.mubr.bf16.gmra.mrb[152].mxu1 %v6213_v48 }
 0x28a   : > { %2242 = vmatprep.mubr.bf16.mxu0 %v7346_v2  ;;  %2595 = vmatprep.mubr.bf16.mxu1 %v7346_v2 }
 0x291   : > { %2243 = vmatmul.mubr.bf16.gmra.mrb[156].mxu0 %v6211_v47  ;;  %2596 = vmatmul.mubr.bf16.gmra.mrb[156].mxu1 %v6211_v47 }
 0x292   : > { %2252 = vmatprep.mubr.bf16.mxu0 %v7346_v2  ;;  %2605 = vmatprep.mubr.bf16.mxu1 %v7346_v2 }
 0x299   : > { %2253 = vmatmul.mubr.bf16.gmra.mrb[160].mxu0 %v6225_v16  ;;  %2606 = vmatmul.mubr.bf16.gmra.mrb[160].mxu1 %v6225_v16 }
 0x29a   : > { %2262 = vmatprep.mubr.bf16.mxu0 %v7346_v2  ;;  %2615 = vmatprep.mubr.bf16.mxu1 %v7346_v2 }
 0x2a1   : > { %2263 = vmatmul.mubr.bf16.gmra.mrb[164].mxu0 %v6223_v15  ;;  %2616 = vmatmul.mubr.bf16.gmra.mrb[164].mxu1 %v6223_v15 }
 0x2a2   : > { %2272 = vmatprep.mubr.bf16.mxu0 %v7346_v2  ;;  %2625 = vmatprep.mubr.bf16.mxu1 %v7346_v2 }
 0x2a9   : > { %2273 = vmatmul.mubr.bf16.gmra.mrb[168].mxu0 %v6249_v43  ;;  %2626 = vmatmul.mubr.bf16.gmra.mrb[168].mxu1 %v6249_v43 }
 0x2aa   : > { %2282 = vmatprep.mubr.bf16.mxu0 %v7346_v2  ;;  %2635 = vmatprep.mubr.bf16.mxu1 %v7346_v2 }
 0x2ac   : > { %v2014_v55 = vpop.f32.mrb[64].mxu0  ;;  %v2367_v56 = vpop.f32.mrb[64].mxu1 }
 0x2ad   : > { %v2015_v57 = vadd.f32 %v2014_v55, %v6330_v45  ;;  %v2368_v58 = vadd.f32 %v2367_v56, %v6332_v46  ;;  %v2016_v0 = vpop.f32.mrb[65].mxu0  ;;  %v2369_v1 = vpop.f32.mrb[65].mxu1 }
 0x2ae   : > { %v2017_v4 = vadd.f32 %v2016_v0, %v6334_v49  ;;  %v2370_v6 = vadd.f32 %v2369_v1, %v6336_v50  ;;  %v2018_v18 = vpop.f32.mrb[66].mxu0  ;;  %v2371_v19 = vpop.f32.mrb[66].mxu1 }
 0x2af   : > { %v2019_v22 = vadd.f32 %v2018_v18, %v6330_v45  ;;  %v2372_v23 = vadd.f32 %v2371_v19, %v6332_v46  ;;  %v2020_v24 = vpop.f32.mrb[67].mxu0  ;;  %v2373_v25 = vpop.f32.mrb[67].mxu1  ;;  %v3392_v28 = vmax.f32 %v2015_v57, 0.0  ;;  %v3394_v29 = vmax.f32 %v2368_v58, 0.0 }
 0x2b0   : > { %v2021_v26 = vadd.f32 %v2020_v24, %v6334_v49  ;;  %v2374_v27 = vadd.f32 %v2373_v25, %v6336_v50  ;;  %v3393_v51 = vmax.f32 %v2017_v4, 0.0  ;;  %v3395_v35 = vmax.f32 %v2370_v6, 0.0 }
 0x2b1   : > { %v3400_v62 = vmax.f32 %v2019_v22, 0.0  ;;  %v3402_v63 = vmax.f32 %v2372_v23, 0.0  ;;  %2283 = vmatmul.mubr.bf16.gmra.mrb[172].mxu0 %v6247_v41  ;;  %2636 = vmatmul.mubr.bf16.gmra.mrb[172].mxu1 %v6247_v41 }
 0x2b2   : > { %v3401_v36 = vmax.f32 %v2021_v26, 0.0  ;;  %v3403_v38 = vmax.f32 %v2374_v27, 0.0  ;;  %2292 = vmatprep.mubr.bf16.mxu0 %v7346_v2  ;;  %2645 = vmatprep.mubr.bf16.mxu1 %v7346_v2 }
 0x2b3   : > { %v3904_v42 = vmax.f32 %v3392_v28, %v3400_v62  ;;  %v3930_v44 = vmax.f32 %v3394_v29, %v3402_v63 }
 0x2b4   : > { %v3917_v55 = vmax.f32 %v3393_v51, %v3401_v36  ;;  %v3943_v56 = vmax.f32 %v3395_v35, %v3403_v38  ;;  %v2024_v57 = vpop.f32.mrb[68].mxu0  ;;  %v2377_v58 = vpop.f32.mrb[68].mxu1 }
 0x2b5   : > { %v2025_v0 = vadd.f32 %v2024_v57, %v6330_v45  ;;  %v2378_v1 = vadd.f32 %v2377_v58, %v6332_v46  ;;  %v2026_v18 = vpop.f32.mrb[69].mxu0  ;;  %v2379_v19 = vpop.f32.mrb[69].mxu1 }
 0x2b6   : > { %v2027_v4 = vadd.f32 %v2026_v18, %v6334_v49  ;;  %v2380_v6 = vadd.f32 %v2379_v19, %v6336_v50  ;;  %v2028_v22 = vpop.f32.mrb[70].mxu0  ;;  %v2381_v23 = vpop.f32.mrb[70].mxu1 }
 0x2b7   : > { %v3408_v24 = vmax.f32 %v2025_v0, 0.0  ;;  %v3410_v25 = vmax.f32 %v2378_v1, 0.0  ;;  %v2029_v26 = vadd.f32 %v2028_v22, %v6330_v45  ;;  %v2382_v27 = vadd.f32 %v2381_v23, %v6332_v46  ;;  %v2030_v28 = vpop.f32.mrb[71].mxu0  ;;  %v2383_v29 = vpop.f32.mrb[71].mxu1 }
 0x2b8   : > { %v3409_v62 = vmax.f32 %v2027_v4, 0.0  ;;  %v3411_v63 = vmax.f32 %v2380_v6, 0.0  ;;  %v2031_v51 = vadd.f32 %v2030_v28, %v6334_v49  ;;  %v2384_v35 = vadd.f32 %v2383_v29, %v6336_v50 }
 0x2b9   : > { %v3905_v36 = vmax.f32 %v3904_v42, %v3408_v24  ;;  %v3931_v38 = vmax.f32 %v3930_v44, %v3410_v25  ;;  %v3416_v57 = vmax.f32 %v2029_v26, 0.0  ;;  %v3418_v58 = vmax.f32 %v2382_v27, 0.0  ;;  %2293 = vmatmul.mubr.bf16.gmra.mrb[176].mxu0 %v6261_v12  ;;  %2646 = vmatmul.mubr.bf16.gmra.mrb[176].mxu1 %v6261_v12 }
 0x2ba   : > { %v3918_v0 = vmax.f32 %v3917_v55, %v3409_v62  ;;  %v3944_v1 = vmax.f32 %v3943_v56, %v3411_v63  ;;  %v3417_v18 = vmax.f32 %v2031_v51, 0.0  ;;  %v3419_v19 = vmax.f32 %v2384_v35, 0.0  ;;  %2302 = vmatprep.mubr.bf16.mxu0 %v7346_v2  ;;  %2655 = vmatprep.mubr.bf16.mxu1 %v7346_v2 }
 0x2bb   : > { %v3906_v4 = vmax.f32 %v3905_v36, %v3416_v57  ;;  %v3932_v6 = vmax.f32 %v3931_v38, %v3418_v58 }
 0x2bc   : > { %v3919_v22 = vmax.f32 %v3918_v0, %v3417_v18  ;;  %v3945_v23 = vmax.f32 %v3944_v1, %v3419_v19  ;;  %v2034_v42 = vpop.f32.mrb[72].mxu0  ;;  %v2387_v44 = vpop.f32.mrb[72].mxu1 }
 0x2bd   : > { %v2035_v24 = vadd.f32 %v2034_v42, %v6330_v45  ;;  %v2388_v25 = vadd.f32 %v2387_v44, %v6332_v46  ;;  %v2036_v26 = vpop.f32.mrb[73].mxu0  ;;  %v2389_v27 = vpop.f32.mrb[73].mxu1 }
 0x2be   : > { %v2037_v55 = vadd.f32 %v2036_v26, %v6334_v49  ;;  %v2390_v56 = vadd.f32 %v2389_v27, %v6336_v50  ;;  %v2038_v28 = vpop.f32.mrb[74].mxu0  ;;  %v2391_v29 = vpop.f32.mrb[74].mxu1 }
 0x2bf   : > { %v3424_v62 = vmax.f32 %v2035_v24, 0.0  ;;  %v3426_v63 = vmax.f32 %v2388_v25, 0.0  ;;  %v2039_v51 = vadd.f32 %v2038_v28, %v6330_v45  ;;  %v2392_v35 = vadd.f32 %v2391_v29, %v6332_v46  ;;  %v2040_v36 = vpop.f32.mrb[75].mxu0  ;;  %v2393_v38 = vpop.f32.mrb[75].mxu1 }
 0x2c0   : > { %v3425_v57 = vmax.f32 %v2037_v55, 0.0  ;;  %v3427_v58 = vmax.f32 %v2390_v56, 0.0  ;;  %v2041_v0 = vadd.f32 %v2040_v36, %v6334_v49  ;;  %v2394_v1 = vadd.f32 %v2393_v38, %v6336_v50 }
 0x2c1   : > { %v3907_v18 = vmax.f32 %v3906_v4, %v3424_v62  ;;  %v3933_v19 = vmax.f32 %v3932_v6, %v3426_v63  ;;  %v3432_v42 = vmax.f32 %v2039_v51, 0.0  ;;  %v3434_v44 = vmax.f32 %v2392_v35, 0.0  ;;  %2303 = vmatmul.mubr.bf16.gmra.mrb[180].mxu0 %v6259_v8  ;;  %2656 = vmatmul.mubr.bf16.gmra.mrb[180].mxu1 %v6259_v8 }
 0x2c2   : > { %v3920_v24 = vmax.f32 %v3919_v22, %v3425_v57  ;;  %v3946_v25 = vmax.f32 %v3945_v23, %v3427_v58  ;;  %v3433_v26 = vmax.f32 %v2041_v0, 0.0  ;;  %v3435_v27 = vmax.f32 %v2394_v1, 0.0  ;;  %2312 = vmatprep.mubr.bf16.mxu0 %v7346_v2  ;;  %2665 = vmatprep.mubr.bf16.mxu1 %v7346_v2 }
 0x2c3   : > { %v3908_v55 = vmax.f32 %v3907_v18, %v3432_v42  ;;  %v3934_v56 = vmax.f32 %v3933_v19, %v3434_v44 }
 0x2c4   : > { %v3921_v28 = vmax.f32 %v3920_v24, %v3433_v26  ;;  %v3947_v29 = vmax.f32 %v3946_v25, %v3435_v27  ;;  %v2044_v4 = vpop.f32.mrb[76].mxu0  ;;  %v2397_v6 = vpop.f32.mrb[76].mxu1 }
 0x2c5   : > { %v2045_v62 = vadd.f32 %v2044_v4, %v6330_v45  ;;  %v2398_v63 = vadd.f32 %v2397_v6, %v6332_v46  ;;  %v2046_v51 = vpop.f32.mrb[77].mxu0  ;;  %v2399_v35 = vpop.f32.mrb[77].mxu1 }
 0x2c6   : > { %v2047_v22 = vadd.f32 %v2046_v51, %v6334_v49  ;;  %v2400_v23 = vadd.f32 %v2399_v35, %v6336_v50  ;;  %v2048_v36 = vpop.f32.mrb[78].mxu0  ;;  %v2401_v38 = vpop.f32.mrb[78].mxu1 }
 0x2c7   : > { %v3440_v57 = vmax.f32 %v2045_v62, 0.0  ;;  %v3442_v58 = vmax.f32 %v2398_v63, 0.0  ;;  %v2049_v0 = vadd.f32 %v2048_v36, %v6330_v45  ;;  %v2402_v1 = vadd.f32 %v2401_v38, %v6332_v46  ;;  %v2050_v18 = vpop.f32.mrb[79].mxu0  ;;  %v2403_v19 = vpop.f32.mrb[79].mxu1 }
 0x2c8   : > { %v3441_v42 = vmax.f32 %v2047_v22, 0.0  ;;  %v3443_v44 = vmax.f32 %v2400_v23, 0.0  ;;  %v2051_v24 = vadd.f32 %v2050_v18, %v6334_v49  ;;  %v2404_v25 = vadd.f32 %v2403_v19, %v6336_v50 }
 0x2c9   : > { %v3909_v26 = vmax.f32 %v3908_v55, %v3440_v57  ;;  %v3935_v27 = vmax.f32 %v3934_v56, %v3442_v58  ;;  %v3448_v4 = vmax.f32 %v2049_v0, 0.0  ;;  %v3450_v6 = vmax.f32 %v2402_v1, 0.0  ;;  %2313 = vmatmul.mubr.bf16.gmra.mrb[184].mxu0 %v6273_v31  ;;  %2666 = vmatmul.mubr.bf16.gmra.mrb[184].mxu1 %v6273_v31 }
 0x2ca   : > { %v3922_v62 = vmax.f32 %v3921_v28, %v3441_v42  ;;  %v3948_v63 = vmax.f32 %v3947_v29, %v3443_v44  ;;  %v3449_v51 = vmax.f32 %v2051_v24, 0.0  ;;  %v3451_v35 = vmax.f32 %v2404_v25, 0.0  ;;  %2322 = vmatprep.mubr.bf16.mxu0 %v7346_v2  ;;  %2675 = vmatprep.mubr.bf16.mxu1 %v7346_v2 }
 0x2cb   : > { %v3910_v22 = vmax.f32 %v3909_v26, %v3448_v4  ;;  %v3936_v23 = vmax.f32 %v3935_v27, %v3450_v6 }
 0x2cc   : > { %v3923_v36 = vmax.f32 %v3922_v62, %v3449_v51  ;;  %v3949_v38 = vmax.f32 %v3948_v63, %v3451_v35  ;;  %v2054_v55 = vpop.f32.mrb[80].mxu0  ;;  %v2407_v56 = vpop.f32.mrb[80].mxu1 }
 0x2cd   : > { %v3911_v57 = vrot.slane %v3910_v22, 4  ;;  %v3937_v58 = vrot.slane %v3936_v23, 4  ;;  %v2055_v0 = vadd.f32 %v2054_v55, %v6330_v45  ;;  %v2408_v1 = vadd.f32 %v2407_v56, %v6332_v46  ;;  %v2056_v28 = vpop.f32.mrb[81].mxu0  ;;  %v2409_v29 = vpop.f32.mrb[81].mxu1 }
 0x2ce   : > { %v3924_v18 = vrot.slane %v3923_v36, 4  ;;  %v3950_v19 = vrot.slane %v3949_v38, 4  ;;  %v2057_v42 = vadd.f32 %v2056_v28, %v6334_v49  ;;  %v2410_v44 = vadd.f32 %v2409_v29, %v6336_v50  ;;  %v2058_v24 = vpop.f32.mrb[82].mxu0  ;;  %v2411_v25 = vpop.f32.mrb[82].mxu1 }
 0x2cf   : > { %v3912_v26 = vmax.f32 %v3910_v22, %v3911_v57  ;;  %v3938_v27 = vmax.f32 %v3936_v23, %v3937_v58  ;;  %v2060_v4 = vpop.f32.mrb[83].mxu0  ;;  %v2413_v6 = vpop.f32.mrb[83].mxu1  ;;  %v3456_v51 = vmax.f32 %v2055_v0, 0.0  ;;  %v3458_v35 = vmax.f32 %v2408_v1, 0.0 }
 0x2d0   : > { %v3925_v62 = vmax.f32 %v3923_v36, %v3924_v18  ;;  %v3951_v63 = vmax.f32 %v3949_v38, %v3950_v19  ;;  %v2059_v55 = vadd.f32 %v2058_v24, %v6330_v45  ;;  %v2412_v56 = vadd.f32 %v2411_v25, %v6332_v46 }
 0x2d1   : > { %2323 = vmatmul.mubr.bf16.gmra.mrb[188].mxu0 %v6271_v9  ;;  %2676 = vmatmul.mubr.bf16.gmra.mrb[188].mxu1 %v6271_v9  ;;  %v3457_v28 = vmax.f32 %v2057_v42, 0.0  ;;  %v3459_v29 = vmax.f32 %v2410_v44, 0.0  ;;  %v2061_v2 = vadd.f32 %v2060_v4, %v6334_v49  ;;  %v2414_v22 = vadd.f32 %v2413_v6, %v6336_v50 }
 0x2d2   : > { %v7380_v23 = vmov 0   ;;  %v3913_v36 = vrot.slane %v3912_v26, 2  ;;  %v3939_v38 = vrot.slane %v3938_v27, 2  ;;  %v3464_v57 = vmax.f32 %v2059_v55, 0.0 }
 0x2d3   : > { %2718 = vmatprep.mubr.bf16.mxu0 %v7380_v23  ;;  %3071 = vmatprep.mubr.bf16.mxu1 %v7380_v23  ;;  %v3466_v58 = vmax.f32 %v2412_v56, 0.0  ;;  %v3926_v0 = vrot.slane %v3925_v62, 2  ;;  %v3952_v1 = vrot.slane %v3951_v63, 2  ;;  %v3465_v18 = vmax.f32 %v2061_v2, 0.0 }
 0x2d4   : > { %v3467_v19 = vmax.f32 %v2414_v22, 0.0  ;;  %v2064_v24 = vpop.f32.mrb[84].mxu0  ;;  %v2417_v25 = vpop.f32.mrb[84].mxu1  ;;  %v4008_v42 = vmax.f32 %v3456_v51, %v3464_v57  ;;  %v6400_v41 = vmax.f32 %v3912_v26, %v3913_v36  ;;  %v6402_v43 = vmax.f32 %v3938_v27, %v3939_v38 }
 0x2d5   : > { %v4034_v44 = vmax.f32 %v3458_v35, %v3466_v58  ;;  %v2066_v9 = vpop.f32.mrb[85].mxu0  ;;  %v2419_v4 = vpop.f32.mrb[85].mxu1  ;;  %v4021_v31 = vmax.f32 %v3457_v28, %v3465_v18  ;;  %v2065_v55 = vadd.f32 %v2064_v24, %v6330_v45  ;;  %v2418_v56 = vadd.f32 %v2417_v25, %v6332_v46 }
 0x2d6   : > { %v4047_v6 = vmax.f32 %v3459_v29, %v3467_v19  ;;  %v2068_v8 = vpop.f32.mrb[86].mxu0  ;;  %v2421_v12 = vpop.f32.mrb[86].mxu1  ;;  %v6406_v15 = vmax.f32 %v3925_v62, %v3926_v0  ;;  %v6408_v51 = vmax.f32 %v3951_v63, %v3952_v1  ;;  %v2067_v35 = vadd.f32 %v2066_v9, %v6334_v49 }
 0x2d7   : > { %v2070_v2 = vpop.f32.mrb[87].mxu0  ;;  %v2423_v22 = vpop.f32.mrb[87].mxu1  ;;  %v2420_v28 = vadd.f32 %v2419_v4, %v6336_v50  ;;  %v3472_v29 = vmax.f32 %v2065_v55, 0.0  ;;  %v3474_v57 = vmax.f32 %v2418_v56, 0.0  ;;  %v2069_v26 = vadd.f32 %v2068_v8, %v6330_v45 }
 0x2d8   : > { %v2422_v27 = vadd.f32 %v2421_v12, %v6332_v46  ;;  %v3473_v36 = vmax.f32 %v2067_v35, 0.0  ;;  %v2071_v62 = vadd.f32 %v2070_v2, %v6334_v49  ;;  %v2424_v63 = vadd.f32 %v2423_v22, %v6336_v50 }
 0x2d9   : > { %2719 = vmatmul.mubr.bf16.vlgmr.msra.gmra.mrb[192].mxu0 %v6015_v14  ;;  %3072 = vmatmul.mubr.bf16.vlgmr.msra.gmra.mrb[192].mxu1 %v6015_v14  ;;  %v3475_v38 = vmax.f32 %v2420_v28, 0.0  ;;  %v4009_v9 = vmax.f32 %v4008_v42, %v3472_v29  ;;  %v4035_v58 = vmax.f32 %v4034_v44, %v3474_v57  ;;  %v3480_v0 = vmax.f32 %v2069_v26, 0.0 }
 0x2da   : > { %2728 = vmatprep.mubr.bf16.mxu0 %v7380_v23  ;;  %3081 = vmatprep.mubr.bf16.mxu1 %v7380_v23  ;;  %v3482_v8 = vmax.f32 %v2422_v27, 0.0  ;;  %v4022_v1 = vmax.f32 %v4021_v31, %v3473_v36  ;;  %v3481_v18 = vmax.f32 %v2071_v62, 0.0  ;;  %v3483_v19 = vmax.f32 %v2424_v63, 0.0 }
 0x2db   : > { %v4048_v12 = vmax.f32 %v4047_v6, %v3475_v38  ;;  %v4010_v25 = vmax.f32 %v4009_v9, %v3480_v0 }
 0x2dc   : > { %v2074_v24 = vpop.f32.mrb[88].mxu0  ;;  %v2427_v14 = vpop.f32.mrb[88].mxu1  ;;  %v4036_v4 = vmax.f32 %v4035_v58, %v3482_v8  ;;  %v4023_v35 = vmax.f32 %v4022_v1, %v3481_v18 }
 0x2dd   : > { %v2075_v55 = vadd.f32 %v2074_v24, %v6330_v45  ;;  %v2428_v56 = vadd.f32 %v2427_v14, %v6332_v46  ;;  %v2076_v2 = vpop.f32.mrb[89].mxu0  ;;  %v2429_v22 = vpop.f32.mrb[89].mxu1  ;;  %v4049_v28 = vmax.f32 %v4048_v12, %v3483_v19 }
 0x2de   : > { %v2077_v42 = vadd.f32 %v2076_v2, %v6334_v49  ;;  %v2430_v44 = vadd.f32 %v2429_v22, %v6336_v50  ;;  %v2078_v31 = vpop.f32.mrb[90].mxu0  ;;  %v2431_v6 = vpop.f32.mrb[90].mxu1 }
 0x2df   : > { %v3488_v29 = vmax.f32 %v2075_v55, 0.0  ;;  %v3490_v57 = vmax.f32 %v2428_v56, 0.0  ;;  %v2079_v26 = vadd.f32 %v2078_v31, %v6330_v45  ;;  %v2432_v27 = vadd.f32 %v2431_v6, %v6332_v46  ;;  %v2080_v36 = vpop.f32.mrb[91].mxu0  ;;  %v2433_v38 = vpop.f32.mrb[91].mxu1 }
 0x2e0   : > { %v3489_v62 = vmax.f32 %v2077_v42, 0.0  ;;  %v3491_v63 = vmax.f32 %v2430_v44, 0.0  ;;  %v2081_v9 = vadd.f32 %v2080_v36, %v6334_v49  ;;  %v2434_v58 = vadd.f32 %v2433_v38, %v6336_v50 }
 0x2e1   : > { %v4011_v0 = vmax.f32 %v4010_v25, %v3488_v29  ;;  %v4037_v8 = vmax.f32 %v4036_v4, %v3490_v57  ;;  %v3496_v1 = vmax.f32 %v2079_v26, 0.0  ;;  %v3498_v12 = vmax.f32 %v2432_v27, 0.0  ;;  %2729 = vmatmul.mubr.bf16.gmra.mrb[196].mxu0 %v6013_v13  ;;  %3082 = vmatmul.mubr.bf16.gmra.mrb[196].mxu1 %v6013_v13 }
 0x2e2   : > { %v4024_v18 = vmax.f32 %v4023_v35, %v3489_v62  ;;  %v4050_v19 = vmax.f32 %v4049_v28, %v3491_v63  ;;  %v3497_v24 = vmax.f32 %v2081_v9, 0.0  ;;  %v3499_v14 = vmax.f32 %v2434_v58, 0.0  ;;  %2738 = vmatprep.mubr.bf16.mxu0 %v7380_v23  ;;  %3091 = vmatprep.mubr.bf16.mxu1 %v7380_v23 }
 0x2e3   : > { %v4012_v55 = vmax.f32 %v4011_v0, %v3496_v1  ;;  %v4038_v56 = vmax.f32 %v4037_v8, %v3498_v12  ;;  %v3915_v42 = vrot.slane %v6400_v41, 1  ;;  %v3941_v44 = vrot.slane %v6402_v43, 1 }
 0x2e4   : > { %v4025_v2 = vmax.f32 %v4024_v18, %v3497_v24  ;;  %v4051_v22 = vmax.f32 %v4050_v19, %v3499_v14  ;;  %v2084_v25 = vpop.f32.mrb[92].mxu0  ;;  %v2437_v4 = vpop.f32.mrb[92].mxu1  ;;  %v3928_v6 = vrot.slane %v6406_v15, 1  ;;  %v3954_v29 = vrot.slane %v6408_v51, 1 }
 0x2e5   : > { %v2085_v13 = vadd.f32 %v2084_v25, %v6330_v45  ;;  %v2438_v35 = vadd.f32 %v2437_v4, %v6332_v46  ;;  %v2086_v28 = vpop.f32.mrb[93].mxu0  ;;  %v2439_v31 = vpop.f32.mrb[93].mxu1 }
 0x2e6   : > { %v2087_v57 = vadd.f32 %v2086_v28, %v6334_v49  ;;  %v2440_v26 = vadd.f32 %v2439_v31, %v6336_v50  ;;  %v2088_v27 = vpop.f32.mrb[94].mxu0  ;;  %v2441_v36 = vpop.f32.mrb[94].mxu1  ;;  %v6449_v31 = vmax.f32 %v6400_v41, %v3915_v42 }
 0x2e7   : > { %v3504_v38 = vmax.f32 %v2085_v13, 0.0  ;;  %v3506_v62 = vmax.f32 %v2438_v35, 0.0  ;;  %v2089_v63 = vadd.f32 %v2088_v27, %v6330_v45  ;;  %v2442_v9 = vadd.f32 %v2441_v36, %v6332_v46  ;;  %v2090_v58 = vpop.f32.mrb[95].mxu0  ;;  %v2443_v0 = vpop.f32.mrb[95].mxu1 }
 0x2e8   : > { %v3505_v8 = vmax.f32 %v2087_v57, 0.0  ;;  %v3507_v1 = vmax.f32 %v2440_v26, 0.0  ;;  %v2091_v12 = vadd.f32 %v2090_v58, %v6334_v49  ;;  %v2444_v18 = vadd.f32 %v2443_v0, %v6336_v50 }
 0x2e9   : > { %v4013_v19 = vmax.f32 %v4012_v55, %v3504_v38  ;;  %v4039_v24 = vmax.f32 %v4038_v56, %v3506_v62  ;;  %v3512_v14 = vmax.f32 %v2089_v63, 0.0  ;;  %v3514_v25 = vmax.f32 %v2442_v9, 0.0  ;;  %2739 = vmatmul.mubr.bf16.gmra.mrb[200].mxu0 %v6057_v33  ;;  %3092 = vmatmul.mubr.bf16.gmra.mrb[200].mxu1 %v6057_v33 }
 0x2ea   : > { %v4026_v4 = vmax.f32 %v4025_v2, %v3505_v8  ;;  %v4052_v13 = vmax.f32 %v4051_v22, %v3507_v1  ;;  %v3513_v35 = vmax.f32 %v2091_v12, 0.0  ;;  %v3515_v28 = vmax.f32 %v2444_v18, 0.0  ;;  %2748 = vmatprep.mubr.bf16.mxu0 %v7380_v23  ;;  %3101 = vmatprep.mubr.bf16.mxu1 %v7380_v23 }
 0x2eb   : > { %v6452_v55 = vmax.f32 %v6402_v43, %v3941_v44  ;;  %v4014_v56 = vmax.f32 %v4013_v19, %v3512_v14  ;;  %v4040_v57 = vmax.f32 %v4039_v24, %v3514_v25  ;;  %v6455_v26 = vmax.f32 %v6406_v15, %v3928_v6 }
 0x2ec   : > { %v6458_v33 = vmax.f32 %v6408_v51, %v3954_v29  ;;  %v4027_v2 = vmax.f32 %v4026_v4, %v3513_v35  ;;  %v4053_v22 = vmax.f32 %v4052_v13, %v3515_v28  ;;  %v2094_v27 = vpop.f32.mrb[96].mxu0  ;;  %v2447_v36 = vpop.f32.mrb[96].mxu1 }
 0x2ed   : > { %v4015_v38 = vrot.slane %v4014_v56, 4  ;;  %v4041_v62 = vrot.slane %v4040_v57, 4  ;;  %v2095_v41 = vadd.f32 %v2094_v27, %v6330_v45  ;;  %v2448_v42 = vadd.f32 %v2447_v36, %v6332_v46  ;;  %v2096_v43 = vpop.f32.mrb[97].mxu0  ;;  %v2449_v44 = vpop.f32.mrb[97].mxu1 }
 0x2ee   : > { %v4028_v63 = vrot.slane %v4027_v2, 4  ;;  %v4054_v9 = vrot.slane %v4053_v22, 4  ;;  %v2097_v15 = vadd.f32 %v2096_v43, %v6334_v49  ;;  %v2450_v51 = vadd.f32 %v2449_v44, %v6336_v50  ;;  %v2098_v6 = vpop.f32.mrb[98].mxu0  ;;  %v2451_v29 = vpop.f32.mrb[98].mxu1 }
 0x2ef   : > { %v4016_v58 = vmax.f32 %v4014_v56, %v4015_v38  ;;  %v4042_v0 = vmax.f32 %v4040_v57, %v4041_v62  ;;  %v3520_v8 = vmax.f32 %v2095_v41, 0.0  ;;  %v3522_v1 = vmax.f32 %v2448_v42, 0.0  ;;  %v2100_v12 = vpop.f32.mrb[99].mxu0  ;;  %v2453_v18 = vpop.f32.mrb[99].mxu1 }
 0x2f0   : > { %v4029_v19 = vmax.f32 %v4027_v2, %v4028_v63  ;;  %v4055_v24 = vmax.f32 %v4053_v22, %v4054_v9  ;;  %v3521_v14 = vmax.f32 %v2097_v15, 0.0  ;;  %v3523_v25 = vmax.f32 %v2450_v51, 0.0 }
 0x2f1   : > { %v4017_v4 = vrot.slane %v4016_v58, 2  ;;  %v4043_v13 = vrot.slane %v4042_v0, 2  ;;  %v2099_v35 = vadd.f32 %v2098_v6, %v6330_v45  ;;  %v2452_v28 = vadd.f32 %v2451_v29, %v6332_v46  ;;  %2749 = vmatmul.mubr.bf16.gmra.mrb[204].mxu0 %v6055_v32  ;;  %3102 = vmatmul.mubr.bf16.gmra.mrb[204].mxu1 %v6055_v32 }
 0x2f2   : > { %v4030_v56 = vrot.slane %v4029_v19, 2  ;;  %v4056_v57 = vrot.slane %v4055_v24, 2  ;;  %v2101_v27 = vadd.f32 %v2100_v12, %v6334_v49  ;;  %v2454_v36 = vadd.f32 %v2453_v18, %v6336_v50  ;;  %2758 = vmatprep.mubr.bf16.mxu0 %v7380_v23  ;;  %3111 = vmatprep.mubr.bf16.mxu1 %v7380_v23 }
 0x2f3   : > { %v4018_v2 = vmax.f32 %v4016_v58, %v4017_v4  ;;  %v4044_v22 = vmax.f32 %v4042_v0, %v4043_v13  ;;  %v3528_v38 = vmax.f32 %v2099_v35, 0.0  ;;  %v3530_v62 = vmax.f32 %v2452_v28, 0.0 }
 0x2f4   : > { %v4031_v41 = vmax.f32 %v4029_v19, %v4030_v56  ;;  %v4057_v42 = vmax.f32 %v4055_v24, %v4056_v57  ;;  %v3529_v43 = vmax.f32 %v2101_v27, 0.0  ;;  %v3531_v44 = vmax.f32 %v2454_v36, 0.0  ;;  %v2104_v63 = vpop.f32.mrb[100].mxu0  ;;  %v2457_v32 = vpop.f32.mrb[100].mxu1 }
 0x2f5   : > { %v4019_v9 = vrot.slane %v4018_v2, 1  ;;  %v4045_v15 = vrot.slane %v4044_v22, 1  ;;  %v4112_v51 = vmax.f32 %v3520_v8, %v3528_v38  ;;  %v4138_v6 = vmax.f32 %v3522_v1, %v3530_v62  ;;  %v2106_v29 = vpop.f32.mrb[101].mxu0  ;;  %v2459_v12 = vpop.f32.mrb[101].mxu1 }
 0x2f6   : > { %v4032_v18 = vrot.slane %v4031_v41, 1  ;;  %v4058_v16 = vrot.slane %v4057_v42, 1  ;;  %v4125_v47 = vmax.f32 %v3521_v14, %v3529_v43  ;;  %v4151_v34 = vmax.f32 %v3523_v25, %v3531_v44  ;;  %v2108_v58 = vpop.f32.mrb[102].mxu0  ;;  %v2461_v0 = vpop.f32.mrb[102].mxu1 }
 0x2f7   : > { %v4020_v4 = vmax.f32 %v4018_v2, %v4019_v9  ;;  %v4046_v13 = vmax.f32 %v4044_v22, %v4045_v15  ;;  %v2105_v19 = vadd.f32 %v2104_v63, %v6330_v45  ;;  %v2458_v24 = vadd.f32 %v2457_v32, %v6332_v46  ;;  %v2110_v35 = vpop.f32.mrb[103].mxu0  ;;  %v2463_v28 = vpop.f32.mrb[103].mxu1 }
 0x2f8   : > { %v4033_v56 = vmax.f32 %v4031_v41, %v4032_v18  ;;  %v4059_v57 = vmax.f32 %v4057_v42, %v4058_v16  ;;  %v2107_v8 = vadd.f32 %v2106_v29, %v6334_v49  ;;  %v2460_v1 = vadd.f32 %v2459_v12, %v6336_v50 }
 0x2f9   : > { %v6478_v14 = vsel %vm4800_vm3, %v4020_v4, %v6449_v31  ;;  %v6482_v25 = vsel %vm4800_vm3, %v4046_v13, %v6452_v55  ;;  %v3536_v27 = vmax.f32 %v2105_v19, 0.0  ;;  %v3538_v36 = vmax.f32 %v2458_v24, 0.0  ;;  %2759 = vmatmul.mubr.bf16.gmra.mrb[208].mxu0 %v6081_v60  ;;  %3112 = vmatmul.mubr.bf16.gmra.mrb[208].mxu1 %v6081_v60 }
 0x2fa   : > { %v6488_v16 = vsel %vm4800_vm3, %v4033_v56, %v6455_v26  ;;  %v6492_v2 = vsel %vm4800_vm3, %v4059_v57, %v6458_v33  ;;  %v3537_v31 = vmax.f32 %v2107_v8, 0.0  ;;  %v3539_v22 = vmax.f32 %v2460_v1, 0.0  ;;  %2768 = vmatprep.mubr.bf16.mxu0 %v7380_v23  ;;  %3121 = vmatprep.mubr.bf16.mxu1 %v7380_v23 }
 0x2fb   : > { %v4113_v55 = vmax.f32 %v4112_v51, %v3536_v27  ;;  %v4139_v38 = vmax.f32 %v4138_v6, %v3538_v36  ;;  %v2109_v62 = vadd.f32 %v2108_v58, %v6330_v45  ;;  %v2462_v60 = vadd.f32 %v2461_v0, %v6332_v46 }
 0x2fc   : > { %v4126_v41 = vmax.f32 %v4125_v47, %v3537_v31  ;;  %v4152_v42 = vmax.f32 %v4151_v34, %v3539_v22  ;;  %v2111_v26 = vadd.f32 %v2110_v35, %v6334_v49  ;;  %v2464_v43 = vadd.f32 %v2463_v28, %v6336_v50  ;;  %v2114_v33 = vpop.f32.mrb[104].mxu0  ;;  %v2467_v44 = vpop.f32.mrb[104].mxu1 }
 0x2fd   : > { %v3544_v63 = vmax.f32 %v2109_v62, 0.0  ;;  %v3546_v32 = vmax.f32 %v2462_v60, 0.0  ;;  %v2115_v9 = vadd.f32 %v2114_v33, %v6330_v45  ;;  %v2468_v15 = vadd.f32 %v2467_v44, %v6332_v46  ;;  %v2116_v51 = vpop.f32.mrb[105].mxu0  ;;  %v2469_v6 = vpop.f32.mrb[105].mxu1 }
 0x2fe   : > { %v3545_v29 = vmax.f32 %v2111_v26, 0.0  ;;  %v3547_v12 = vmax.f32 %v2464_v43, 0.0  ;;  %v2117_v18 = vadd.f32 %v2116_v51, %v6334_v49  ;;  %v2470_v47 = vadd.f32 %v2469_v6, %v6336_v50  ;;  %v2118_v34 = vpop.f32.mrb[106].mxu0  ;;  %v2471_v58 = vpop.f32.mrb[106].mxu1 }
 0x2ff   : > { %v4114_v0 = vmax.f32 %v4113_v55, %v3544_v63  ;;  %v4140_v4 = vmax.f32 %v4139_v38, %v3546_v32  ;;  %v3552_v13 = vmax.f32 %v2115_v9, 0.0  ;;  %v3554_v19 = vmax.f32 %v2468_v15, 0.0  ;;  %v2120_v24 = vpop.f32.mrb[107].mxu0  ;;  %v2473_v35 = vpop.f32.mrb[107].mxu1 }
 0x300   : > { %v4127_v28 = vmax.f32 %v4126_v41, %v3545_v29  ;;  %v4153_v56 = vmax.f32 %v4152_v42, %v3547_v12  ;;  %v3553_v57 = vmax.f32 %v2117_v18, 0.0  ;;  %v3555_v8 = vmax.f32 %v2470_v47, 0.0 }
 0x301   : > { %v4115_v1 = vmax.f32 %v4114_v0, %v3552_v13  ;;  %v4141_v27 = vmax.f32 %v4140_v4, %v3554_v19  ;;  %v2119_v36 = vadd.f32 %v2118_v34, %v6330_v45  ;;  %v2472_v31 = vadd.f32 %v2471_v58, %v6332_v46  ;;  %2769 = vmatmul.mubr.bf16.gmra.mrb[212].mxu0 %v6079_v59 }
 0x302   : > { %v4128_v22 = vmax.f32 %v4127_v28, %v3553_v57  ;;  %v4154_v62 = vmax.f32 %v4153_v56, %v3555_v8  ;;  %v2121_v55 = vadd.f32 %v2120_v24, %v6334_v49  ;;  %v2474_v38 = vadd.f32 %v2473_v35, %v6336_v50  ;;  %3122 = vmatmul.mubr.bf16.gmra.mrb[212].mxu1 %v6079_v59 }
 0x303   : > { %v3560_v60 = vmax.f32 %v2119_v36, 0.0  ;;  %v3562_v41 = vmax.f32 %v2472_v31, 0.0  ;;  %2778 = vmatprep.mubr.bf16.mxu0 %v7380_v23  ;;  %3131 = vmatprep.mubr.bf16.mxu1 %v7380_v23 }
 0x304   : > { %v3561_v42 = vmax.f32 %v2121_v55, 0.0  ;;  %v3563_v26 = vmax.f32 %v2474_v38, 0.0  ;;  %v2124_v43 = vpop.f32.mrb[108].mxu0  ;;  %v2477_v33 = vpop.f32.mrb[108].mxu1 }
 0x305   : > { %v4116_v44 = vmax.f32 %v4115_v1, %v3560_v60  ;;  %v4142_v63 = vmax.f32 %v4141_v27, %v3562_v41  ;;  %v2125_v32 = vadd.f32 %v2124_v43, %v6330_v45  ;;  %v2478_v9 = vadd.f32 %v2477_v33, %v6332_v46  ;;  %v2126_v15 = vpop.f32.mrb[109].mxu0  ;;  %v2479_v51 = vpop.f32.mrb[109].mxu1 }
 0x306   : > { %v4129_v6 = vmax.f32 %v4128_v22, %v3561_v42  ;;  %v4155_v59 = vmax.f32 %v4154_v62, %v3563_v26  ;;  %v2127_v29 = vadd.f32 %v2126_v15, %v6334_v49  ;;  %v2480_v12 = vadd.f32 %v2479_v51, %v6336_v50  ;;  %v2128_v18 = vpop.f32.mrb[110].mxu0  ;;  %v2481_v47 = vpop.f32.mrb[110].mxu1 }
 0x307   : > { %v3568_v34 = vmax.f32 %v2125_v32, 0.0  ;;  %v3570_v58 = vmax.f32 %v2478_v9, 0.0  ;;  %v2129_v0 = vadd.f32 %v2128_v18, %v6330_v45  ;;  %v2482_v4 = vadd.f32 %v2481_v47, %v6332_v46  ;;  %v2130_v13 = vpop.f32.mrb[111].mxu0  ;;  %v2483_v19 = vpop.f32.mrb[111].mxu1 }
 0x308   : > { %v3569_v24 = vmax.f32 %v2127_v29, 0.0  ;;  %v3571_v35 = vmax.f32 %v2480_v12, 0.0  ;;  %v2131_v28 = vadd.f32 %v2130_v13, %v6334_v49  ;;  %v2484_v56 = vadd.f32 %v2483_v19, %v6336_v50 }
 0x309   : > { %v4117_v57 = vmax.f32 %v4116_v44, %v3568_v34  ;;  %v4143_v8 = vmax.f32 %v4142_v63, %v3570_v58  ;;  %v3576_v1 = vmax.f32 %v2129_v0, 0.0  ;;  %v3578_v27 = vmax.f32 %v2482_v4, 0.0  ;;  %2779 = vmatmul.mubr.bf16.gmra.mrb[216].mxu0 %v6093_v21 }
 0x30a   : > { %v4130_v36 = vmax.f32 %v4129_v6, %v3569_v24  ;;  %v4156_v31 = vmax.f32 %v4155_v59, %v3571_v35  ;;  %v3577_v22 = vmax.f32 %v2131_v28, 0.0  ;;  %v3579_v62 = vmax.f32 %v2484_v56, 0.0  ;;  %3132 = vmatmul.mubr.bf16.gmra.mrb[216].mxu1 %v6093_v21  ;;  %2788 = vmatprep.mubr.bf16.mxu0 %v7380_v23 }
 0x30b   : > { %v4118_v55 = vmax.f32 %v4117_v57, %v3576_v1  ;;  %v4144_v38 = vmax.f32 %v4143_v8, %v3578_v27  ;;  %3141 = vmatprep.mubr.bf16.mxu1 %v7380_v23 }
 0x30c   : > { %v4131_v60 = vmax.f32 %v4130_v36, %v3577_v22  ;;  %v4157_v41 = vmax.f32 %v4156_v31, %v3579_v62  ;;  %v2134_v42 = vpop.f32.mrb[112].mxu0  ;;  %v2487_v26 = vpop.f32.mrb[112].mxu1 }
 0x30d   : > { %v4119_v43 = vrot.slane %v4118_v55, 4  ;;  %v4145_v33 = vrot.slane %v4144_v38, 4  ;;  %v2135_v44 = vadd.f32 %v2134_v42, %v6330_v45  ;;  %v2488_v63 = vadd.f32 %v2487_v26, %v6332_v46  ;;  %v2136_v32 = vpop.f32.mrb[113].mxu0  ;;  %v2489_v9 = vpop.f32.mrb[113].mxu1 }
 0x30e   : > { %v4132_v21 = vrot.slane %v4131_v60, 4  ;;  %v4158_v15 = vrot.slane %v4157_v41, 4  ;;  %v2137_v51 = vadd.f32 %v2136_v32, %v6334_v49  ;;  %v2490_v6 = vadd.f32 %v2489_v9, %v6336_v50  ;;  %v2138_v59 = vpop.f32.mrb[114].mxu0  ;;  %v2491_v29 = vpop.f32.mrb[114].mxu1 }
 0x30f   : > { %v4120_v12 = vmax.f32 %v4118_v55, %v4119_v43  ;;  %v4146_v18 = vmax.f32 %v4144_v38, %v4145_v33  ;;  %v3584_v47 = vmax.f32 %v2135_v44, 0.0  ;;  %v3586_v34 = vmax.f32 %v2488_v63, 0.0  ;;  %v2140_v58 = vpop.f32.mrb[115].mxu0  ;;  %v2493_v0 = vpop.f32.mrb[115].mxu1 }
 0x310   : > { %v4133_v4 = vmax.f32 %v4131_v60, %v4132_v21  ;;  %v4159_v13 = vmax.f32 %v4157_v41, %v4158_v15  ;;  %v3585_v19 = vmax.f32 %v2137_v51, 0.0  ;;  %v3587_v24 = vmax.f32 %v2490_v6, 0.0 }
 0x311   : > { %v4121_v35 = vrot.slane %v4120_v12, 2  ;;  %v4147_v28 = vrot.slane %v4146_v18, 2  ;;  %v2139_v56 = vadd.f32 %v2138_v59, %v6330_v45  ;;  %v2492_v57 = vadd.f32 %v2491_v29, %v6332_v46  ;;  %2789 = vmatmul.mubr.bf16.gmra.mrb[220].mxu0 %v6091_v20 }
 0x312   : > { %v4134_v8 = vrot.slane %v4133_v4, 2  ;;  %v4160_v1 = vrot.slane %v4159_v13, 2  ;;  %v2141_v27 = vadd.f32 %v2140_v58, %v6334_v49  ;;  %v2494_v36 = vadd.f32 %v2493_v0, %v6336_v50  ;;  %3142 = vmatmul.mubr.bf16.gmra.mrb[220].mxu1 %v6091_v20  ;;  %2798 = vmatprep.mubr.bf16.mxu0 %v7380_v23 }
 0x313   : > { %v4122_v31 = vmax.f32 %v4120_v12, %v4121_v35  ;;  %v4148_v22 = vmax.f32 %v4146_v18, %v4147_v28  ;;  %v3592_v62 = vmax.f32 %v2139_v56, 0.0  ;;  %v3594_v55 = vmax.f32 %v2492_v57, 0.0  ;;  %3151 = vmatprep.mubr.bf16.mxu1 %v7380_v23 }
 0x314   : > { %v4135_v38 = vmax.f32 %v4133_v4, %v4134_v8  ;;  %v4161_v60 = vmax.f32 %v4159_v13, %v4160_v1  ;;  %v3593_v41 = vmax.f32 %v2141_v27, 0.0  ;;  %v3595_v42 = vmax.f32 %v2494_v36, 0.0  ;;  %v2144_v26 = vpop.f32.mrb[116].mxu0  ;;  %v2497_v43 = vpop.f32.mrb[116].mxu1 }
 0x315   : > { %v4123_v33 = vrot.slane %v4122_v31, 1  ;;  %v4149_v44 = vrot.slane %v4148_v22, 1  ;;  %v4216_v63 = vmax.f32 %v3584_v47, %v3592_v62  ;;  %v4242_v32 = vmax.f32 %v3586_v34, %v3594_v55  ;;  %v2146_v9 = vpop.f32.mrb[117].mxu0  ;;  %v2499_v20 = vpop.f32.mrb[117].mxu1 }
 0x316   : > { %v4136_v21 = vrot.slane %v4135_v38, 1  ;;  %v4162_v15 = vrot.slane %v4161_v60, 1  ;;  %v4229_v51 = vmax.f32 %v3585_v19, %v3593_v41  ;;  %v4255_v6 = vmax.f32 %v3587_v24, %v3595_v42  ;;  %v2148_v59 = vpop.f32.mrb[118].mxu0  ;;  %v2501_v29 = vpop.f32.mrb[118].mxu1 }
 0x317   : > { %v4124_v12 = vmax.f32 %v4122_v31, %v4123_v33  ;;  %v4150_v18 = vmax.f32 %v4148_v22, %v4149_v44  ;;  %v2145_v58 = vadd.f32 %v2144_v26, %v6330_v45  ;;  %v2498_v0 = vadd.f32 %v2497_v43, %v6332_v46  ;;  %v2150_v4 = vpop.f32.mrb[119].mxu0  ;;  %v2503_v13 = vpop.f32.mrb[119].mxu1 }
 0x318   : > { %v4137_v35 = vmax.f32 %v4135_v38, %v4136_v21  ;;  %v4163_v28 = vmax.f32 %v4161_v60, %v4162_v15  ;;  %v2147_v47 = vadd.f32 %v2146_v9, %v6334_v49  ;;  %v2500_v34 = vadd.f32 %v2499_v20, %v6336_v50 }
 0x319   : > { %v6542_v19 = vsel %vm4802_vm4, %v4124_v12, %v6478_v14  ;;  %v6546_v24 = vsel %vm4802_vm4, %v4150_v18, %v6482_v25  ;;  %v3600_v56 = vmax.f32 %v2145_v58, 0.0  ;;  %v3602_v57 = vmax.f32 %v2498_v0, 0.0  ;;  %2799 = vmatmul.mubr.bf16.gmra.mrb[224].mxu0 %v6117_v40 }
 0x31a   : > { %v6551_v8 = vsel %vm4802_vm4, %v4137_v35, %v6488_v16  ;;  %v6555_v1 = vsel %vm4802_vm4, %v4163_v28, %v6492_v2  ;;  %v3601_v27 = vmax.f32 %v2147_v47, 0.0  ;;  %v3603_v36 = vmax.f32 %v2500_v34, 0.0  ;;  %3152 = vmatmul.mubr.bf16.gmra.mrb[224].mxu1 %v6117_v40  ;;  %2808 = vmatprep.mubr.bf16.mxu0 %v7380_v23 }
 0x31b   : > { %v4217_v14 = vmax.f32 %v4216_v63, %v3600_v56  ;;  %v4243_v25 = vmax.f32 %v4242_v32, %v3602_v57  ;;  %v2149_v31 = vadd.f32 %v2148_v59, %v6330_v45  ;;  %v2502_v22 = vadd.f32 %v2501_v29, %v6332_v46  ;;  %3161 = vmatprep.mubr.bf16.mxu1 %v7380_v23 }
 0x31c   : > { %v4230_v16 = vmax.f32 %v4229_v51, %v3601_v27  ;;  %v4256_v62 = vmax.f32 %v4255_v6, %v3603_v36  ;;  %v2151_v55 = vadd.f32 %v2150_v4, %v6334_v49  ;;  %v2504_v2 = vadd.f32 %v2503_v13, %v6336_v50  ;;  %v2154_v38 = vpop.f32.mrb[120].mxu0  ;;  %v2507_v60 = vpop.f32.mrb[120].mxu1 }
 0x31d   : > { %v3608_v41 = vmax.f32 %v2149_v31, 0.0  ;;  %v3610_v40 = vmax.f32 %v2502_v22, 0.0  ;;  %v2155_v42 = vadd.f32 %v2154_v38, %v6330_v45  ;;  %v2508_v26 = vadd.f32 %v2507_v60, %v6332_v46  ;;  %v2156_v43 = vpop.f32.mrb[121].mxu0  ;;  %v2509_v33 = vpop.f32.mrb[121].mxu1 }
 0x31e   : > { %v3609_v44 = vmax.f32 %v2151_v55, 0.0  ;;  %v3611_v63 = vmax.f32 %v2504_v2, 0.0  ;;  %v2157_v32 = vadd.f32 %v2156_v43, %v6334_v49  ;;  %v2510_v9 = vadd.f32 %v2509_v33, %v6336_v50  ;;  %v2158_v20 = vpop.f32.mrb[122].mxu0  ;;  %v2511_v21 = vpop.f32.mrb[122].mxu1 }
 0x31f   : > { %v4218_v15 = vmax.f32 %v4217_v14, %v3608_v41  ;;  %v4244_v51 = vmax.f32 %v4243_v25, %v3610_v40  ;;  %v3616_v6 = vmax.f32 %v2155_v42, 0.0  ;;  %v3618_v59 = vmax.f32 %v2508_v26, 0.0  ;;  %v2160_v29 = vpop.f32.mrb[123].mxu0  ;;  %v2513_v12 = vpop.f32.mrb[123].mxu1 }
 0x320   : > { %v4231_v18 = vmax.f32 %v4230_v16, %v3609_v44  ;;  %v4257_v58 = vmax.f32 %v4256_v62, %v3611_v63  ;;  %v3617_v0 = vmax.f32 %v2157_v32, 0.0  ;;  %v3619_v4 = vmax.f32 %v2510_v9, 0.0 }
 0x321   : > { %v4219_v13 = vmax.f32 %v4218_v15, %v3616_v6  ;;  %v4245_v35 = vmax.f32 %v4244_v51, %v3618_v59  ;;  %v2159_v28 = vadd.f32 %v2158_v20, %v6330_v45  ;;  %v2512_v47 = vadd.f32 %v2511_v21, %v6332_v46  ;;  %2809 = vmatmul.mubr.bf16.gmra.mrb[228].mxu0 %v6115_v39 }
 0x322   : > { %v4232_v34 = vmax.f32 %v4231_v18, %v3617_v0  ;;  %v4258_v56 = vmax.f32 %v4257_v58, %v3619_v4  ;;  %v2161_v57 = vadd.f32 %v2160_v29, %v6334_v49  ;;  %v2514_v27 = vadd.f32 %v2513_v12, %v6336_v50  ;;  %3162 = vmatmul.mubr.bf16.gmra.mrb[228].mxu1 %v6115_v39 }
 0x323   : > { %v3624_v36 = vmax.f32 %v2159_v28, 0.0  ;;  %v3626_v14 = vmax.f32 %v2512_v47, 0.0  ;;  %2818 = vmatprep.mubr.bf16.mxu0 %v7380_v23  ;;  %3171 = vmatprep.mubr.bf16.mxu1 %v7380_v23 }
 0x324   : > { %v3625_v25 = vmax.f32 %v2161_v57, 0.0  ;;  %v3627_v31 = vmax.f32 %v2514_v27, 0.0  ;;  %v2164_v22 = vpop.f32.mrb[124].mxu0  ;;  %v2517_v16 = vpop.f32.mrb[124].mxu1 }
 0x325   : > { %v4220_v62 = vmax.f32 %v4219_v13, %v3624_v36  ;;  %v4246_v55 = vmax.f32 %v4245_v35, %v3626_v14  ;;  %v2165_v2 = vadd.f32 %v2164_v22, %v6330_v45  ;;  %v2518_v38 = vadd.f32 %v2517_v16, %v6332_v46  ;;  %v2166_v60 = vpop.f32.mrb[125].mxu0  ;;  %v2519_v41 = vpop.f32.mrb[125].mxu1 }
 0x326   : > { %v4233_v40 = vmax.f32 %v4232_v34, %v3625_v25  ;;  %v4259_v39 = vmax.f32 %v4258_v56, %v3627_v31  ;;  %v2167_v42 = vadd.f32 %v2166_v60, %v6334_v49  ;;  %v2520_v26 = vadd.f32 %v2519_v41, %v6336_v50  ;;  %v2168_v43 = vpop.f32.mrb[126].mxu0  ;;  %v2521_v33 = vpop.f32.mrb[126].mxu1 }
 0x327   : > { %v3632_v44 = vmax.f32 %v2165_v2, 0.0  ;;  %v3634_v63 = vmax.f32 %v2518_v38, 0.0  ;;  %v2169_v32 = vadd.f32 %v2168_v43, %v6330_v45  ;;  %v2522_v9 = vadd.f32 %v2521_v33, %v6332_v46  ;;  %v2170_v20 = vpop.f32.mrb[127].mxu0  ;;  %v2523_v21 = vpop.f32.mrb[127].mxu1 }
 0x328   : > { %v3633_v15 = vmax.f32 %v2167_v42, 0.0  ;;  %v3635_v51 = vmax.f32 %v2520_v26, 0.0  ;;  %v2171_v6 = vadd.f32 %v2170_v20, %v6334_v49  ;;  %v2524_v59 = vadd.f32 %v2523_v21, %v6336_v50 }
 0x329   : > { %v4221_v29 = vmax.f32 %v4220_v62, %v3632_v44  ;;  %v4247_v12 = vmax.f32 %v4246_v55, %v3634_v63  ;;  %v3640_v18 = vmax.f32 %v2169_v32, 0.0  ;;  %v3642_v58 = vmax.f32 %v2522_v9, 0.0  ;;  %2819 = vmatmul.mubr.bf16.gmra.mrb[232].mxu0 %v6129_v37 }
 0x32a   : > { %v4234_v0 = vmax.f32 %v4233_v40, %v3633_v15  ;;  %v4260_v4 = vmax.f32 %v4259_v39, %v3635_v51  ;;  %v3641_v13 = vmax.f32 %v2171_v6, 0.0  ;;  %v3643_v35 = vmax.f32 %v2524_v59, 0.0  ;;  %3172 = vmatmul.mubr.bf16.gmra.mrb[232].mxu1 %v6129_v37  ;;  %2828 = vmatprep.mubr.bf16.mxu0 %v7380_v23 }
 0x32b   : > { %v4222_v28 = vmax.f32 %v4221_v29, %v3640_v18  ;;  %v4248_v47 = vmax.f32 %v4247_v12, %v3642_v58  ;;  %3181 = vmatprep.mubr.bf16.mxu1 %v7380_v23 }
 0x32c   : > { %v4235_v34 = vmax.f32 %v4234_v0, %v3641_v13  ;;  %v4261_v56 = vmax.f32 %v4260_v4, %v3643_v35  ;;  %v2174_v57 = vpop.f32.mrb[128].mxu0  ;;  %v2527_v27 = vpop.f32.mrb[128].mxu1 }
 0x32d   : > { %v4223_v36 = vrot.slane %v4222_v28, 4  ;;  %v4249_v14 = vrot.slane %v4248_v47, 4  ;;  %v2175_v25 = vadd.f32 %v2174_v57, %v6330_v45  ;;  %v2528_v31 = vadd.f32 %v2527_v27, %v6332_v46  ;;  %v2176_v22 = vpop.f32.mrb[129].mxu0  ;;  %v2529_v16 = vpop.f32.mrb[129].mxu1 }
 0x32e   : > { %v4236_v37 = vrot.slane %v4235_v34, 4  ;;  %v4262_v62 = vrot.slane %v4261_v56, 4  ;;  %v2177_v55 = vadd.f32 %v2176_v22, %v6334_v49  ;;  %v2530_v2 = vadd.f32 %v2529_v16, %v6336_v50  ;;  %v2178_v38 = vpop.f32.mrb[130].mxu0  ;;  %v2531_v60 = vpop.f32.mrb[130].mxu1 }
 0x32f   : > { %v4224_v41 = vmax.f32 %v4222_v28, %v4223_v36  ;;  %v4250_v40 = vmax.f32 %v4248_v47, %v4249_v14  ;;  %v3648_v39 = vmax.f32 %v2175_v25, 0.0  ;;  %v3650_v42 = vmax.f32 %v2528_v31, 0.0  ;;  %v2180_v26 = vpop.f32.mrb[131].mxu0  ;;  %v2533_v43 = vpop.f32.mrb[131].mxu1 }
 0x330   : > { %v4237_v33 = vmax.f32 %v4235_v34, %v4236_v37  ;;  %v4263_v44 = vmax.f32 %v4261_v56, %v4262_v62  ;;  %v3649_v63 = vmax.f32 %v2177_v55, 0.0  ;;  %v3651_v32 = vmax.f32 %v2530_v2, 0.0 }
 0x331   : > { %v4225_v9 = vrot.slane %v4224_v41, 2  ;;  %v4251_v20 = vrot.slane %v4250_v40, 2  ;;  %v2179_v21 = vadd.f32 %v2178_v38, %v6330_v45  ;;  %v2532_v15 = vadd.f32 %v2531_v60, %v6332_v46  ;;  %2829 = vmatmul.mubr.bf16.gmra.mrb[236].mxu0 %v6127_v54 }
 0x332   : > { %v4238_v51 = vrot.slane %v4237_v33, 2  ;;  %v4264_v6 = vrot.slane %v4263_v44, 2  ;;  %v2181_v59 = vadd.f32 %v2180_v26, %v6334_v49  ;;  %v2534_v29 = vadd.f32 %v2533_v43, %v6336_v50  ;;  %3182 = vmatmul.mubr.bf16.gmra.mrb[236].mxu1 %v6127_v54  ;;  %2838 = vmatprep.mubr.bf16.mxu0 %v7380_v23 }
 0x333   : > { %v4226_v12 = vmax.f32 %v4224_v41, %v4225_v9  ;;  %v4252_v18 = vmax.f32 %v4250_v40, %v4251_v20  ;;  %v3656_v58 = vmax.f32 %v2179_v21, 0.0  ;;  %v3658_v0 = vmax.f32 %v2532_v15, 0.0  ;;  %3191 = vmatprep.mubr.bf16.mxu1 %v7380_v23 }
 0x334   : > { %v4239_v4 = vmax.f32 %v4237_v33, %v4238_v51  ;;  %v4265_v13 = vmax.f32 %v4263_v44, %v4264_v6  ;;  %v3657_v35 = vmax.f32 %v2181_v59, 0.0  ;;  %v3659_v28 = vmax.f32 %v2534_v29, 0.0  ;;  %v2184_v47 = vpop.f32.mrb[132].mxu0  ;;  %v2537_v34 = vpop.f32.mrb[132].mxu1 }
 0x335   : > { %v4227_v56 = vrot.slane %v4226_v12, 1  ;;  %v4253_v57 = vrot.slane %v4252_v18, 1  ;;  %v4320_v27 = vmax.f32 %v3648_v39, %v3656_v58  ;;  %v4346_v36 = vmax.f32 %v3650_v42, %v3658_v0  ;;  %v2186_v14 = vpop.f32.mrb[133].mxu0  ;;  %v2539_v54 = vpop.f32.mrb[133].mxu1 }
 0x336   : > { %v4240_v25 = vrot.slane %v4239_v4, 1  ;;  %v4266_v31 = vrot.slane %v4265_v13, 1  ;;  %v4333_v22 = vmax.f32 %v3649_v63, %v3657_v35  ;;  %v4359_v16 = vmax.f32 %v3651_v32, %v3659_v28  ;;  %v2188_v37 = vpop.f32.mrb[134].mxu0  ;;  %v2541_v62 = vpop.f32.mrb[134].mxu1 }
 0x337   : > { %v4228_v55 = vmax.f32 %v4226_v12, %v4227_v56  ;;  %v4254_v2 = vmax.f32 %v4252_v18, %v4253_v57  ;;  %v2185_v38 = vadd.f32 %v2184_v47, %v6330_v45  ;;  %v2538_v60 = vadd.f32 %v2537_v34, %v6332_v46  ;;  %v2190_v41 = vpop.f32.mrb[135].mxu0  ;;  %v2543_v40 = vpop.f32.mrb[135].mxu1 }
 0x338   : > { %v4241_v26 = vmax.f32 %v4239_v4, %v4240_v25  ;;  %v4267_v43 = vmax.f32 %v4265_v13, %v4266_v31  ;;  %v2187_v39 = vadd.f32 %v2186_v14, %v6334_v49  ;;  %v2540_v42 = vadd.f32 %v2539_v54, %v6336_v50 }
 0x339   : > { %v6606_v33 = vsel %vm4804_vm5, %v4228_v55, %v6542_v19  ;;  %v6610_v44 = vsel %vm4804_vm5, %v4254_v2, %v6546_v24  ;;  %v3664_v63 = vmax.f32 %v2185_v38, 0.0  ;;  %v3666_v32 = vmax.f32 %v2538_v60, 0.0  ;;  %2839 = vmatmul.mubr.bf16.gmra.mrb[240].mxu0 %v6141_v10 }
 0x33a   : > { %v6615_v9 = vsel %vm4804_vm5, %v4241_v26, %v6551_v8  ;;  %v6619_v20 = vsel %vm4804_vm5, %v4267_v43, %v6555_v1  ;;  %v3665_v21 = vmax.f32 %v2187_v39, 0.0  ;;  %v3667_v15 = vmax.f32 %v2540_v42, 0.0  ;;  %3192 = vmatmul.mubr.bf16.gmra.mrb[240].mxu1 %v6141_v10  ;;  %2848 = vmatprep.mubr.bf16.mxu0 %v7380_v23 }
 0x33b   : > { %v4321_v19 = vmax.f32 %v4320_v27, %v3664_v63  ;;  %v4347_v24 = vmax.f32 %v4346_v36, %v3666_v32  ;;  %v2189_v51 = vadd.f32 %v2188_v37, %v6330_v45  ;;  %v2542_v6 = vadd.f32 %v2541_v62, %v6332_v46  ;;  %3201 = vmatprep.mubr.bf16.mxu1 %v7380_v23 }
 0x33c   : > { %v4334_v8 = vmax.f32 %v4333_v22, %v3665_v21  ;;  %v4360_v59 = vmax.f32 %v4359_v16, %v3667_v15  ;;  %v2191_v29 = vadd.f32 %v2190_v41, %v6334_v49  ;;  %v2544_v1 = vadd.f32 %v2543_v40, %v6336_v50  ;;  %v2194_v12 = vpop.f32.mrb[136].mxu0  ;;  %v2547_v18 = vpop.f32.mrb[136].mxu1 }
 0x33d   : > { %v3672_v58 = vmax.f32 %v2189_v51, 0.0  ;;  %v3674_v10 = vmax.f32 %v2542_v6, 0.0  ;;  %v2195_v0 = vadd.f32 %v2194_v12, %v6330_v45  ;;  %v2548_v4 = vadd.f32 %v2547_v18, %v6332_v46  ;;  %v2196_v13 = vpop.f32.mrb[137].mxu0  ;;  %v2549_v35 = vpop.f32.mrb[137].mxu1 }
 0x33e   : > { %v3673_v28 = vmax.f32 %v2191_v29, 0.0  ;;  %v3675_v47 = vmax.f32 %v2544_v1, 0.0  ;;  %v2197_v34 = vadd.f32 %v2196_v13, %v6334_v49  ;;  %v2550_v56 = vadd.f32 %v2549_v35, %v6336_v50  ;;  %v2198_v57 = vpop.f32.mrb[138].mxu0  ;;  %v2551_v27 = vpop.f32.mrb[138].mxu1 }
 0x33f   : > { %v4322_v36 = vmax.f32 %v4321_v19, %v3672_v58  ;;  %v4348_v14 = vmax.f32 %v4347_v24, %v3674_v10  ;;  %v3680_v54 = vmax.f32 %v2195_v0, 0.0  ;;  %v3682_v25 = vmax.f32 %v2548_v4, 0.0  ;;  %v2200_v31 = vpop.f32.mrb[139].mxu0  ;;  %v2553_v22 = vpop.f32.mrb[139].mxu1 }
 0x340   : > { %v4335_v16 = vmax.f32 %v4334_v8, %v3673_v28  ;;  %v4361_v37 = vmax.f32 %v4360_v59, %v3675_v47  ;;  %v3681_v62 = vmax.f32 %v2197_v34, 0.0  ;;  %v3683_v55 = vmax.f32 %v2550_v56, 0.0 }
 0x341   : > { %v4323_v2 = vmax.f32 %v4322_v36, %v3680_v54  ;;  %v4349_v38 = vmax.f32 %v4348_v14, %v3682_v25  ;;  %v2199_v60 = vadd.f32 %v2198_v57, %v6330_v45  ;;  %v2552_v41 = vadd.f32 %v2551_v27, %v6332_v46  ;;  %2849 = vmatmul.mubr.bf16.gmra.mrb[244].mxu0 %v6139_v7 }
 0x342   : > { %v4336_v40 = vmax.f32 %v4335_v16, %v3681_v62  ;;  %v4362_v26 = vmax.f32 %v4361_v37, %v3683_v55  ;;  %v2201_v43 = vadd.f32 %v2200_v31, %v6334_v49  ;;  %v2554_v39 = vadd.f32 %v2553_v22, %v6336_v50  ;;  %3202 = vmatmul.mubr.bf16.gmra.mrb[244].mxu1 %v6139_v7 }
 0x343   : > { %v3688_v42 = vmax.f32 %v2199_v60, 0.0  ;;  %v3690_v63 = vmax.f32 %v2552_v41, 0.0  ;;  %2858 = vmatprep.mubr.bf16.mxu0 %v7380_v23  ;;  %3211 = vmatprep.mubr.bf16.mxu1 %v7380_v23 }
 0x344   : > { %v3689_v32 = vmax.f32 %v2201_v43, 0.0  ;;  %v3691_v21 = vmax.f32 %v2554_v39, 0.0  ;;  %v2204_v15 = vpop.f32.mrb[140].mxu0  ;;  %v2557_v19 = vpop.f32.mrb[140].mxu1 }
 0x345   : > { %v4324_v24 = vmax.f32 %v4323_v2, %v3688_v42  ;;  %v4350_v51 = vmax.f32 %v4349_v38, %v3690_v63  ;;  %v2205_v6 = vadd.f32 %v2204_v15, %v6330_v45  ;;  %v2558_v8 = vadd.f32 %v2557_v19, %v6332_v46  ;;  %v2206_v59 = vpop.f32.mrb[141].mxu0  ;;  %v2559_v29 = vpop.f32.mrb[141].mxu1 }
 0x346   : > { %v4337_v1 = vmax.f32 %v4336_v40, %v3689_v32  ;;  %v4363_v7 = vmax.f32 %v4362_v26, %v3691_v21  ;;  %v2207_v12 = vadd.f32 %v2206_v59, %v6334_v49  ;;  %v2560_v18 = vadd.f32 %v2559_v29, %v6336_v50  ;;  %v2208_v58 = vpop.f32.mrb[142].mxu0  ;;  %v2561_v10 = vpop.f32.mrb[142].mxu1 }
 0x347   : > { %v3696_v0 = vmax.f32 %v2205_v6, 0.0  ;;  %v3698_v4 = vmax.f32 %v2558_v8, 0.0  ;;  %v2209_v13 = vadd.f32 %v2208_v58, %v6330_v45  ;;  %v2562_v35 = vadd.f32 %v2561_v10, %v6332_v46  ;;  %v2210_v28 = vpop.f32.mrb[143].mxu0  ;;  %v2563_v47 = vpop.f32.mrb[143].mxu1 }
 0x348   : > { %v3697_v34 = vmax.f32 %v2207_v12, 0.0  ;;  %v3699_v56 = vmax.f32 %v2560_v18, 0.0  ;;  %v2211_v57 = vadd.f32 %v2210_v28, %v6334_v49  ;;  %v2564_v27 = vadd.f32 %v2563_v47, %v6336_v50 }
 0x349   : > { %v4325_v36 = vmax.f32 %v4324_v24, %v3696_v0  ;;  %v4351_v14 = vmax.f32 %v4350_v51, %v3698_v4  ;;  %v3704_v54 = vmax.f32 %v2209_v13, 0.0  ;;  %v3706_v25 = vmax.f32 %v2562_v35, 0.0  ;;  %2859 = vmatmul.mubr.bf16.gmra.mrb[248].mxu0 %v6153_v61 }
 0x34a   : > { %v4338_v31 = vmax.f32 %v4337_v1, %v3697_v34  ;;  %v4364_v22 = vmax.f32 %v4363_v7, %v3699_v56  ;;  %v3705_v16 = vmax.f32 %v2211_v57, 0.0  ;;  %v3707_v37 = vmax.f32 %v2564_v27, 0.0  ;;  %3212 = vmatmul.mubr.bf16.gmra.mrb[248].mxu1 %v6153_v61  ;;  %2868 = vmatprep.mubr.bf16.mxu0 %v7380_v23 }
 0x34b   : > { %v4326_v62 = vmax.f32 %v4325_v36, %v3704_v54  ;;  %v4352_v55 = vmax.f32 %v4351_v14, %v3706_v25  ;;  %3221 = vmatprep.mubr.bf16.mxu1 %v7380_v23 }
 0x34c   : > { %v4339_v2 = vmax.f32 %v4338_v31, %v3705_v16  ;;  %v4365_v38 = vmax.f32 %v4364_v22, %v3707_v37  ;;  %v2214_v60 = vpop.f32.mrb[144].mxu0  ;;  %v2567_v41 = vpop.f32.mrb[144].mxu1 }
 0x34d   : > { %v4327_v40 = vrot.slane %v4326_v62, 4  ;;  %v4353_v26 = vrot.slane %v4352_v55, 4  ;;  %v2215_v43 = vadd.f32 %v2214_v60, %v6330_v45  ;;  %v2568_v39 = vadd.f32 %v2567_v41, %v6332_v46  ;;  %v2216_v42 = vpop.f32.mrb[145].mxu0  ;;  %v2569_v63 = vpop.f32.mrb[145].mxu1 }
 0x34e   : > { %v4340_v61 = vrot.slane %v4339_v2, 4  ;;  %v4366_v32 = vrot.slane %v4365_v38, 4  ;;  %v2217_v21 = vadd.f32 %v2216_v42, %v6334_v49  ;;  %v2570_v15 = vadd.f32 %v2569_v63, %v6336_v50  ;;  %v2218_v19 = vpop.f32.mrb[146].mxu0  ;;  %v2571_v24 = vpop.f32.mrb[146].mxu1 }
 0x34f   : > { %v4328_v51 = vmax.f32 %v4326_v62, %v4327_v40  ;;  %v4354_v6 = vmax.f32 %v4352_v55, %v4353_v26  ;;  %v3712_v8 = vmax.f32 %v2215_v43, 0.0  ;;  %v3714_v59 = vmax.f32 %v2568_v39, 0.0  ;;  %v2220_v29 = vpop.f32.mrb[147].mxu0  ;;  %v2573_v1 = vpop.f32.mrb[147].mxu1 }
 0x350   : > { %v4341_v7 = vmax.f32 %v4339_v2, %v4340_v61  ;;  %v4367_v12 = vmax.f32 %v4365_v38, %v4366_v32  ;;  %v3713_v18 = vmax.f32 %v2217_v21, 0.0  ;;  %v3715_v58 = vmax.f32 %v2570_v15, 0.0 }
 0x351   : > { %v4329_v10 = vrot.slane %v4328_v51, 2  ;;  %v4355_v0 = vrot.slane %v4354_v6, 2  ;;  %v2219_v4 = vadd.f32 %v2218_v19, %v6330_v45  ;;  %v2572_v13 = vadd.f32 %v2571_v24, %v6332_v46  ;;  %2869 = vmatmul.mubr.bf16.gmra.mrb[252].mxu0 %v6151_v30 }
 0x352   : > { %v4342_v35 = vrot.slane %v4341_v7, 2  ;;  %v4368_v28 = vrot.slane %v4367_v12, 2  ;;  %v2221_v47 = vadd.f32 %v2220_v29, %v6334_v49  ;;  %v2574_v34 = vadd.f32 %v2573_v1, %v6336_v50  ;;  %3222 = vmatmul.mubr.bf16.gmra.mrb[252].mxu1 %v6151_v30  ;;  %2878 = vmatprep.mubr.bf16.mxu0 %v7380_v23 }
 0x353   : > { %v4330_v56 = vmax.f32 %v4328_v51, %v4329_v10  ;;  %v4356_v57 = vmax.f32 %v4354_v6, %v4355_v0  ;;  %v3720_v27 = vmax.f32 %v2219_v4, 0.0  ;;  %v3722_v36 = vmax.f32 %v2572_v13, 0.0  ;;  %3231 = vmatprep.mubr.bf16.mxu1 %v7380_v23 }
 0x354   : > { %v4343_v14 = vmax.f32 %v4341_v7, %v4342_v35  ;;  %v4369_v54 = vmax.f32 %v4367_v12, %v4368_v28  ;;  %v3721_v25 = vmax.f32 %v2221_v47, 0.0  ;;  %v3723_v31 = vmax.f32 %v2574_v34, 0.0  ;;  %v2224_v22 = vpop.f32.mrb[148].mxu0  ;;  %v2577_v16 = vpop.f32.mrb[148].mxu1 }
 0x355   : > { %v4331_v37 = vrot.slane %v4330_v56, 1  ;;  %v4357_v62 = vrot.slane %v4356_v57, 1  ;;  %v4424_v55 = vmax.f32 %v3712_v8, %v3720_v27  ;;  %v4450_v2 = vmax.f32 %v3714_v59, %v3722_v36  ;;  %v2226_v38 = vpop.f32.mrb[149].mxu0  ;;  %v2579_v30 = vpop.f32.mrb[149].mxu1 }
 0x356   : > { %v4344_v60 = vrot.slane %v4343_v14, 1  ;;  %v4370_v41 = vrot.slane %v4369_v54, 1  ;;  %v4437_v40 = vmax.f32 %v3713_v18, %v3721_v25  ;;  %v4463_v26 = vmax.f32 %v3715_v58, %v3723_v31  ;;  %v2228_v43 = vpop.f32.mrb[150].mxu0  ;;  %v2581_v39 = vpop.f32.mrb[150].mxu1 }
 0x357   : > { %v4332_v42 = vmax.f32 %v4330_v56, %v4331_v37  ;;  %v4358_v63 = vmax.f32 %v4356_v57, %v4357_v62  ;;  %v2225_v61 = vadd.f32 %v2224_v22, %v6330_v45  ;;  %v2578_v32 = vadd.f32 %v2577_v16, %v6332_v46  ;;  %v2230_v21 = vpop.f32.mrb[151].mxu0  ;;  %v2583_v15 = vpop.f32.mrb[151].mxu1 }
 0x358   : > { %v4345_v19 = vmax.f32 %v4343_v14, %v4344_v60  ;;  %v4371_v24 = vmax.f32 %v4369_v54, %v4370_v41  ;;  %v2227_v51 = vadd.f32 %v2226_v38, %v6334_v49  ;;  %v2580_v6 = vadd.f32 %v2579_v30, %v6336_v50 }
 0x359   : > { %v6670_v8 = vsel %vm4806_vm6, %v4332_v42, %v6606_v33  ;;  %v6674_v59 = vsel %vm4806_vm6, %v4358_v63, %v6610_v44  ;;  %v3728_v29 = vmax.f32 %v2225_v61, 0.0  ;;  %v3730_v1 = vmax.f32 %v2578_v32, 0.0  ;;  %2879 = vmatmul.mubr.bf16.gmra.mrb[0].mxu0 %v6177_v53 }
 0x35a   : > { %v6679_v7 = vsel %vm4806_vm6, %v4345_v19, %v6615_v9  ;;  %v6683_v12 = vsel %vm4806_vm6, %v4371_v24, %v6619_v20  ;;  %v3729_v18 = vmax.f32 %v2227_v51, 0.0  ;;  %v3731_v58 = vmax.f32 %v2580_v6, 0.0  ;;  %3232 = vmatmul.mubr.bf16.gmra.mrb[0].mxu1 %v6177_v53  ;;  %2888 = vmatprep.mubr.bf16.mxu0 %v7380_v23 }
 0x35b   : > { %v4425_v33 = vmax.f32 %v4424_v55, %v3728_v29  ;;  %v4451_v44 = vmax.f32 %v4450_v2, %v3730_v1  ;;  %v2229_v10 = vadd.f32 %v2228_v43, %v6330_v45  ;;  %v2582_v0 = vadd.f32 %v2581_v39, %v6332_v46  ;;  %3241 = vmatprep.mubr.bf16.mxu1 %v7380_v23 }
 0x35c   : > { %v4438_v9 = vmax.f32 %v4437_v40, %v3729_v18  ;;  %v4464_v4 = vmax.f32 %v4463_v26, %v3731_v58  ;;  %v2231_v13 = vadd.f32 %v2230_v21, %v6334_v49  ;;  %v2584_v20 = vadd.f32 %v2583_v15, %v6336_v50  ;;  %v2234_v35 = vpop.f32.mrb[152].mxu0  ;;  %v2587_v28 = vpop.f32.mrb[152].mxu1 }
 0x35d   : > { %v3736_v47 = vmax.f32 %v2229_v10, 0.0  ;;  %v3738_v53 = vmax.f32 %v2582_v0, 0.0  ;;  %v2235_v34 = vadd.f32 %v2234_v35, %v6330_v45  ;;  %v2588_v56 = vadd.f32 %v2587_v28, %v6332_v46  ;;  %v2236_v57 = vpop.f32.mrb[153].mxu0  ;;  %v2589_v27 = vpop.f32.mrb[153].mxu1 }
 0x35e   : > { %v3737_v36 = vmax.f32 %v2231_v13, 0.0  ;;  %v3739_v14 = vmax.f32 %v2584_v20, 0.0  ;;  %v2237_v54 = vadd.f32 %v2236_v57, %v6334_v49  ;;  %v2590_v25 = vadd.f32 %v2589_v27, %v6336_v50  ;;  %v2238_v31 = vpop.f32.mrb[154].mxu0  ;;  %v2591_v22 = vpop.f32.mrb[154].mxu1 }
 0x35f   : > { %v4426_v16 = vmax.f32 %v4425_v33, %v3736_v47  ;;  %v4452_v37 = vmax.f32 %v4451_v44, %v3738_v53  ;;  %v3744_v62 = vmax.f32 %v2235_v34, 0.0  ;;  %v3746_v55 = vmax.f32 %v2588_v56, 0.0  ;;  %v2240_v2 = vpop.f32.mrb[155].mxu0  ;;  %v2593_v38 = vpop.f32.mrb[155].mxu1 }
 0x360   : > { %v4439_v30 = vmax.f32 %v4438_v9, %v3737_v36  ;;  %v4465_v60 = vmax.f32 %v4464_v4, %v3739_v14  ;;  %v3745_v41 = vmax.f32 %v2237_v54, 0.0  ;;  %v3747_v40 = vmax.f32 %v2590_v25, 0.0 }
 0x361   : > { %v4427_v26 = vmax.f32 %v4426_v16, %v3744_v62  ;;  %v4453_v43 = vmax.f32 %v4452_v37, %v3746_v55  ;;  %v2239_v39 = vadd.f32 %v2238_v31, %v6330_v45  ;;  %v2592_v42 = vadd.f32 %v2591_v22, %v6332_v46  ;;  %2889 = vmatmul.mubr.bf16.gmra.mrb[4].mxu0 %v6175_v52 }
 0x362   : > { %v4440_v63 = vmax.f32 %v4439_v30, %v3745_v41  ;;  %v4466_v61 = vmax.f32 %v4465_v60, %v3747_v40  ;;  %v2241_v32 = vadd.f32 %v2240_v2, %v6334_v49  ;;  %v2594_v21 = vadd.f32 %v2593_v38, %v6336_v50  ;;  %3242 = vmatmul.mubr.bf16.gmra.mrb[4].mxu1 %v6175_v52 }
 0x363   : > { %v3752_v15 = vmax.f32 %v2239_v39, 0.0  ;;  %v3754_v19 = vmax.f32 %v2592_v42, 0.0  ;;  %2898 = vmatprep.mubr.bf16.mxu0 %v7380_v23  ;;  %3251 = vmatprep.mubr.bf16.mxu1 %v7380_v23 }
 0x364   : > { %v3753_v24 = vmax.f32 %v2241_v32, 0.0  ;;  %v3755_v51 = vmax.f32 %v2594_v21, 0.0  ;;  %v2244_v6 = vpop.f32.mrb[156].mxu0  ;;  %v2597_v29 = vpop.f32.mrb[156].mxu1 }
 0x365   : > { %v4428_v1 = vmax.f32 %v4427_v26, %v3752_v15  ;;  %v4454_v18 = vmax.f32 %v4453_v43, %v3754_v19  ;;  %v2245_v58 = vadd.f32 %v2244_v6, %v6330_v45  ;;  %v2598_v33 = vadd.f32 %v2597_v29, %v6332_v46  ;;  %v2246_v44 = vpop.f32.mrb[157].mxu0  ;;  %v2599_v10 = vpop.f32.mrb[157].mxu1 }
 0x366   : > { %v4441_v0 = vmax.f32 %v4440_v63, %v3753_v24  ;;  %v4467_v52 = vmax.f32 %v4466_v61, %v3755_v51  ;;  %v2247_v9 = vadd.f32 %v2246_v44, %v6334_v49  ;;  %v2600_v4 = vadd.f32 %v2599_v10, %v6336_v50  ;;  %v2248_v13 = vpop.f32.mrb[158].mxu0  ;;  %v2601_v20 = vpop.f32.mrb[158].mxu1 }
 0x367   : > { %v3760_v35 = vmax.f32 %v2245_v58, 0.0  ;;  %v3762_v28 = vmax.f32 %v2598_v33, 0.0  ;;  %v2249_v47 = vadd.f32 %v2248_v13, %v6330_v45  ;;  %v2602_v53 = vadd.f32 %v2601_v20, %v6332_v46  ;;  %v2250_v34 = vpop.f32.mrb[159].mxu0  ;;  %v2603_v56 = vpop.f32.mrb[159].mxu1 }
 0x368   : > { %v3761_v57 = vmax.f32 %v2247_v9, 0.0  ;;  %v3763_v27 = vmax.f32 %v2600_v4, 0.0  ;;  %v2251_v36 = vadd.f32 %v2250_v34, %v6334_v49  ;;  %v2604_v14 = vadd.f32 %v2603_v56, %v6336_v50 }
 0x369   : > { %v4429_v54 = vmax.f32 %v4428_v1, %v3760_v35  ;;  %v4455_v25 = vmax.f32 %v4454_v18, %v3762_v28  ;;  %v3768_v31 = vmax.f32 %v2249_v47, 0.0  ;;  %v3770_v22 = vmax.f32 %v2602_v53, 0.0  ;;  %2899 = vmatmul.mubr.bf16.gmra.mrb[8].mxu0 %v6189_v17 }
 0x36a   : > { %v4442_v16 = vmax.f32 %v4441_v0, %v3761_v57  ;;  %v4468_v37 = vmax.f32 %v4467_v52, %v3763_v27  ;;  %v3769_v62 = vmax.f32 %v2251_v36, 0.0  ;;  %v3771_v55 = vmax.f32 %v2604_v14, 0.0  ;;  %3252 = vmatmul.mubr.bf16.gmra.mrb[8].mxu1 %v6189_v17  ;;  %2908 = vmatprep.mubr.bf16.mxu0 %v7380_v23 }
 0x36b   : > { %v4430_v2 = vmax.f32 %v4429_v54, %v3768_v31  ;;  %v4456_v38 = vmax.f32 %v4455_v25, %v3770_v22  ;;  %3261 = vmatprep.mubr.bf16.mxu1 %v7380_v23 }
 0x36c   : > { %v4443_v30 = vmax.f32 %v4442_v16, %v3769_v62  ;;  %v4469_v60 = vmax.f32 %v4468_v37, %v3771_v55  ;;  %v2254_v41 = vpop.f32.mrb[160].mxu0  ;;  %v2607_v40 = vpop.f32.mrb[160].mxu1 }
 0x36d   : > { %v4431_v26 = vrot.slane %v4430_v2, 4  ;;  %v4457_v43 = vrot.slane %v4456_v38, 4  ;;  %v2255_v39 = vadd.f32 %v2254_v41, %v6330_v45  ;;  %v2608_v42 = vadd.f32 %v2607_v40, %v6332_v46  ;;  %v2256_v63 = vpop.f32.mrb[161].mxu0  ;;  %v2609_v61 = vpop.f32.mrb[161].mxu1 }
 0x36e   : > { %v4444_v17 = vrot.slane %v4443_v30, 4  ;;  %v4470_v32 = vrot.slane %v4469_v60, 4  ;;  %v2257_v21 = vadd.f32 %v2256_v63, %v6334_v49  ;;  %v2610_v15 = vadd.f32 %v2609_v61, %v6336_v50  ;;  %v2258_v19 = vpop.f32.mrb[162].mxu0  ;;  %v2611_v24 = vpop.f32.mrb[162].mxu1 }
 0x36f   : > { %v4432_v51 = vmax.f32 %v4430_v2, %v4431_v26  ;;  %v4458_v6 = vmax.f32 %v4456_v38, %v4457_v43  ;;  %v3776_v29 = vmax.f32 %v2255_v39, 0.0  ;;  %v3778_v1 = vmax.f32 %v2608_v42, 0.0  ;;  %v2260_v18 = vpop.f32.mrb[163].mxu0  ;;  %v2613_v58 = vpop.f32.mrb[163].mxu1 }
 0x370   : > { %v4445_v33 = vmax.f32 %v4443_v30, %v4444_v17  ;;  %v4471_v44 = vmax.f32 %v4469_v60, %v4470_v32  ;;  %v3777_v10 = vmax.f32 %v2257_v21, 0.0  ;;  %v3779_v0 = vmax.f32 %v2610_v15, 0.0 }
 0x371   : > { %v4433_v52 = vrot.slane %v4432_v51, 2  ;;  %v4459_v9 = vrot.slane %v4458_v6, 2  ;;  %v2259_v4 = vadd.f32 %v2258_v19, %v6330_v45  ;;  %v2612_v13 = vadd.f32 %v2611_v24, %v6332_v46  ;;  %2909 = vmatmul.mubr.bf16.gmra.mrb[12].mxu0 %v6187_v11 }
 0x372   : > { %v4446_v20 = vrot.slane %v4445_v33, 2  ;;  %v4472_v35 = vrot.slane %v4471_v44, 2  ;;  %v2261_v28 = vadd.f32 %v2260_v18, %v6334_v49  ;;  %v2614_v47 = vadd.f32 %v2613_v58, %v6336_v50  ;;  %3262 = vmatmul.mubr.bf16.gmra.mrb[12].mxu1 %v6187_v11  ;;  %2918 = vmatprep.mubr.bf16.mxu0 %v7380_v23 }
 0x373   : > { %v4434_v53 = vmax.f32 %v4432_v51, %v4433_v52  ;;  %v4460_v34 = vmax.f32 %v4458_v6, %v4459_v9  ;;  %v3784_v56 = vmax.f32 %v2259_v4, 0.0  ;;  %v3786_v57 = vmax.f32 %v2612_v13, 0.0  ;;  %3271 = vmatprep.mubr.bf16.mxu1 %v7380_v23 }
 0x374   : > { %v4447_v27 = vmax.f32 %v4445_v33, %v4446_v20  ;;  %v4473_v36 = vmax.f32 %v4471_v44, %v4472_v35  ;;  %v3785_v14 = vmax.f32 %v2261_v28, 0.0  ;;  %v3787_v54 = vmax.f32 %v2614_v47, 0.0  ;;  %v2264_v25 = vpop.f32.mrb[164].mxu0  ;;  %v2617_v31 = vpop.f32.mrb[164].mxu1 }
 0x375   : > { %v4435_v22 = vrot.slane %v4434_v53, 1  ;;  %v4461_v16 = vrot.slane %v4460_v34, 1  ;;  %v4528_v37 = vmax.f32 %v3776_v29, %v3784_v56  ;;  %v4554_v62 = vmax.f32 %v3778_v1, %v3786_v57  ;;  %v2266_v55 = vpop.f32.mrb[165].mxu0  ;;  %v2619_v11 = vpop.f32.mrb[165].mxu1 }
 0x376   : > { %v4448_v2 = vrot.slane %v4447_v27, 1  ;;  %v4474_v38 = vrot.slane %v4473_v36, 1  ;;  %v4541_v30 = vmax.f32 %v3777_v10, %v3785_v14  ;;  %v4567_v60 = vmax.f32 %v3779_v0, %v3787_v54  ;;  %v2268_v41 = vpop.f32.mrb[166].mxu0  ;;  %v2621_v40 = vpop.f32.mrb[166].mxu1 }
 0x377   : > { %v4436_v26 = vmax.f32 %v4434_v53, %v4435_v22  ;;  %v4462_v43 = vmax.f32 %v4460_v34, %v4461_v16  ;;  %v2265_v39 = vadd.f32 %v2264_v25, %v6330_v45  ;;  %v2618_v42 = vadd.f32 %v2617_v31, %v6332_v46  ;;  %v2270_v63 = vpop.f32.mrb[167].mxu0  ;;  %v2623_v61 = vpop.f32.mrb[167].mxu1 }
 0x378   : > { %v4449_v17 = vmax.f32 %v4447_v27, %v4448_v2  ;;  %v4475_v32 = vmax.f32 %v4473_v36, %v4474_v38  ;;  %v2267_v21 = vadd.f32 %v2266_v55, %v6334_v49  ;;  %v2620_v15 = vadd.f32 %v2619_v11, %v6336_v50 }
 0x379   : > { %v6734_v19 = vsel %vm4808_vm7, %v4436_v26, %v6670_v8  ;;  %v6738_v24 = vsel %vm4808_vm7, %v4462_v43, %v6674_v59  ;;  %v3792_v51 = vmax.f32 %v2265_v39, 0.0  ;;  %v3794_v6 = vmax.f32 %v2618_v42, 0.0  ;;  %2919 = vmatmul.mubr.bf16.gmra.mrb[16].mxu0 %v6201_v5 }
 0x37a   : > { %v6743_v29 = vsel %vm4808_vm7, %v4449_v17, %v6679_v7  ;;  %v6747_v1 = vsel %vm4808_vm7, %v4475_v32, %v6683_v12  ;;  %v3793_v18 = vmax.f32 %v2267_v21, 0.0  ;;  %v3795_v58 = vmax.f32 %v2620_v15, 0.0  ;;  %3272 = vmatmul.mubr.bf16.gmra.mrb[16].mxu1 %v6201_v5  ;;  %2928 = vmatprep.mubr.bf16.mxu0 %v7380_v23 }
 0x37b   : > { %v4529_v8 = vmax.f32 %v4528_v37, %v3792_v51  ;;  %v4555_v59 = vmax.f32 %v4554_v62, %v3794_v6  ;;  %v2269_v33 = vadd.f32 %v2268_v41, %v6330_v45  ;;  %v2622_v44 = vadd.f32 %v2621_v40, %v6332_v46  ;;  %3281 = vmatprep.mubr.bf16.mxu1 %v7380_v23 }
 0x37c   : > { %v4542_v7 = vmax.f32 %v4541_v30, %v3793_v18  ;;  %v4568_v10 = vmax.f32 %v4567_v60, %v3795_v58  ;;  %v2271_v0 = vadd.f32 %v2270_v63, %v6334_v49  ;;  %v2624_v12 = vadd.f32 %v2623_v61, %v6336_v50  ;;  %v2274_v52 = vpop.f32.mrb[168].mxu0  ;;  %v2627_v9 = vpop.f32.mrb[168].mxu1 }
 0x37d   : > { %v3800_v4 = vmax.f32 %v2269_v33, 0.0  ;;  %v3802_v5 = vmax.f32 %v2622_v44, 0.0  ;;  %v2275_v13 = vadd.f32 %v2274_v52, %v6330_v45  ;;  %v2628_v20 = vadd.f32 %v2627_v9, %v6332_v46  ;;  %v2276_v35 = vpop.f32.mrb[169].mxu0  ;;  %v2629_v28 = vpop.f32.mrb[169].mxu1 }
 0x37e   : > { %v3801_v47 = vmax.f32 %v2271_v0, 0.0  ;;  %v3803_v53 = vmax.f32 %v2624_v12, 0.0  ;;  %v2277_v34 = vadd.f32 %v2276_v35, %v6334_v49  ;;  %v2630_v56 = vadd.f32 %v2629_v28, %v6336_v50  ;;  %v2278_v57 = vpop.f32.mrb[170].mxu0  ;;  %v2631_v27 = vpop.f32.mrb[170].mxu1 }
 0x37f   : > { %v4530_v36 = vmax.f32 %v4529_v8, %v3800_v4  ;;  %v4556_v14 = vmax.f32 %v4555_v59, %v3802_v5  ;;  %v3808_v54 = vmax.f32 %v2275_v13, 0.0  ;;  %v3810_v25 = vmax.f32 %v2628_v20, 0.0  ;;  %v2280_v31 = vpop.f32.mrb[171].mxu0  ;;  %v2633_v22 = vpop.f32.mrb[171].mxu1 }
 0x380   : > { %v4543_v16 = vmax.f32 %v4542_v7, %v3801_v47  ;;  %v4569_v37 = vmax.f32 %v4568_v10, %v3803_v53  ;;  %v3809_v62 = vmax.f32 %v2277_v34, 0.0  ;;  %v3811_v55 = vmax.f32 %v2630_v56, 0.0 }
 0x381   : > { %v4531_v11 = vmax.f32 %v4530_v36, %v3808_v54  ;;  %v4557_v2 = vmax.f32 %v4556_v14, %v3810_v25  ;;  %v2279_v38 = vadd.f32 %v2278_v57, %v6330_v45  ;;  %v2632_v30 = vadd.f32 %v2631_v27, %v6332_v46  ;;  %2929 = vmatmul.mubr.bf16.gmra.mrb[20].mxu0 %v6199_v3  ;;  %v7381_v54 = vld [vmem:[#allocation14_spill] sm:$0xff] }
 0x382   : > { %v4544_v60 = vmax.f32 %v4543_v16, %v3809_v62  ;;  %v4570_v41 = vmax.f32 %v4569_v37, %v3811_v55  ;;  %v2281_v40 = vadd.f32 %v2280_v31, %v6334_v49  ;;  %v2634_v26 = vadd.f32 %v2633_v22, %v6336_v50  ;;  %3282 = vmatmul.mubr.bf16.gmra.mrb[20].mxu1 %v6199_v3 }
 0x383   : > { %v3816_v43 = vmax.f32 %v2279_v38, 0.0  ;;  %v3818_v39 = vmax.f32 %v2632_v30, 0.0  ;;  %2938 = vmatprep.mubr.bf16.mxu0 %v7380_v23  ;;  %3291 = vmatprep.mubr.bf16.mxu1 %v7380_v23  ;;  %v1638_v25 = vsub.s32 4, %v7381_v54  ;;  %v1646_v31 = vsub.s32 6, %v7381_v54 }
 0x384   : > { %v3817_v42 = vmax.f32 %v2281_v40, 0.0  ;;  %v3819_v63 = vmax.f32 %v2634_v26, 0.0  ;;  %v2284_v61 = vpop.f32.mrb[172].mxu0  ;;  %v2637_v17 = vpop.f32.mrb[172].mxu1  ;;  %v1642_v55 = vsub.s32 5, %v7381_v54 }
 0x385   : > { %v4532_v32 = vmax.f32 %v4531_v11, %v3816_v43  ;;  %v4558_v21 = vmax.f32 %v4557_v2, %v3818_v39  ;;  %v2285_v15 = vadd.f32 %v2284_v61, %v6330_v45  ;;  %v2638_v51 = vadd.f32 %v2637_v17, %v6332_v46  ;;  %v2286_v6 = vpop.f32.mrb[173].mxu0  ;;  %v2639_v18 = vpop.f32.mrb[173].mxu1 }
 0x386   : > { %v4545_v58 = vmax.f32 %v4544_v60, %v3817_v42  ;;  %v4571_v3 = vmax.f32 %v4570_v41, %v3819_v63  ;;  %v2287_v8 = vadd.f32 %v2286_v6, %v6334_v49  ;;  %v2640_v59 = vadd.f32 %v2639_v18, %v6336_v50  ;;  %v2288_v33 = vpop.f32.mrb[174].mxu0  ;;  %v2641_v44 = vpop.f32.mrb[174].mxu1 }
 0x387   : > { %v3824_v7 = vmax.f32 %v2285_v15, 0.0  ;;  %v3826_v10 = vmax.f32 %v2638_v51, 0.0  ;;  %v2289_v0 = vadd.f32 %v2288_v33, %v6330_v45  ;;  %v2642_v12 = vadd.f32 %v2641_v44, %v6332_v46  ;;  %v2290_v52 = vpop.f32.mrb[175].mxu0  ;;  %v2643_v9 = vpop.f32.mrb[175].mxu1 }
 0x388   : > { %v3825_v4 = vmax.f32 %v2287_v8, 0.0  ;;  %v3827_v5 = vmax.f32 %v2640_v59, 0.0  ;;  %v2291_v13 = vadd.f32 %v2290_v52, %v6334_v49  ;;  %v2644_v20 = vadd.f32 %v2643_v9, %v6336_v50 }
 0x389   : > { %v4533_v35 = vmax.f32 %v4532_v32, %v3824_v7  ;;  %v4559_v28 = vmax.f32 %v4558_v21, %v3826_v10  ;;  %v3832_v47 = vmax.f32 %v2289_v0, 0.0  ;;  %v3834_v53 = vmax.f32 %v2642_v12, 0.0  ;;  %2939 = vmatmul.mubr.bf16.gmra.mrb[24].mxu0 %v6213_v48  ;;  %v7382_v7 = vld [vmem:[#allocation5_spill] sm:$0xff] }
 0x38a   : > { %v4546_v34 = vmax.f32 %v4545_v58, %v3825_v4  ;;  %v4572_v56 = vmax.f32 %v4571_v3, %v3827_v5  ;;  %v3833_v57 = vmax.f32 %v2291_v13, 0.0  ;;  %v3835_v27 = vmax.f32 %v2644_v20, 0.0  ;;  %3292 = vmatmul.mubr.bf16.gmra.mrb[24].mxu1 %v6213_v48  ;;  %2948 = vmatprep.mubr.bf16.mxu0 %v7380_v23 }
 0x38b   : > { %v4534_v36 = vmax.f32 %v4533_v35, %v3832_v47  ;;  %v4560_v14 = vmax.f32 %v4559_v28, %v3834_v53  ;;  %3301 = vmatprep.mubr.bf16.mxu1 %v7380_v23  ;;  %v1650_v11 = vsub.s32 7, %v7381_v54 }
 0x38c   : > { %v4547_v22 = vmax.f32 %v4546_v34, %v3833_v57  ;;  %v4573_v16 = vmax.f32 %v4572_v56, %v3835_v27  ;;  %v2294_v37 = vpop.f32.mrb[176].mxu0  ;;  %v2647_v62 = vpop.f32.mrb[176].mxu1 }
 0x38d   : > { %v4535_v2 = vrot.slane %v4534_v36, 4  ;;  %v4561_v48 = vrot.slane %v4560_v14, 4  ;;  %v2295_v38 = vadd.f32 %v2294_v37, %v6330_v45  ;;  %v2648_v30 = vadd.f32 %v2647_v62, %v6332_v46  ;;  %v2296_v60 = vpop.f32.mrb[177].mxu0  ;;  %v2649_v41 = vpop.f32.mrb[177].mxu1 }
 0x38e   : > { %v4548_v40 = vrot.slane %v4547_v22, 4  ;;  %v4574_v26 = vrot.slane %v4573_v16, 4  ;;  %v2297_v43 = vadd.f32 %v2296_v60, %v6334_v49  ;;  %v2650_v39 = vadd.f32 %v2649_v41, %v6336_v50  ;;  %v2298_v42 = vpop.f32.mrb[178].mxu0  ;;  %v2651_v63 = vpop.f32.mrb[178].mxu1 }
 0x38f   : > { %v4536_v61 = vmax.f32 %v4534_v36, %v4535_v2  ;;  %v4562_v17 = vmax.f32 %v4560_v14, %v4561_v48  ;;  %v3840_v32 = vmax.f32 %v2295_v38, 0.0  ;;  %v3842_v21 = vmax.f32 %v2648_v30, 0.0  ;;  %v2300_v15 = vpop.f32.mrb[179].mxu0  ;;  %v2653_v51 = vpop.f32.mrb[179].mxu1 }
 0x390   : > { %v4549_v6 = vmax.f32 %v4547_v22, %v4548_v40  ;;  %v4575_v18 = vmax.f32 %v4573_v16, %v4574_v26  ;;  %v3841_v58 = vmax.f32 %v2297_v43, 0.0  ;;  %v3843_v3 = vmax.f32 %v2650_v39, 0.0 }
 0x391   : > { %v4537_v8 = vrot.slane %v4536_v61, 2  ;;  %v4563_v59 = vrot.slane %v4562_v17, 2  ;;  %v2299_v33 = vadd.f32 %v2298_v42, %v6330_v45  ;;  %v2652_v44 = vadd.f32 %v2651_v63, %v6332_v46  ;;  %2949 = vmatmul.mubr.bf16.gmra.mrb[28].mxu0 %v7382_v7 }
 0x392   : > { %v4550_v10 = vrot.slane %v4549_v6, 2  ;;  %v4576_v0 = vrot.slane %v4575_v18, 2  ;;  %v2301_v12 = vadd.f32 %v2300_v15, %v6334_v49  ;;  %v2654_v52 = vadd.f32 %v2653_v51, %v6336_v50  ;;  %3302 = vmatmul.mubr.bf16.gmra.mrb[28].mxu1 %v7382_v7  ;;  %2958 = vmatprep.mubr.bf16.mxu0 %v7380_v23  ;;  %v7383_v51 = vld [vmem:[#allocation7_spill] sm:$0xff] }
 0x393   : > { %v4538_v9 = vmax.f32 %v4536_v61, %v4537_v8  ;;  %v4564_v4 = vmax.f32 %v4562_v17, %v4563_v59  ;;  %v3848_v5 = vmax.f32 %v2299_v33, 0.0  ;;  %v3850_v13 = vmax.f32 %v2652_v44, 0.0  ;;  %3311 = vmatprep.mubr.bf16.mxu1 %v7380_v23 }
 0x394   : > { %v4551_v20 = vmax.f32 %v4549_v6, %v4550_v10  ;;  %v4577_v35 = vmax.f32 %v4575_v18, %v4576_v0  ;;  %v3849_v28 = vmax.f32 %v2301_v12, 0.0  ;;  %v3851_v47 = vmax.f32 %v2654_v52, 0.0  ;;  %v2304_v53 = vpop.f32.mrb[180].mxu0  ;;  %v2657_v34 = vpop.f32.mrb[180].mxu1 }
 0x395   : > { %v4539_v56 = vrot.slane %v4538_v9, 1  ;;  %v4565_v57 = vrot.slane %v4564_v4, 1  ;;  %v4632_v27 = vmax.f32 %v3840_v32, %v3848_v5  ;;  %v4658_v36 = vmax.f32 %v3842_v21, %v3850_v13  ;;  %v2306_v14 = vpop.f32.mrb[181].mxu0  ;;  %v2659_v22 = vpop.f32.mrb[181].mxu1 }
 0x396   : > { %v4552_v16 = vrot.slane %v4551_v20, 1  ;;  %v4578_v37 = vrot.slane %v4577_v35, 1  ;;  %v4645_v62 = vmax.f32 %v3841_v58, %v3849_v28  ;;  %v4671_v2 = vmax.f32 %v3843_v3, %v3851_v47  ;;  %v2308_v48 = vpop.f32.mrb[182].mxu0  ;;  %v2661_v38 = vpop.f32.mrb[182].mxu1 }
 0x397   : > { %v4540_v30 = vmax.f32 %v4538_v9, %v4539_v56  ;;  %v4566_v60 = vmax.f32 %v4564_v4, %v4565_v57  ;;  %v2305_v41 = vadd.f32 %v2304_v53, %v6330_v45  ;;  %v2658_v40 = vadd.f32 %v2657_v34, %v6332_v46  ;;  %v2310_v26 = vpop.f32.mrb[183].mxu0  ;;  %v2663_v43 = vpop.f32.mrb[183].mxu1 }
 0x398   : > { %v4553_v39 = vmax.f32 %v4551_v20, %v4552_v16  ;;  %v4579_v42 = vmax.f32 %v4577_v35, %v4578_v37  ;;  %v2307_v63 = vadd.f32 %v2306_v14, %v6334_v49  ;;  %v2660_v61 = vadd.f32 %v2659_v22, %v6336_v50 }
 0x399   : > { %v6802_v17 = vsel %vm4810_vm8, %v4540_v30, %v6734_v19  ;;  %v6806_v32 = vsel %vm4810_vm8, %v4566_v60, %v6738_v24  ;;  %v3856_v21 = vmax.f32 %v2305_v41, 0.0  ;;  %v3858_v15 = vmax.f32 %v2658_v40, 0.0  ;;  %2959 = vmatmul.mubr.bf16.gmra.mrb[32].mxu0 %v7383_v51  ;;  %v7384_v60 = vld [vmem:[#allocation6_spill] sm:$0xff] }
 0x39a   : > { %v6811_v6 = vsel %vm4810_vm8, %v4553_v39, %v6743_v29  ;;  %v6815_v18 = vsel %vm4810_vm8, %v4579_v42, %v6747_v1  ;;  %v3857_v58 = vmax.f32 %v2307_v63, 0.0  ;;  %v3859_v3 = vmax.f32 %v2660_v61, 0.0  ;;  %3312 = vmatmul.mubr.bf16.gmra.mrb[32].mxu1 %v7383_v51  ;;  %2968 = vmatprep.mubr.bf16.mxu0 %v7380_v23  ;;  %v5450_v63 = vld [vmem:[%s7344_s6] sm:$0xff] }
 0x39b   : > { %v4633_v19 = vmax.f32 %v4632_v27, %v3856_v21  ;;  %v4659_v24 = vmax.f32 %v4658_v36, %v3858_v15  ;;  %v2309_v8 = vadd.f32 %v2308_v48, %v6330_v45  ;;  %v2662_v59 = vadd.f32 %v2661_v38, %v6332_v46  ;;  %3321 = vmatprep.mubr.bf16.mxu1 %v7380_v23 }
 0x39c   : > { %v4646_v29 = vmax.f32 %v4645_v62, %v3857_v58  ;;  %v4672_v33 = vmax.f32 %v4671_v2, %v3859_v3  ;;  %v2311_v44 = vadd.f32 %v2310_v26, %v6334_v49  ;;  %v2664_v1 = vadd.f32 %v2663_v43, %v6336_v50  ;;  %v2314_v7 = vpop.f32.mrb[184].mxu0  ;;  %v2667_v10 = vpop.f32.mrb[184].mxu1 }
 0x39d   : > { %v3864_v0 = vmax.f32 %v2309_v8, 0.0  ;;  %v3866_v12 = vmax.f32 %v2662_v59, 0.0  ;;  %v2315_v52 = vadd.f32 %v2314_v7, %v6330_v45  ;;  %v2668_v9 = vadd.f32 %v2667_v10, %v6332_v46  ;;  %v2316_v4 = vpop.f32.mrb[185].mxu0  ;;  %v2669_v5 = vpop.f32.mrb[185].mxu1 }
 0x39e   : > { %v3865_v13 = vmax.f32 %v2311_v44, 0.0  ;;  %v3867_v20 = vmax.f32 %v2664_v1, 0.0  ;;  %v2317_v35 = vadd.f32 %v2316_v4, %v6334_v49  ;;  %v2670_v28 = vadd.f32 %v2669_v5, %v6336_v50  ;;  %v2318_v47 = vpop.f32.mrb[186].mxu0  ;;  %v2671_v53 = vpop.f32.mrb[186].mxu1 }
 0x39f   : > { %v4634_v34 = vmax.f32 %v4633_v19, %v3864_v0  ;;  %v4660_v56 = vmax.f32 %v4659_v24, %v3866_v12  ;;  %v3872_v57 = vmax.f32 %v2315_v52, 0.0  ;;  %v3874_v27 = vmax.f32 %v2668_v9, 0.0  ;;  %v2320_v36 = vpop.f32.mrb[187].mxu0  ;;  %v2673_v14 = vpop.f32.mrb[187].mxu1 }
 0x3a0   : > { %v4647_v22 = vmax.f32 %v4646_v29, %v3865_v13  ;;  %v4673_v16 = vmax.f32 %v4672_v33, %v3867_v20  ;;  %v3873_v37 = vmax.f32 %v2317_v35, 0.0  ;;  %v3875_v62 = vmax.f32 %v2670_v28, 0.0 }
 0x3a1   : > { %v4635_v2 = vmax.f32 %v4634_v34, %v3872_v57  ;;  %v4661_v48 = vmax.f32 %v4660_v56, %v3874_v27  ;;  %v2319_v38 = vadd.f32 %v2318_v47, %v6330_v45  ;;  %v2672_v30 = vadd.f32 %v2671_v53, %v6332_v46  ;;  %2969 = vmatmul.mubr.bf16.gmra.mrb[36].mxu0 %v7384_v60  ;;  %v7385_v56 = vld [vmem:[#allocation9_spill] sm:$0xff] }
 0x3a2   : > { %v4648_v41 = vmax.f32 %v4647_v22, %v3873_v37  ;;  %v4674_v40 = vmax.f32 %v4673_v16, %v3875_v62  ;;  %v2321_v26 = vadd.f32 %v2320_v36, %v6334_v49  ;;  %v2674_v43 = vadd.f32 %v2673_v14, %v6336_v50  ;;  %3322 = vmatmul.mubr.bf16.gmra.mrb[36].mxu1 %v7384_v60 }
 0x3a3   : > { %v3880_v39 = vmax.f32 %v2319_v38, 0.0  ;;  %v3882_v42 = vmax.f32 %v2672_v30, 0.0  ;;  %2978 = vmatprep.mubr.bf16.mxu0 %v7380_v23  ;;  %3331 = vmatprep.mubr.bf16.mxu1 %v7380_v23  ;;  %v6841_v61 = vrot.slane %v5450_v63, %v1638_v25  ;;  %v6845_v21 = vrot.slane %v5450_v63, %v1646_v31 }
 0x3a4   : > { %v3881_v15 = vmax.f32 %v2321_v26, 0.0  ;;  %v3883_v51 = vmax.f32 %v2674_v43, 0.0  ;;  %v2324_v58 = vpop.f32.mrb[188].mxu0  ;;  %v2677_v3 = vpop.f32.mrb[188].mxu1  ;;  %v6849_v19 = vrot.slane %v5450_v63, %v1642_v55  ;;  %v6853_v24 = vrot.slane %v5450_v63, %v1650_v11 }
 0x3a5   : > { %v4636_v8 = vmax.f32 %v4635_v2, %v3880_v39  ;;  %v4662_v59 = vmax.f32 %v4661_v48, %v3882_v42  ;;  %v2325_v25 = vadd.f32 %v2324_v58, %v6330_v45  ;;  %v2678_v29 = vadd.f32 %v2677_v3, %v6332_v46  ;;  %v2326_v31 = vpop.f32.mrb[189].mxu0  ;;  %v2679_v33 = vpop.f32.mrb[189].mxu1 }
 0x3a6   : > { %v4649_v44 = vmax.f32 %v4648_v41, %v3881_v15  ;;  %v4675_v1 = vmax.f32 %v4674_v40, %v3883_v51  ;;  %v2327_v7 = vadd.f32 %v2326_v31, %v6334_v49  ;;  %v2680_v10 = vadd.f32 %v2679_v33, %v6336_v50  ;;  %v2328_v55 = vpop.f32.mrb[190].mxu0  ;;  %v2681_v0 = vpop.f32.mrb[190].mxu1 }
 0x3a7   : > { %v3888_v12 = vmax.f32 %v2325_v25, 0.0  ;;  %v3890_v54 = vmax.f32 %v2678_v29, 0.0  ;;  %v2329_v11 = vadd.f32 %v2328_v55, %v6330_v45  ;;  %v2682_v52 = vadd.f32 %v2681_v0, %v6332_v46  ;;  %v2330_v9 = vpop.f32.mrb[191].mxu0  ;;  %v2683_v4 = vpop.f32.mrb[191].mxu1 }
 0x3a8   : > { %v3889_v5 = vmax.f32 %v2327_v7, 0.0  ;;  %v3891_v13 = vmax.f32 %v2680_v10, 0.0  ;;  %v2331_v20 = vadd.f32 %v2330_v9, %v6334_v49  ;;  %v2684_v35 = vadd.f32 %v2683_v4, %v6336_v50  ;;  %v7386_v7 = vld [vmem:[#allocation8_spill] sm:$0xff] }
 0x3a9   : > { %v4637_v28 = vmax.f32 %v4636_v8, %v3888_v12  ;;  %v4663_v47 = vmax.f32 %v4662_v59, %v3890_v54  ;;  %v3896_v53 = vmax.f32 %v2329_v11, 0.0  ;;  %v3898_v34 = vmax.f32 %v2682_v52, 0.0  ;;  %2979 = vmatmul.mubr.bf16.gmra.mrb[40].mxu0 %v7385_v56 }
 0x3aa   : > { %v4650_v57 = vmax.f32 %v4649_v44, %v3889_v5  ;;  %v4676_v27 = vmax.f32 %v4675_v1, %v3891_v13  ;;  %v3897_v36 = vmax.f32 %v2331_v20, 0.0  ;;  %v3899_v45 = vmax.f32 %v2684_v35, 0.0  ;;  %3332 = vmatmul.mubr.bf16.gmra.mrb[40].mxu1 %v7385_v56  ;;  %2988 = vmatprep.mubr.bf16.mxu0 %v7380_v23 }
 0x3ab   : > { %v4638_v46 = vmax.f32 %v4637_v28, %v3896_v53  ;;  %v4664_v14 = vmax.f32 %v4663_v47, %v3898_v34  ;;  %3341 = vmatprep.mubr.bf16.mxu1 %v7380_v23 }
 0x3ac   : > { %v4651_v49 = vmax.f32 %v4650_v57, %v3897_v36  ;;  %v4677_v50 = vmax.f32 %v4676_v27, %v3899_v45  ;;  %v2720_v22 = vpop.f32.mrb[192].mxu0  ;;  %v3073_v16 = vpop.f32.mrb[192].mxu1 }
 0x3ad   : > { %v4639_v37 = vrot.slane %v4638_v46, 4  ;;  %v4665_v62 = vrot.slane %v4664_v14, 4  ;;  %v2721_v2 = vadd.f32 %v2720_v22, %v6841_v61  ;;  %v3074_v48 = vadd.f32 %v3073_v16, %v6845_v21  ;;  %v2722_v38 = vpop.f32.mrb[193].mxu0  ;;  %v3075_v30 = vpop.f32.mrb[193].mxu1 }
 0x3ae   : > { %v4652_v60 = vrot.slane %v4651_v49, 4  ;;  %v4678_v41 = vrot.slane %v4677_v50, 4  ;;  %v2723_v40 = vadd.f32 %v2722_v38, %v6849_v19  ;;  %v3076_v26 = vadd.f32 %v3075_v30, %v6853_v24  ;;  %v2724_v43 = vpop.f32.mrb[194].mxu0  ;;  %v3077_v39 = vpop.f32.mrb[194].mxu1 }
 0x3af   : > { %v4640_v42 = vmax.f32 %v4638_v46, %v4639_v37  ;;  %v4666_v63 = vmax.f32 %v4664_v14, %v4665_v62  ;;  %v3396_v15 = vmax.f32 %v2721_v2, 0.0  ;;  %v3398_v51 = vmax.f32 %v3074_v48, 0.0  ;;  %v2726_v58 = vpop.f32.mrb[195].mxu0  ;;  %v3079_v3 = vpop.f32.mrb[195].mxu1 }
 0x3b0   : > { %v4653_v8 = vmax.f32 %v4651_v49, %v4652_v60  ;;  %v4679_v59 = vmax.f32 %v4677_v50, %v4678_v41  ;;  %v3397_v25 = vmax.f32 %v2723_v40, 0.0  ;;  %v3399_v29 = vmax.f32 %v3076_v26, 0.0 }
 0x3b1   : > { %v4641_v31 = vrot.slane %v4640_v42, 2  ;;  %v4667_v33 = vrot.slane %v4666_v63, 2  ;;  %v2725_v44 = vadd.f32 %v2724_v43, %v6841_v61  ;;  %v3078_v1 = vadd.f32 %v3077_v39, %v6845_v21  ;;  %2989 = vmatmul.mubr.bf16.gmra.mrb[44].mxu0 %v7386_v7 }
 0x3b2   : > { %v4654_v10 = vrot.slane %v4653_v8, 2  ;;  %v4680_v55 = vrot.slane %v4679_v59, 2  ;;  %v2727_v0 = vadd.f32 %v2726_v58, %v6849_v19  ;;  %v3080_v12 = vadd.f32 %v3079_v3, %v6853_v24  ;;  %3342 = vmatmul.mubr.bf16.gmra.mrb[44].mxu1 %v7386_v7  ;;  %2998 = vmatprep.mubr.bf16.mxu0 %v7380_v23 }
 0x3b3   : > { %v4642_v54 = vmax.f32 %v4640_v42, %v4641_v31  ;;  %v4668_v11 = vmax.f32 %v4666_v63, %v4667_v33  ;;  %v3404_v52 = vmax.f32 %v2725_v44, 0.0  ;;  %v3406_v9 = vmax.f32 %v3078_v1, 0.0  ;;  %3351 = vmatprep.mubr.bf16.mxu1 %v7380_v23  ;;  %v7387_v42 = vld [vmem:[#allocation11_spill] sm:$0xff] }
 0x3b4   : > { %v4655_v4 = vmax.f32 %v4653_v8, %v4654_v10  ;;  %v4681_v5 = vmax.f32 %v4679_v59, %v4680_v55  ;;  %v3405_v13 = vmax.f32 %v2727_v0, 0.0  ;;  %v3407_v20 = vmax.f32 %v3080_v12, 0.0  ;;  %v2730_v35 = vpop.f32.mrb[196].mxu0  ;;  %v3083_v28 = vpop.f32.mrb[196].mxu1 }
 0x3b5   : > { %v4643_v47 = vrot.slane %v4642_v54, 1  ;;  %v4669_v53 = vrot.slane %v4668_v11, 1  ;;  %v3956_v34 = vmax.f32 %v3396_v15, %v3404_v52  ;;  %v3982_v56 = vmax.f32 %v3398_v51, %v3406_v9  ;;  %v2732_v57 = vpop.f32.mrb[197].mxu0  ;;  %v3085_v27 = vpop.f32.mrb[197].mxu1 }
 0x3b6   : > { %v4656_v36 = vrot.slane %v4655_v4, 1  ;;  %v4682_v45 = vrot.slane %v4681_v5, 1  ;;  %v3969_v46 = vmax.f32 %v3397_v25, %v3405_v13  ;;  %v3995_v14 = vmax.f32 %v3399_v29, %v3407_v20  ;;  %v2734_v49 = vpop.f32.mrb[198].mxu0  ;;  %v3087_v50 = vpop.f32.mrb[198].mxu1 }
 0x3b7   : > { %v4644_v22 = vmax.f32 %v4642_v54, %v4643_v47  ;;  %v4670_v16 = vmax.f32 %v4668_v11, %v4669_v53  ;;  %v2731_v37 = vadd.f32 %v2730_v35, %v6841_v61  ;;  %v3084_v62 = vadd.f32 %v3083_v28, %v6845_v21  ;;  %v2736_v2 = vpop.f32.mrb[199].mxu0  ;;  %v3089_v48 = vpop.f32.mrb[199].mxu1 }
 0x3b8   : > { %v4657_v38 = vmax.f32 %v4655_v4, %v4656_v36  ;;  %v4683_v30 = vmax.f32 %v4681_v5, %v4682_v45  ;;  %v2733_v60 = vadd.f32 %v2732_v57, %v6849_v19  ;;  %v3086_v41 = vadd.f32 %v3085_v27, %v6853_v24 }
 0x3b9   : > { %v4813_v40 = vsel %vm4812_vm9, %v4644_v22, %v6802_v17  ;;  %v4827_v26 = vsel %vm4812_vm9, %v4670_v16, %v6806_v32  ;;  %v3412_v43 = vmax.f32 %v2731_v37, 0.0  ;;  %v3414_v39 = vmax.f32 %v3084_v62, 0.0  ;;  %2999 = vmatmul.mubr.bf16.gmra.mrb[48].mxu0 %v7387_v42 }
 0x3ba   : > { %4871 = vst [vmem:[%s6894_s9] sm:$0xff] %v4813_v40  ;;  %4873 = vst [vmem:[%s6894_s9 + $0x10] sm:$0xff] %v4827_v26  ;;  %v4820_v63 = vsel %vm4812_vm9, %v4657_v38, %v6811_v6  ;;  %v4834_v17 = vsel %vm4812_vm9, %v4683_v30, %v6815_v18  ;;  %v3413_v15 = vmax.f32 %v2733_v60, 0.0  ;;  %v3415_v32 = vmax.f32 %v3086_v41, 0.0  ;;  %3352 = vmatmul.mubr.bf16.gmra.mrb[48].mxu1 %v7387_v42 }
 0x3bb   : > { %3008 = vmatprep.mubr.bf16.mxu0 %v7380_v23  ;;  %4872 = vst [vmem:[%s6894_s9 + $0x8] sm:$0xff] %v4820_v63  ;;  %4874 = vst [vmem:[%s6894_s9 + $0x18] sm:$0xff] %v4834_v17  ;;  %v3957_v51 = vmax.f32 %v3956_v34, %v3412_v43  ;;  %v3983_v58 = vmax.f32 %v3982_v56, %v3414_v39  ;;  %v2735_v3 = vadd.f32 %v2734_v49, %v6841_v61 }
 0x3bc   : > { %v3088_v8 = vadd.f32 %v3087_v50, %v6845_v21  ;;  %3361 = vmatprep.mubr.bf16.mxu1 %v7380_v23  ;;  %v3970_v6 = vmax.f32 %v3969_v46, %v3413_v15  ;;  %v3996_v59 = vmax.f32 %v3995_v14, %v3415_v32  ;;  %v2737_v18 = vadd.f32 %v2736_v2, %v6849_v19  ;;  %v2740_v29 = vpop.f32.mrb[200].mxu0  ;;  %v3093_v31 = vpop.f32.mrb[200].mxu1  ;;  %v7388_v46 = vld [vmem:[#allocation10_spill] sm:$0xff] }
 0x3bd   : > { %v3090_v25 = vadd.f32 %v3089_v48, %v6853_v24  ;;  %v3420_v33 = vmax.f32 %v2735_v3, 0.0  ;;  %v2741_v1 = vadd.f32 %v2740_v29, %v6841_v61  ;;  %v3094_v7 = vadd.f32 %v3093_v31, %v6845_v21  ;;  %v2742_v10 = vpop.f32.mrb[201].mxu0  ;;  %v3095_v55 = vpop.f32.mrb[201].mxu1 }
 0x3be   : > { %v3422_v44 = vmax.f32 %v3088_v8, 0.0  ;;  %v3421_v0 = vmax.f32 %v2737_v18, 0.0  ;;  %v2743_v54 = vadd.f32 %v2742_v10, %v6849_v19  ;;  %v3096_v11 = vadd.f32 %v3095_v55, %v6853_v24  ;;  %v2744_v52 = vpop.f32.mrb[202].mxu0  ;;  %v3097_v9 = vpop.f32.mrb[202].mxu1  ;;  %v7389_v10 = vld [vmem:[#allocation13_spill] sm:$0xff] }
 0x3bf   : > { %v3423_v12 = vmax.f32 %v3090_v25, 0.0  ;;  %v3958_v4 = vmax.f32 %v3957_v51, %v3420_v33  ;;  %v3428_v13 = vmax.f32 %v2741_v1, 0.0  ;;  %v3430_v20 = vmax.f32 %v3094_v7, 0.0  ;;  %v2746_v35 = vpop.f32.mrb[203].mxu0  ;;  %v3099_v28 = vpop.f32.mrb[203].mxu1 }
 0x3c0   : > { %v3984_v5 = vmax.f32 %v3983_v58, %v3422_v44  ;;  %v3971_v47 = vmax.f32 %v3970_v6, %v3421_v0  ;;  %v3429_v34 = vmax.f32 %v2743_v54, 0.0  ;;  %v3431_v56 = vmax.f32 %v3096_v11, 0.0 }
 0x3c1   : > { %v3997_v53 = vmax.f32 %v3996_v59, %v3423_v12  ;;  %v3959_v57 = vmax.f32 %v3958_v4, %v3428_v13  ;;  %v2745_v36 = vadd.f32 %v2744_v52, %v6841_v61  ;;  %v3098_v45 = vadd.f32 %v3097_v9, %v6845_v21  ;;  %3009 = vmatmul.mubr.bf16.gmra.mrb[52].mxu0 %v7388_v46 }
 0x3c2   : > { %v3985_v27 = vmax.f32 %v3984_v5, %v3430_v20  ;;  %v3972_v14 = vmax.f32 %v3971_v47, %v3429_v34  ;;  %v2747_v50 = vadd.f32 %v2746_v35, %v6849_v19  ;;  %v3100_v22 = vadd.f32 %v3099_v28, %v6853_v24  ;;  %3362 = vmatmul.mubr.bf16.gmra.mrb[52].mxu1 %v7388_v46 }
 0x3c3   : > { %v3998_v49 = vmax.f32 %v3997_v53, %v3431_v56  ;;  %v3436_v16 = vmax.f32 %v2745_v36, 0.0  ;;  %v3438_v37 = vmax.f32 %v3098_v45, 0.0  ;;  %3018 = vmatprep.mubr.bf16.mxu0 %v7380_v23  ;;  %3371 = vmatprep.mubr.bf16.mxu1 %v7380_v23 }
 0x3c4   : > { %v3437_v62 = vmax.f32 %v2747_v50, 0.0  ;;  %v3439_v2 = vmax.f32 %v3100_v22, 0.0  ;;  %v2750_v48 = vpop.f32.mrb[204].mxu0  ;;  %v3103_v38 = vpop.f32.mrb[204].mxu1 }
 0x3c5   : > { %v3960_v30 = vmax.f32 %v3959_v57, %v3436_v16  ;;  %v3986_v60 = vmax.f32 %v3985_v27, %v3438_v37  ;;  %v2751_v41 = vadd.f32 %v2750_v48, %v6841_v61  ;;  %v3104_v40 = vadd.f32 %v3103_v38, %v6845_v21  ;;  %v2752_v26 = vpop.f32.mrb[205].mxu0  ;;  %v3105_v43 = vpop.f32.mrb[205].mxu1 }
 0x3c6   : > { %v3973_v39 = vmax.f32 %v3972_v14, %v3437_v62  ;;  %v3999_v42 = vmax.f32 %v3998_v49, %v3439_v2  ;;  %v2753_v63 = vadd.f32 %v2752_v26, %v6849_v19  ;;  %v3106_v17 = vadd.f32 %v3105_v43, %v6853_v24  ;;  %v2754_v15 = vpop.f32.mrb[206].mxu0  ;;  %v3107_v32 = vpop.f32.mrb[206].mxu1  ;;  %v7390_v62 = vld [vmem:[#allocation12_spill] sm:$0xff] }
 0x3c7   : > { %v3444_v51 = vmax.f32 %v2751_v41, 0.0  ;;  %v3446_v58 = vmax.f32 %v3104_v40, 0.0  ;;  %v2755_v3 = vadd.f32 %v2754_v15, %v6841_v61  ;;  %v3108_v8 = vadd.f32 %v3107_v32, %v6845_v21  ;;  %v2756_v6 = vpop.f32.mrb[207].mxu0  ;;  %v3109_v59 = vpop.f32.mrb[207].mxu1 }
 0x3c8   : > { %v3445_v18 = vmax.f32 %v2753_v63, 0.0  ;;  %v3447_v25 = vmax.f32 %v3106_v17, 0.0  ;;  %v2757_v29 = vadd.f32 %v2756_v6, %v6849_v19  ;;  %v3110_v31 = vadd.f32 %v3109_v59, %v6853_v24 }
 0x3c9   : > { %v3961_v33 = vmax.f32 %v3960_v30, %v3444_v51  ;;  %v3987_v44 = vmax.f32 %v3986_v60, %v3446_v58  ;;  %v3452_v1 = vmax.f32 %v2755_v3, 0.0  ;;  %v3454_v7 = vmax.f32 %v3108_v8, 0.0  ;;  %3019 = vmatmul.mubr.bf16.gmra.mrb[56].mxu0 %v7389_v10 }
 0x3ca   : > { %v3974_v55 = vmax.f32 %v3973_v39, %v3445_v18  ;;  %v4000_v0 = vmax.f32 %v3999_v42, %v3447_v25  ;;  %v3453_v12 = vmax.f32 %v2757_v29, 0.0  ;;  %v3455_v54 = vmax.f32 %v3110_v31, 0.0  ;;  %3372 = vmatmul.mubr.bf16.gmra.mrb[56].mxu1 %v7389_v10  ;;  %3028 = vmatprep.mubr.bf16.mxu0 %v7380_v23 }
 0x3cb   : > { %v3962_v11 = vmax.f32 %v3961_v33, %v3452_v1  ;;  %v3988_v52 = vmax.f32 %v3987_v44, %v3454_v7  ;;  %3381 = vmatprep.mubr.bf16.mxu1 %v7380_v23 }
 0x3cc   : > { %v3975_v9 = vmax.f32 %v3974_v55, %v3453_v12  ;;  %v4001_v4 = vmax.f32 %v4000_v0, %v3455_v54  ;;  %v2760_v5 = vpop.f32.mrb[208].mxu0  ;;  %v3113_v13 = vpop.f32.mrb[208].mxu1 }
 0x3cd   : > { %v3963_v20 = vrot.slane %v3962_v11, 4  ;;  %v3989_v35 = vrot.slane %v3988_v52, 4  ;;  %v2761_v28 = vadd.f32 %v2760_v5, %v6841_v61  ;;  %v2762_v47 = vpop.f32.mrb[209].mxu0  ;;  %v3115_v53 = vpop.f32.mrb[209].mxu1  ;;  %v3114_v56 = vadd.f32 %v3113_v13, %v6845_v21 }
 0x3ce   : > { %v3976_v34 = vrot.slane %v3975_v9, 4  ;;  %v2764_v57 = vpop.f32.mrb[210].mxu0  ;;  %v3117_v27 = vpop.f32.mrb[210].mxu1  ;;  %v4002_v36 = vrot.slane %v4001_v4, 4  ;;  %v2763_v45 = vadd.f32 %v2762_v47, %v6849_v19  ;;  %v3116_v49 = vadd.f32 %v3115_v53, %v6853_v24 }
 0x3cf   : > { %v2766_v46 = vpop.f32.mrb[211].mxu0  ;;  %v3119_v23 = vpop.f32.mrb[211].mxu1  ;;  %v3964_v14 = vmax.f32 %v3962_v11, %v3963_v20  ;;  %v3990_v50 = vmax.f32 %v3988_v52, %v3989_v35  ;;  %v3460_v22 = vmax.f32 %v2761_v28, 0.0  ;;  %v2765_v16 = vadd.f32 %v2764_v57, %v6841_v61 }
 0x3d0   : > { %v3118_v37 = vadd.f32 %v3117_v27, %v6845_v21  ;;  %v3977_v2 = vmax.f32 %v3975_v9, %v3976_v34  ;;  %v3462_v48 = vmax.f32 %v3114_v56, 0.0  ;;  %v2767_v38 = vadd.f32 %v2766_v46, %v6849_v19 }
 0x3d1   : > { %3029 = vmatmul.mubr.bf16.gmra.mrb[60].mxu0 %v7390_v62  ;;  %v3120_v30 = vadd.f32 %v3119_v23, %v6853_v24  ;;  %v6945_v60 = vmax.f32 %v4001_v4, %v4002_v36  ;;  %v3461_v41 = vmax.f32 %v2763_v45, 0.0  ;;  %v3468_v40 = vmax.f32 %v2765_v16, 0.0 }
 0x3d2   : > { %3382 = vmatmul.mubr.bf16.gmra.mrb[60].mxu1 %v7390_v62  ;;  %v3470_v26 = vmax.f32 %v3118_v37, 0.0  ;;  %v3965_v43 = vrot.slane %v3964_v14, 2  ;;  %v3463_v39 = vmax.f32 %v3116_v49, 0.0  ;;  %v3469_v42 = vmax.f32 %v2767_v38, 0.0 }
 0x3d3   : > { %v3471_v63 = vmax.f32 %v3120_v30, 0.0  ;;  %v4060_v15 = vmax.f32 %v3460_v22, %v3468_v40  ;;  %v3991_v18 = vrot.slane %v3990_v50, 2  ;;  %v3978_v25 = vrot.slane %v3977_v2, 2 }
 0x3d4   : > { %v2770_v17 = vpop.f32.mrb[212].mxu0  ;;  %v4086_v32 = vmax.f32 %v3462_v48, %v3470_v26  ;;  %v4073_v3 = vmax.f32 %v3461_v41, %v3469_v42  ;;  %v6949_v1 = vmax.f32 %v3964_v14, %v3965_v43  ;;  %v4004_v7 = vrot.slane %v6945_v60, 2 }
 0x3d5   : > { %v3123_v51 = vpop.f32.mrb[212].mxu1  ;;  %v2772_v58 = vpop.f32.mrb[213].mxu0  ;;  %v4099_v8 = vmax.f32 %v3463_v39, %v3471_v63  ;;  %v2771_v29 = vadd.f32 %v2770_v17, %v6841_v61  ;;  %v6958_v36 = vmax.f32 %v3990_v50, %v3991_v18  ;;  %v3979_v30 = vmax.f32 %v3977_v2, %v3978_v25 }
 0x3d6   : > { %v3125_v6 = vpop.f32.mrb[213].mxu1  ;;  %v2774_v59 = vpop.f32.mrb[214].mxu0  ;;  %v3124_v31 = vadd.f32 %v3123_v51, %v6845_v21  ;;  %v2773_v10 = vadd.f32 %v2772_v58, %v6849_v19  ;;  %v4005_v18 = vmax.f32 %v6945_v60, %v4004_v7 }
 0x3d7   : > { %v3127_v33 = vpop.f32.mrb[214].mxu1  ;;  %v2776_v44 = vpop.f32.mrb[215].mxu0  ;;  %v3126_v55 = vadd.f32 %v3125_v6, %v6853_v24  ;;  %v3476_v12 = vmax.f32 %v2771_v29, 0.0  ;;  %v2775_v11 = vadd.f32 %v2774_v59, %v6841_v61 }
 0x3d8   : > { %v3129_v0 = vpop.f32.mrb[215].mxu1  ;;  %v3478_v54 = vmax.f32 %v3124_v31, 0.0  ;;  %v3128_v52 = vadd.f32 %v3127_v33, %v6845_v21  ;;  %v3477_v9 = vmax.f32 %v2773_v10, 0.0  ;;  %v2777_v5 = vadd.f32 %v2776_v44, %v6849_v19 }
 0x3d9   : > { %v3479_v4 = vmax.f32 %v3126_v55, 0.0  ;;  %v3130_v13 = vadd.f32 %v3129_v0, %v6853_v24  ;;  %v4061_v20 = vmax.f32 %v4060_v15, %v3476_v12  ;;  %v3484_v28 = vmax.f32 %v2775_v11, 0.0 }
 0x3da   : > { %v4087_v35 = vmax.f32 %v4086_v32, %v3478_v54  ;;  %v3486_v47 = vmax.f32 %v3128_v52, 0.0  ;;  %v4074_v53 = vmax.f32 %v4073_v3, %v3477_v9  ;;  %v3485_v56 = vmax.f32 %v2777_v5, 0.0 }
 0x3db   : > { %v4100_v34 = vmax.f32 %v4099_v8, %v3479_v4  ;;  %v3487_v57 = vmax.f32 %v3130_v13, 0.0  ;;  %v4062_v45 = vmax.f32 %v4061_v20, %v3484_v28  ;;  %v3967_v55 = vrot.slane %v6949_v1, 1 }
 0x3dc   : > { %v2780_v27 = vpop.f32.mrb[216].mxu0  ;;  %v4088_v46 = vmax.f32 %v4087_v35, %v3486_v47  ;;  %v4075_v22 = vmax.f32 %v4074_v53, %v3485_v56  ;;  %v3993_v52 = vrot.slane %v6958_v36, 1  ;;  %v3980_v9 = vrot.slane %v3979_v30, 1 }
 0x3dd   : > { %v2781_v23 = vadd.f32 %v2780_v27, %v6841_v61  ;;  %v3133_v14 = vpop.f32.mrb[216].mxu1  ;;  %v2782_v49 = vpop.f32.mrb[217].mxu0  ;;  %v4101_v16 = vmax.f32 %v4100_v34, %v3487_v57  ;;  %v4006_v13 = vrot.slane %v4005_v18, 1 }
 0x3de   : > { %v3134_v37 = vadd.f32 %v3133_v14, %v6845_v21  ;;  %v2783_v62 = vadd.f32 %v2782_v49, %v6849_v19  ;;  %v3135_v48 = vpop.f32.mrb[217].mxu1  ;;  %v2784_v38 = vpop.f32.mrb[218].mxu0 }
 0x3df   : > { %v3492_v41 = vmax.f32 %v2781_v23, 0.0  ;;  %v3136_v40 = vadd.f32 %v3135_v48, %v6853_v24  ;;  %v2785_v50 = vadd.f32 %v2784_v38, %v6841_v61  ;;  %v3137_v26 = vpop.f32.mrb[218].mxu1  ;;  %v2786_v43 = vpop.f32.mrb[219].mxu0  ;;  %v6980_v48 = vmax.f32 %v6949_v1, %v3967_v55 }
 0x3e0   : > { %v3494_v39 = vmax.f32 %v3134_v37, 0.0  ;;  %v3493_v42 = vmax.f32 %v2783_v62, 0.0  ;;  %v3138_v63 = vadd.f32 %v3137_v26, %v6845_v21  ;;  %v2787_v17 = vadd.f32 %v2786_v43, %v6849_v19  ;;  %v3139_v15 = vpop.f32.mrb[219].mxu1 }
 0x3e1   : > { %v4063_v32 = vmax.f32 %v4062_v45, %v3492_v41  ;;  %v3495_v51 = vmax.f32 %v3136_v40, 0.0  ;;  %v3500_v58 = vmax.f32 %v2785_v50, 0.0  ;;  %v3140_v3 = vadd.f32 %v3139_v15, %v6853_v24 }
 0x3e2   : > { %v4089_v2 = vmax.f32 %v4088_v46, %v3494_v39  ;;  %v4076_v8 = vmax.f32 %v4075_v22, %v3493_v42  ;;  %v3502_v6 = vmax.f32 %v3138_v63, 0.0  ;;  %v3501_v59 = vmax.f32 %v2787_v17, 0.0 }
 0x3e3   : > { %v4102_v25 = vmax.f32 %v4101_v16, %v3495_v51  ;;  %v4064_v29 = vmax.f32 %v4063_v32, %v3500_v58  ;;  %v3503_v31 = vmax.f32 %v3140_v3, 0.0  ;;  %v6983_v50 = vmax.f32 %v6958_v36, %v3993_v52 }
 0x3e4   : > { %v4090_v33 = vmax.f32 %v4089_v2, %v3502_v6  ;;  %v4077_v44 = vmax.f32 %v4076_v8, %v3501_v59  ;;  %v2790_v10 = vpop.f32.mrb[220].mxu0  ;;  %v6985_v26 = vmax.f32 %v3979_v30, %v3980_v9  ;;  %v6987_v63 = vmax.f32 %v4005_v18, %v4006_v13 }
 0x3e5   : > { %v4103_v0 = vmax.f32 %v4102_v25, %v3503_v31  ;;  %v2791_v12 = vadd.f32 %v2790_v10, %v6841_v61  ;;  %v3143_v54 = vpop.f32.mrb[220].mxu1  ;;  %v2792_v11 = vpop.f32.mrb[221].mxu0 }
 0x3e6   : > { %v3144_v4 = vadd.f32 %v3143_v54, %v6845_v21  ;;  %v2793_v60 = vadd.f32 %v2792_v11, %v6849_v19  ;;  %v3145_v7 = vpop.f32.mrb[221].mxu1  ;;  %v2794_v5 = vpop.f32.mrb[222].mxu0 }
 0x3e7   : > { %v3508_v20 = vmax.f32 %v2791_v12, 0.0  ;;  %v3146_v35 = vadd.f32 %v3145_v7, %v6853_v24  ;;  %v2795_v28 = vadd.f32 %v2794_v5, %v6841_v61  ;;  %v3147_v47 = vpop.f32.mrb[222].mxu1  ;;  %v2796_v53 = vpop.f32.mrb[223].mxu0 }
 0x3e8   : > { %v3510_v34 = vmax.f32 %v3144_v4, 0.0  ;;  %v3509_v56 = vmax.f32 %v2793_v60, 0.0  ;;  %v3148_v57 = vadd.f32 %v3147_v47, %v6845_v21  ;;  %v2797_v27 = vadd.f32 %v2796_v53, %v6849_v19  ;;  %v3149_v45 = vpop.f32.mrb[223].mxu1 }
 0x3e9   : > { %v4065_v46 = vmax.f32 %v4064_v29, %v3508_v20  ;;  %v3511_v23 = vmax.f32 %v3146_v35, 0.0  ;;  %v3516_v14 = vmax.f32 %v2795_v28, 0.0  ;;  %v3150_v49 = vadd.f32 %v3149_v45, %v6853_v24 }
 0x3ea   : > { %v4091_v22 = vmax.f32 %v4090_v33, %v3510_v34  ;;  %v4078_v16 = vmax.f32 %v4077_v44, %v3509_v56  ;;  %v3518_v37 = vmax.f32 %v3148_v57, 0.0  ;;  %v3517_v62 = vmax.f32 %v2797_v27, 0.0 }
 0x3eb   : > { %v4104_v38 = vmax.f32 %v4103_v0, %v3511_v23  ;;  %v4066_v41 = vmax.f32 %v4065_v46, %v3516_v14  ;;  %v3519_v40 = vmax.f32 %v3150_v49, 0.0 }
 0x3ec   : > { %v4092_v43 = vmax.f32 %v4091_v22, %v3518_v37  ;;  %v4079_v39 = vmax.f32 %v4078_v16, %v3517_v62  ;;  %v2800_v42 = vpop.f32.mrb[224].mxu0 }
 0x3ed   : > { %v4067_v17 = vrot.slane %v4066_v41, 4  ;;  %v4105_v15 = vmax.f32 %v4104_v38, %v3519_v40  ;;  %v2801_v32 = vadd.f32 %v2800_v42, %v6841_v61  ;;  %v3153_v51 = vpop.f32.mrb[224].mxu1  ;;  %v2802_v1 = vpop.f32.mrb[225].mxu0 }
 0x3ee   : > { %v4093_v58 = vrot.slane %v4092_v43, 4  ;;  %v4080_v3 = vrot.slane %v4079_v39, 4  ;;  %v3154_v2 = vadd.f32 %v3153_v51, %v6845_v21  ;;  %v2803_v36 = vadd.f32 %v2802_v1, %v6849_v19  ;;  %v3155_v8 = vpop.f32.mrb[225].mxu1  ;;  %v2804_v30 = vpop.f32.mrb[226].mxu0 }
 0x3ef   : > { %v4068_v6 = vmax.f32 %v4066_v41, %v4067_v17  ;;  %v4106_v59 = vrot.slane %v4105_v15, 4  ;;  %v3524_v25 = vmax.f32 %v2801_v32, 0.0  ;;  %v3156_v18 = vadd.f32 %v3155_v8, %v6853_v24  ;;  %v3157_v29 = vpop.f32.mrb[226].mxu1  ;;  %v2806_v31 = vpop.f32.mrb[227].mxu0 }
 0x3f0   : > { %v4094_v33 = vmax.f32 %v4092_v43, %v4093_v58  ;;  %v4081_v44 = vmax.f32 %v4079_v39, %v4080_v3  ;;  %v3526_v10 = vmax.f32 %v3154_v2, 0.0  ;;  %v3525_v55 = vmax.f32 %v2803_v36, 0.0  ;;  %v3159_v0 = vpop.f32.mrb[227].mxu1 }
 0x3f1   : > { %v4069_v12 = vrot.slane %v4068_v6, 2  ;;  %v4107_v54 = vmax.f32 %v4105_v15, %v4106_v59  ;;  %v3527_v11 = vmax.f32 %v3156_v18, 0.0  ;;  %v2805_v52 = vadd.f32 %v2804_v30, %v6841_v61 }
 0x3f2   : > { %v4095_v9 = vrot.slane %v4094_v33, 2  ;;  %v4082_v4 = vrot.slane %v4081_v44, 2  ;;  %v3158_v60 = vadd.f32 %v3157_v29, %v6845_v21  ;;  %v2807_v7 = vadd.f32 %v2806_v31, %v6849_v19 }
 0x3f3   : > { %v4070_v5 = vmax.f32 %v4068_v6, %v4069_v12  ;;  %v4108_v13 = vrot.slane %v4107_v54, 2  ;;  %v3532_v20 = vmax.f32 %v2805_v52, 0.0  ;;  %v3160_v35 = vadd.f32 %v3159_v0, %v6853_v24 }
 0x3f4   : > { %v4096_v28 = vmax.f32 %v4094_v33, %v4095_v9  ;;  %v4083_v47 = vmax.f32 %v4081_v44, %v4082_v4  ;;  %v3534_v53 = vmax.f32 %v3158_v60, 0.0  ;;  %v3533_v34 = vmax.f32 %v2807_v7, 0.0  ;;  %v2810_v56 = vpop.f32.mrb[228].mxu0 }
 0x3f5   : > { %v4071_v57 = vrot.slane %v4070_v5, 1  ;;  %v4109_v27 = vmax.f32 %v4107_v54, %v4108_v13  ;;  %v4164_v45 = vmax.f32 %v3524_v25, %v3532_v20  ;;  %v3535_v46 = vmax.f32 %v3160_v35, 0.0  ;;  %v3163_v23 = vpop.f32.mrb[228].mxu1  ;;  %v2812_v14 = vpop.f32.mrb[229].mxu0 }
 0x3f6   : > { %v4097_v49 = vrot.slane %v4096_v28, 1  ;;  %v4084_v22 = vrot.slane %v4083_v47, 1  ;;  %v4190_v16 = vmax.f32 %v3526_v10, %v3534_v53  ;;  %v4177_v37 = vmax.f32 %v3525_v55, %v3533_v34  ;;  %v3165_v62 = vpop.f32.mrb[229].mxu1  ;;  %v2814_v38 = vpop.f32.mrb[230].mxu0 }
 0x3f7   : > { %v4072_v41 = vmax.f32 %v4070_v5, %v4071_v57  ;;  %v4110_v40 = vrot.slane %v4109_v27, 1  ;;  %v4203_v43 = vmax.f32 %v3527_v11, %v3535_v46  ;;  %v2811_v39 = vadd.f32 %v2810_v56, %v6841_v61  ;;  %v3167_v42 = vpop.f32.mrb[230].mxu1  ;;  %v2816_v17 = vpop.f32.mrb[231].mxu0 }
 0x3f8   : > { %v4098_v15 = vmax.f32 %v4096_v28, %v4097_v49  ;;  %v4085_v32 = vmax.f32 %v4083_v47, %v4084_v22  ;;  %v3164_v51 = vadd.f32 %v3163_v23, %v6845_v21  ;;  %v2813_v1 = vadd.f32 %v2812_v14, %v6849_v19  ;;  %v3169_v58 = vpop.f32.mrb[231].mxu1 }
 0x3f9   : > { %v7002_v3 = vsel %vm4800_vm3, %v4072_v41, %v6980_v48  ;;  %v4111_v2 = vmax.f32 %v4109_v27, %v4110_v40  ;;  %v3540_v36 = vmax.f32 %v2811_v39, 0.0  ;;  %v3166_v8 = vadd.f32 %v3165_v62, %v6853_v24 }
 0x3fa   : > { %v7007_v30 = vsel %vm4800_vm3, %v4098_v15, %v6983_v50  ;;  %v7011_v6 = vsel %vm4800_vm3, %v4085_v32, %v6985_v26  ;;  %v3542_v59 = vmax.f32 %v3164_v51, 0.0  ;;  %v3541_v25 = vmax.f32 %v2813_v1, 0.0 }
 0x3fb   : > { %v7015_v18 = vsel %vm4800_vm3, %v4111_v2, %v6987_v63  ;;  %v4165_v48 = vmax.f32 %v4164_v45, %v3540_v36  ;;  %v3543_v29 = vmax.f32 %v3166_v8, 0.0  ;;  %v2815_v31 = vadd.f32 %v2814_v38, %v6841_v61 }
 0x3fc   : > { %v4191_v33 = vmax.f32 %v4190_v16, %v3542_v59  ;;  %v4178_v44 = vmax.f32 %v4177_v37, %v3541_v25  ;;  %v3168_v10 = vadd.f32 %v3167_v42, %v6845_v21  ;;  %v2817_v50 = vadd.f32 %v2816_v17, %v6849_v19  ;;  %v2820_v55 = vpop.f32.mrb[232].mxu0 }
 0x3fd   : > { %v4204_v0 = vmax.f32 %v4203_v43, %v3543_v29  ;;  %v3548_v26 = vmax.f32 %v2815_v31, 0.0  ;;  %v3170_v12 = vadd.f32 %v3169_v58, %v6853_v24  ;;  %v2821_v54 = vadd.f32 %v2820_v55, %v6841_v61  ;;  %v3173_v11 = vpop.f32.mrb[232].mxu1  ;;  %v2822_v63 = vpop.f32.mrb[233].mxu0 }
 0x3fe   : > { %v3550_v52 = vmax.f32 %v3168_v10, 0.0  ;;  %v3549_v9 = vmax.f32 %v2817_v50, 0.0  ;;  %v3174_v4 = vadd.f32 %v3173_v11, %v6845_v21  ;;  %v2823_v60 = vadd.f32 %v2822_v63, %v6849_v19  ;;  %v3175_v7 = vpop.f32.mrb[233].mxu1  ;;  %v2824_v5 = vpop.f32.mrb[234].mxu0 }
 0x3ff   : > { %v4166_v13 = vmax.f32 %v4165_v48, %v3548_v26  ;;  %v3551_v20 = vmax.f32 %v3170_v12, 0.0  ;;  %v3556_v35 = vmax.f32 %v2821_v54, 0.0  ;;  %v3176_v28 = vadd.f32 %v3175_v7, %v6853_v24  ;;  %v3177_v47 = vpop.f32.mrb[234].mxu1  ;;  %v2826_v53 = vpop.f32.mrb[235].mxu0 }
 0x400   : > { %v4192_v34 = vmax.f32 %v4191_v33, %v3550_v52  ;;  %v4179_v56 = vmax.f32 %v4178_v44, %v3549_v9  ;;  %v3558_v57 = vmax.f32 %v3174_v4, 0.0  ;;  %v3557_v27 = vmax.f32 %v2823_v60, 0.0  ;;  %v3179_v45 = vpop.f32.mrb[235].mxu1 }
 0x401   : > { %v4205_v46 = vmax.f32 %v4204_v0, %v3551_v20  ;;  %v4167_v23 = vmax.f32 %v4166_v13, %v3556_v35  ;;  %v3559_v14 = vmax.f32 %v3176_v28, 0.0  ;;  %v2825_v49 = vadd.f32 %v2824_v5, %v6841_v61 }
 0x402   : > { %v4193_v22 = vmax.f32 %v4192_v34, %v3558_v57  ;;  %v4180_v16 = vmax.f32 %v4179_v56, %v3557_v27  ;;  %v3178_v37 = vadd.f32 %v3177_v47, %v6845_v21  ;;  %v2827_v62 = vadd.f32 %v2826_v53, %v6849_v19 }
 0x403   : > { %v4206_v38 = vmax.f32 %v4205_v46, %v3559_v14  ;;  %v3564_v41 = vmax.f32 %v2825_v49, 0.0  ;;  %v3180_v40 = vadd.f32 %v3179_v45, %v6853_v24 }
 0x404   : > { %v3566_v43 = vmax.f32 %v3178_v37, 0.0  ;;  %v3565_v39 = vmax.f32 %v2827_v62, 0.0  ;;  %v2830_v42 = vpop.f32.mrb[236].mxu0 }
 0x405   : > { %v4168_v17 = vmax.f32 %v4167_v23, %v3564_v41  ;;  %v3567_v15 = vmax.f32 %v3180_v40, 0.0  ;;  %v2831_v32 = vadd.f32 %v2830_v42, %v6841_v61  ;;  %v3183_v51 = vpop.f32.mrb[236].mxu1  ;;  %v2832_v1 = vpop.f32.mrb[237].mxu0 }
 0x406   : > { %v4194_v58 = vmax.f32 %v4193_v22, %v3566_v43  ;;  %v4181_v2 = vmax.f32 %v4180_v16, %v3565_v39  ;;  %v3184_v36 = vadd.f32 %v3183_v51, %v6845_v21  ;;  %v2833_v8 = vadd.f32 %v2832_v1, %v6849_v19  ;;  %v3185_v59 = vpop.f32.mrb[237].mxu1  ;;  %v2834_v25 = vpop.f32.mrb[238].mxu0 }
 0x407   : > { %v4207_v48 = vmax.f32 %v4206_v38, %v3567_v15  ;;  %v3572_v29 = vmax.f32 %v2831_v32, 0.0  ;;  %v3186_v31 = vadd.f32 %v3185_v59, %v6853_v24  ;;  %v2835_v33 = vadd.f32 %v2834_v25, %v6841_v61  ;;  %v3187_v44 = vpop.f32.mrb[238].mxu1  ;;  %v2836_v10 = vpop.f32.mrb[239].mxu0 }
 0x408   : > { %v3574_v50 = vmax.f32 %v3184_v36, 0.0  ;;  %v3573_v55 = vmax.f32 %v2833_v8, 0.0  ;;  %v3188_v0 = vadd.f32 %v3187_v44, %v6845_v21  ;;  %v2837_v26 = vadd.f32 %v2836_v10, %v6849_v19  ;;  %v3189_v12 = vpop.f32.mrb[239].mxu1 }
 0x409   : > { %v4169_v54 = vmax.f32 %v4168_v17, %v3572_v29  ;;  %v3575_v11 = vmax.f32 %v3186_v31, 0.0  ;;  %v3580_v63 = vmax.f32 %v2835_v33, 0.0  ;;  %v3190_v52 = vadd.f32 %v3189_v12, %v6853_v24 }
 0x40a   : > { %v4195_v9 = vmax.f32 %v4194_v58, %v3574_v50  ;;  %v4182_v4 = vmax.f32 %v4181_v2, %v3573_v55  ;;  %v3582_v60 = vmax.f32 %v3188_v0, 0.0  ;;  %v3581_v7 = vmax.f32 %v2837_v26, 0.0 }
 0x40b   : > { %v4208_v5 = vmax.f32 %v4207_v48, %v3575_v11  ;;  %v4170_v13 = vmax.f32 %v4169_v54, %v3580_v63  ;;  %v3583_v20 = vmax.f32 %v3190_v52, 0.0 }
 0x40c   : > { %v4196_v35 = vmax.f32 %v4195_v9, %v3582_v60  ;;  %v4183_v28 = vmax.f32 %v4182_v4, %v3581_v7  ;;  %v2840_v47 = vpop.f32.mrb[240].mxu0 }
 0x40d   : > { %v4171_v53 = vrot.slane %v4170_v13, 4  ;;  %v4209_v34 = vmax.f32 %v4208_v5, %v3583_v20  ;;  %v2841_v56 = vadd.f32 %v2840_v47, %v6841_v61  ;;  %v3193_v57 = vpop.f32.mrb[240].mxu1  ;;  %v2842_v27 = vpop.f32.mrb[241].mxu0 }
 0x40e   : > { %v4197_v45 = vrot.slane %v4196_v35, 4  ;;  %v4184_v46 = vrot.slane %v4183_v28, 4  ;;  %v3194_v23 = vadd.f32 %v3193_v57, %v6845_v21  ;;  %v2843_v14 = vadd.f32 %v2842_v27, %v6849_v19  ;;  %v3195_v49 = vpop.f32.mrb[241].mxu1  ;;  %v2844_v22 = vpop.f32.mrb[242].mxu0 }
 0x40f   : > { %v4172_v16 = vmax.f32 %v4170_v13, %v4171_v53  ;;  %v4210_v37 = vrot.slane %v4209_v34, 4  ;;  %v3588_v62 = vmax.f32 %v2841_v56, 0.0  ;;  %v3196_v38 = vadd.f32 %v3195_v49, %v6853_v24  ;;  %v3197_v41 = vpop.f32.mrb[242].mxu1  ;;  %v2846_v40 = vpop.f32.mrb[243].mxu0 }
 0x410   : > { %v4198_v43 = vmax.f32 %v4196_v35, %v4197_v45  ;;  %v4185_v39 = vmax.f32 %v4183_v28, %v4184_v46  ;;  %v3590_v42 = vmax.f32 %v3194_v23, 0.0  ;;  %v3589_v17 = vmax.f32 %v2843_v14, 0.0  ;;  %v3199_v15 = vpop.f32.mrb[243].mxu1 }
 0x411   : > { %v4173_v32 = vrot.slane %v4172_v16, 2  ;;  %v4211_v51 = vmax.f32 %v4209_v34, %v4210_v37  ;;  %v3591_v1 = vmax.f32 %v3196_v38, 0.0  ;;  %v2845_v58 = vadd.f32 %v2844_v22, %v6841_v61 }
 0x412   : > { %v4199_v2 = vrot.slane %v4198_v43, 2  ;;  %v4186_v36 = vrot.slane %v4185_v39, 2  ;;  %v3198_v8 = vadd.f32 %v3197_v41, %v6845_v21  ;;  %v2847_v59 = vadd.f32 %v2846_v40, %v6849_v19 }
 0x413   : > { %v4174_v25 = vmax.f32 %v4172_v16, %v4173_v32  ;;  %v4212_v48 = vrot.slane %v4211_v51, 2  ;;  %v3596_v29 = vmax.f32 %v2845_v58, 0.0  ;;  %v3200_v31 = vadd.f32 %v3199_v15, %v6853_v24 }
 0x414   : > { %v4200_v33 = vmax.f32 %v4198_v43, %v4199_v2  ;;  %v4187_v44 = vmax.f32 %v4185_v39, %v4186_v36  ;;  %v3598_v10 = vmax.f32 %v3198_v8, 0.0  ;;  %v3597_v50 = vmax.f32 %v2847_v59, 0.0  ;;  %v2850_v55 = vpop.f32.mrb[244].mxu0 }
 0x415   : > { %v4175_v0 = vrot.slane %v4174_v25, 1  ;;  %v4213_v26 = vmax.f32 %v4211_v51, %v4212_v48  ;;  %v4268_v12 = vmax.f32 %v3588_v62, %v3596_v29  ;;  %v3599_v54 = vmax.f32 %v3200_v31, 0.0  ;;  %v3203_v11 = vpop.f32.mrb[244].mxu1  ;;  %v2852_v63 = vpop.f32.mrb[245].mxu0 }
 0x416   : > { %v4201_v52 = vrot.slane %v4200_v33, 1  ;;  %v4188_v9 = vrot.slane %v4187_v44, 1  ;;  %v4294_v4 = vmax.f32 %v3590_v42, %v3598_v10  ;;  %v4281_v60 = vmax.f32 %v3589_v17, %v3597_v50  ;;  %v3205_v7 = vpop.f32.mrb[245].mxu1  ;;  %v2854_v5 = vpop.f32.mrb[246].mxu0 }
 0x417   : > { %v4176_v13 = vmax.f32 %v4174_v25, %v4175_v0  ;;  %v4214_v20 = vrot.slane %v4213_v26, 1  ;;  %v4307_v35 = vmax.f32 %v3591_v1, %v3599_v54  ;;  %v2851_v28 = vadd.f32 %v2850_v55, %v6841_v61  ;;  %v3207_v47 = vpop.f32.mrb[246].mxu1  ;;  %v2856_v53 = vpop.f32.mrb[247].mxu0 }
 0x418   : > { %v4202_v34 = vmax.f32 %v4200_v33, %v4201_v52  ;;  %v4189_v56 = vmax.f32 %v4187_v44, %v4188_v9  ;;  %v3204_v57 = vadd.f32 %v3203_v11, %v6845_v21  ;;  %v2853_v27 = vadd.f32 %v2852_v63, %v6849_v19  ;;  %v3209_v45 = vpop.f32.mrb[247].mxu1 }
 0x419   : > { %v7050_v46 = vsel %vm4802_vm4, %v4176_v13, %v7002_v3  ;;  %v4215_v23 = vmax.f32 %v4213_v26, %v4214_v20  ;;  %v3604_v14 = vmax.f32 %v2851_v28, 0.0  ;;  %v3206_v49 = vadd.f32 %v3205_v7, %v6853_v24 }
 0x41a   : > { %v7055_v22 = vsel %vm4802_vm4, %v4202_v34, %v7007_v30  ;;  %v7059_v16 = vsel %vm4802_vm4, %v4189_v56, %v7011_v6  ;;  %v3606_v37 = vmax.f32 %v3204_v57, 0.0  ;;  %v3605_v62 = vmax.f32 %v2853_v27, 0.0 }
 0x41b   : > { %v7063_v38 = vsel %vm4802_vm4, %v4215_v23, %v7015_v18  ;;  %v4269_v3 = vmax.f32 %v4268_v12, %v3604_v14  ;;  %v3607_v41 = vmax.f32 %v3206_v49, 0.0  ;;  %v2855_v40 = vadd.f32 %v2854_v5, %v6841_v61 }
 0x41c   : > { %v4295_v43 = vmax.f32 %v4294_v4, %v3606_v37  ;;  %v4282_v39 = vmax.f32 %v4281_v60, %v3605_v62  ;;  %v3208_v42 = vadd.f32 %v3207_v47, %v6845_v21  ;;  %v2857_v30 = vadd.f32 %v2856_v53, %v6849_v19  ;;  %v2860_v17 = vpop.f32.mrb[248].mxu0 }
 0x41d   : > { %v4308_v15 = vmax.f32 %v4307_v35, %v3607_v41  ;;  %v3612_v6 = vmax.f32 %v2855_v40, 0.0  ;;  %v3210_v32 = vadd.f32 %v3209_v45, %v6853_v24  ;;  %v2861_v51 = vadd.f32 %v2860_v17, %v6841_v61  ;;  %v3213_v1 = vpop.f32.mrb[248].mxu1  ;;  %v2862_v18 = vpop.f32.mrb[249].mxu0 }
 0x41e   : > { %v3614_v58 = vmax.f32 %v3208_v42, 0.0  ;;  %v3613_v2 = vmax.f32 %v2857_v30, 0.0  ;;  %v3214_v36 = vadd.f32 %v3213_v1, %v6845_v21  ;;  %v2863_v8 = vadd.f32 %v2862_v18, %v6849_v19  ;;  %v3215_v59 = vpop.f32.mrb[249].mxu1  ;;  %v2864_v25 = vpop.f32.mrb[250].mxu0 }
 0x41f   : > { %v4270_v48 = vmax.f32 %v4269_v3, %v3612_v6  ;;  %v3615_v29 = vmax.f32 %v3210_v32, 0.0  ;;  %v3620_v31 = vmax.f32 %v2861_v51, 0.0  ;;  %v3216_v33 = vadd.f32 %v3215_v59, %v6853_v24  ;;  %v3217_v44 = vpop.f32.mrb[250].mxu1  ;;  %v2866_v10 = vpop.f32.mrb[251].mxu0 }
 0x420   : > { %v4296_v50 = vmax.f32 %v4295_v43, %v3614_v58  ;;  %v4283_v55 = vmax.f32 %v4282_v39, %v3613_v2  ;;  %v3622_v0 = vmax.f32 %v3214_v36, 0.0  ;;  %v3621_v26 = vmax.f32 %v2863_v8, 0.0  ;;  %v3219_v12 = vpop.f32.mrb[251].mxu1 }
 0x421   : > { %v4309_v54 = vmax.f32 %v4308_v15, %v3615_v29  ;;  %v4271_v11 = vmax.f32 %v4270_v48, %v3620_v31  ;;  %v3623_v63 = vmax.f32 %v3216_v33, 0.0  ;;  %v2865_v52 = vadd.f32 %v2864_v25, %v6841_v61 }
 0x422   : > { %v4297_v9 = vmax.f32 %v4296_v50, %v3622_v0  ;;  %v4284_v4 = vmax.f32 %v4283_v55, %v3621_v26  ;;  %v3218_v60 = vadd.f32 %v3217_v44, %v6845_v21  ;;  %v2867_v7 = vadd.f32 %v2866_v10, %v6849_v19 }
 0x423   : > { %v4310_v5 = vmax.f32 %v4309_v54, %v3623_v63  ;;  %v3628_v13 = vmax.f32 %v2865_v52, 0.0  ;;  %v3220_v20 = vadd.f32 %v3219_v12, %v6853_v24 }
 0x424   : > { %v3630_v35 = vmax.f32 %v3218_v60, 0.0  ;;  %v3629_v28 = vmax.f32 %v2867_v7, 0.0  ;;  %v2870_v47 = vpop.f32.mrb[252].mxu0 }
 0x425   : > { %v4272_v53 = vmax.f32 %v4271_v11, %v3628_v13  ;;  %v3631_v34 = vmax.f32 %v3220_v20, 0.0  ;;  %v2871_v56 = vadd.f32 %v2870_v47, %v6841_v61  ;;  %v3223_v57 = vpop.f32.mrb[252].mxu1  ;;  %v2872_v27 = vpop.f32.mrb[253].mxu0 }
 0x426   : > { %v4298_v45 = vmax.f32 %v4297_v9, %v3630_v35  ;;  %v4285_v23 = vmax.f32 %v4284_v4, %v3629_v28  ;;  %v3224_v14 = vadd.f32 %v3223_v57, %v6845_v21  ;;  %v2873_v49 = vadd.f32 %v2872_v27, %v6849_v19  ;;  %v3225_v37 = vpop.f32.mrb[253].mxu1  ;;  %v2874_v62 = vpop.f32.mrb[254].mxu0 }
 0x427   : > { %v4311_v3 = vmax.f32 %v4310_v5, %v3631_v34  ;;  %v3636_v41 = vmax.f32 %v2871_v56, 0.0  ;;  %v3226_v40 = vadd.f32 %v3225_v37, %v6853_v24  ;;  %v2875_v43 = vadd.f32 %v2874_v62, %v6841_v61  ;;  %v3227_v39 = vpop.f32.mrb[254].mxu1  ;;  %v2876_v42 = vpop.f32.mrb[255].mxu0 }
 0x428   : > { %v3638_v30 = vmax.f32 %v3224_v14, 0.0  ;;  %v3637_v17 = vmax.f32 %v2873_v49, 0.0  ;;  %v3228_v15 = vadd.f32 %v3227_v39, %v6845_v21  ;;  %v2877_v6 = vadd.f32 %v2876_v42, %v6849_v19  ;;  %v3229_v32 = vpop.f32.mrb[255].mxu1 }
 0x429   : > { %v4273_v51 = vmax.f32 %v4272_v53, %v3636_v41  ;;  %v3639_v1 = vmax.f32 %v3226_v40, 0.0  ;;  %v3644_v18 = vmax.f32 %v2875_v43, 0.0  ;;  %v3230_v58 = vadd.f32 %v3229_v32, %v6853_v24 }
 0x42a   : > { %v4299_v2 = vmax.f32 %v4298_v45, %v3638_v30  ;;  %v4286_v36 = vmax.f32 %v4285_v23, %v3637_v17  ;;  %v3646_v8 = vmax.f32 %v3228_v15, 0.0  ;;  %v3645_v59 = vmax.f32 %v2877_v6, 0.0 }
 0x42b   : > { %v4312_v25 = vmax.f32 %v4311_v3, %v3639_v1  ;;  %v4274_v48 = vmax.f32 %v4273_v51, %v3644_v18  ;;  %v3647_v29 = vmax.f32 %v3230_v58, 0.0 }
 0x42c   : > { %v4300_v31 = vmax.f32 %v4299_v2, %v3646_v8  ;;  %v4287_v33 = vmax.f32 %v4286_v36, %v3645_v59  ;;  %v2880_v44 = vpop.f32.mrb[0].mxu0 }
 0x42d   : > { %v4275_v10 = vrot.slane %v4274_v48, 4  ;;  %v4313_v50 = vmax.f32 %v4312_v25, %v3647_v29  ;;  %v2881_v55 = vadd.f32 %v2880_v44, %v6841_v61  ;;  %v3233_v0 = vpop.f32.mrb[0].mxu1  ;;  %v2882_v26 = vpop.f32.mrb[1].mxu0 }
 0x42e   : > { %v4301_v12 = vrot.slane %v4300_v31, 4  ;;  %v4288_v54 = vrot.slane %v4287_v33, 4  ;;  %v3234_v11 = vadd.f32 %v3233_v0, %v6845_v21  ;;  %v2883_v63 = vadd.f32 %v2882_v26, %v6849_v19  ;;  %v3235_v52 = vpop.f32.mrb[1].mxu1  ;;  %v2884_v9 = vpop.f32.mrb[2].mxu0 }
 0x42f   : > { %v4276_v4 = vmax.f32 %v4274_v48, %v4275_v10  ;;  %v4314_v60 = vrot.slane %v4313_v50, 4  ;;  %v3652_v7 = vmax.f32 %v2881_v55, 0.0  ;;  %v3236_v5 = vadd.f32 %v3235_v52, %v6853_v24  ;;  %v3237_v13 = vpop.f32.mrb[2].mxu1  ;;  %v2886_v20 = vpop.f32.mrb[3].mxu0 }
 0x430   : > { %v4302_v35 = vmax.f32 %v4300_v31, %v4301_v12  ;;  %v4289_v28 = vmax.f32 %v4287_v33, %v4288_v54  ;;  %v3654_v47 = vmax.f32 %v3234_v11, 0.0  ;;  %v3653_v53 = vmax.f32 %v2883_v63, 0.0  ;;  %v3239_v34 = vpop.f32.mrb[3].mxu1 }
 0x431   : > { %v4277_v56 = vrot.slane %v4276_v4, 2  ;;  %v4315_v57 = vmax.f32 %v4313_v50, %v4314_v60  ;;  %v3655_v27 = vmax.f32 %v3236_v5, 0.0  ;;  %v2885_v45 = vadd.f32 %v2884_v9, %v6841_v61 }
 0x432   : > { %v4303_v23 = vrot.slane %v4302_v35, 2  ;;  %v4290_v14 = vrot.slane %v4289_v28, 2  ;;  %v3238_v49 = vadd.f32 %v3237_v13, %v6845_v21  ;;  %v2887_v37 = vadd.f32 %v2886_v20, %v6849_v19 }
 0x433   : > { %v4278_v62 = vmax.f32 %v4276_v4, %v4277_v56  ;;  %v4316_v3 = vrot.slane %v4315_v57, 2  ;;  %v3660_v41 = vmax.f32 %v2885_v45, 0.0  ;;  %v3240_v40 = vadd.f32 %v3239_v34, %v6853_v24 }
 0x434   : > { %v4304_v43 = vmax.f32 %v4302_v35, %v4303_v23  ;;  %v4291_v39 = vmax.f32 %v4289_v28, %v4290_v14  ;;  %v3662_v42 = vmax.f32 %v3238_v49, 0.0  ;;  %v3661_v30 = vmax.f32 %v2887_v37, 0.0  ;;  %v2890_v17 = vpop.f32.mrb[4].mxu0 }
 0x435   : > { %v4279_v15 = vrot.slane %v4278_v62, 1  ;;  %v4317_v6 = vmax.f32 %v4315_v57, %v4316_v3  ;;  %v4372_v32 = vmax.f32 %v3652_v7, %v3660_v41  ;;  %v3663_v51 = vmax.f32 %v3240_v40, 0.0  ;;  %v3243_v1 = vpop.f32.mrb[4].mxu1  ;;  %v2892_v18 = vpop.f32.mrb[5].mxu0 }
 0x436   : > { %v4305_v58 = vrot.slane %v4304_v43, 1  ;;  %v4292_v2 = vrot.slane %v4291_v39, 1  ;;  %v4398_v36 = vmax.f32 %v3654_v47, %v3662_v42  ;;  %v4385_v8 = vmax.f32 %v3653_v53, %v3661_v30  ;;  %v3245_v59 = vpop.f32.mrb[5].mxu1  ;;  %v2894_v25 = vpop.f32.mrb[6].mxu0 }
 0x437   : > { %v4280_v48 = vmax.f32 %v4278_v62, %v4279_v15  ;;  %v4318_v29 = vrot.slane %v4317_v6, 1  ;;  %v4411_v31 = vmax.f32 %v3655_v27, %v3663_v51  ;;  %v2891_v33 = vadd.f32 %v2890_v17, %v6841_v61  ;;  %v3247_v44 = vpop.f32.mrb[6].mxu1  ;;  %v2896_v10 = vpop.f32.mrb[7].mxu0 }
 0x438   : > { %v4306_v50 = vmax.f32 %v4304_v43, %v4305_v58  ;;  %v4293_v55 = vmax.f32 %v4291_v39, %v4292_v2  ;;  %v3244_v0 = vadd.f32 %v3243_v1, %v6845_v21  ;;  %v2893_v26 = vadd.f32 %v2892_v18, %v6849_v19  ;;  %v3249_v12 = vpop.f32.mrb[7].mxu1 }
 0x439   : > { %v7098_v54 = vsel %vm4804_vm5, %v4280_v48, %v7050_v46  ;;  %v4319_v11 = vmax.f32 %v4317_v6, %v4318_v29  ;;  %v3668_v63 = vmax.f32 %v2891_v33, 0.0  ;;  %v3246_v52 = vadd.f32 %v3245_v59, %v6853_v24 }
 0x43a   : > { %v7103_v9 = vsel %vm4804_vm5, %v4306_v50, %v7055_v22  ;;  %v7107_v4 = vsel %vm4804_vm5, %v4293_v55, %v7059_v16  ;;  %v3670_v60 = vmax.f32 %v3244_v0, 0.0  ;;  %v3669_v7 = vmax.f32 %v2893_v26, 0.0 }
 0x43b   : > { %v7111_v5 = vsel %vm4804_vm5, %v4319_v11, %v7063_v38  ;;  %v4373_v46 = vmax.f32 %v4372_v32, %v3668_v63  ;;  %v3671_v13 = vmax.f32 %v3246_v52, 0.0  ;;  %v2895_v20 = vadd.f32 %v2894_v25, %v6841_v61 }
 0x43c   : > { %v4399_v35 = vmax.f32 %v4398_v36, %v3670_v60  ;;  %v4386_v28 = vmax.f32 %v4385_v8, %v3669_v7  ;;  %v3248_v47 = vadd.f32 %v3247_v44, %v6845_v21  ;;  %v2897_v22 = vadd.f32 %v2896_v10, %v6849_v19  ;;  %v2900_v53 = vpop.f32.mrb[8].mxu0 }
 0x43d   : > { %v4412_v34 = vmax.f32 %v4411_v31, %v3671_v13  ;;  %v3676_v16 = vmax.f32 %v2895_v20, 0.0  ;;  %v3250_v56 = vadd.f32 %v3249_v12, %v6853_v24  ;;  %v2901_v57 = vadd.f32 %v2900_v53, %v6841_v61  ;;  %v3253_v27 = vpop.f32.mrb[8].mxu1  ;;  %v2902_v38 = vpop.f32.mrb[9].mxu0 }
 0x43e   : > { %v3678_v45 = vmax.f32 %v3248_v47, 0.0  ;;  %v3677_v23 = vmax.f32 %v2897_v22, 0.0  ;;  %v3254_v14 = vadd.f32 %v3253_v27, %v6845_v21  ;;  %v2903_v49 = vadd.f32 %v2902_v38, %v6849_v19  ;;  %v3255_v37 = vpop.f32.mrb[9].mxu1  ;;  %v2904_v62 = vpop.f32.mrb[10].mxu0 }
 0x43f   : > { %v4374_v3 = vmax.f32 %v4373_v46, %v3676_v16  ;;  %v3679_v41 = vmax.f32 %v3250_v56, 0.0  ;;  %v3684_v40 = vmax.f32 %v2901_v57, 0.0  ;;  %v3256_v43 = vadd.f32 %v3255_v37, %v6853_v24  ;;  %v3257_v39 = vpop.f32.mrb[10].mxu1  ;;  %v2906_v42 = vpop.f32.mrb[11].mxu0 }
 0x440   : > { %v4400_v30 = vmax.f32 %v4399_v35, %v3678_v45  ;;  %v4387_v17 = vmax.f32 %v4386_v28, %v3677_v23  ;;  %v3686_v15 = vmax.f32 %v3254_v14, 0.0  ;;  %v3685_v6 = vmax.f32 %v2903_v49, 0.0  ;;  %v3259_v32 = vpop.f32.mrb[11].mxu1 }
 0x441   : > { %v4413_v51 = vmax.f32 %v4412_v34, %v3679_v41  ;;  %v4375_v1 = vmax.f32 %v4374_v3, %v3684_v40  ;;  %v3687_v18 = vmax.f32 %v3256_v43, 0.0  ;;  %v2905_v58 = vadd.f32 %v2904_v62, %v6841_v61 }
 0x442   : > { %v4401_v2 = vmax.f32 %v4400_v30, %v3686_v15  ;;  %v4388_v36 = vmax.f32 %v4387_v17, %v3685_v6  ;;  %v3258_v8 = vadd.f32 %v3257_v39, %v6845_v21  ;;  %v2907_v59 = vadd.f32 %v2906_v42, %v6849_v19 }
 0x443   : > { %v4414_v25 = vmax.f32 %v4413_v51, %v3687_v18  ;;  %v3692_v48 = vmax.f32 %v2905_v58, 0.0  ;;  %v3260_v29 = vadd.f32 %v3259_v32, %v6853_v24 }
 0x444   : > { %v3694_v31 = vmax.f32 %v3258_v8, 0.0  ;;  %v3693_v33 = vmax.f32 %v2907_v59, 0.0  ;;  %v2910_v44 = vpop.f32.mrb[12].mxu0 }
 0x445   : > { %v4376_v10 = vmax.f32 %v4375_v1, %v3692_v48  ;;  %v3695_v50 = vmax.f32 %v3260_v29, 0.0  ;;  %v2911_v55 = vadd.f32 %v2910_v44, %v6841_v61  ;;  %v3263_v0 = vpop.f32.mrb[12].mxu1  ;;  %v2912_v26 = vpop.f32.mrb[13].mxu0 }
 0x446   : > { %v4402_v12 = vmax.f32 %v4401_v2, %v3694_v31  ;;  %v4389_v11 = vmax.f32 %v4388_v36, %v3693_v33  ;;  %v3264_v63 = vadd.f32 %v3263_v0, %v6845_v21  ;;  %v2913_v52 = vadd.f32 %v2912_v26, %v6849_v19  ;;  %v3265_v60 = vpop.f32.mrb[13].mxu1  ;;  %v2914_v7 = vpop.f32.mrb[14].mxu0 }
 0x447   : > { %v4415_v46 = vmax.f32 %v4414_v25, %v3695_v50  ;;  %v3700_v13 = vmax.f32 %v2911_v55, 0.0  ;;  %v3266_v20 = vadd.f32 %v3265_v60, %v6853_v24  ;;  %v2915_v35 = vadd.f32 %v2914_v7, %v6841_v61  ;;  %v3267_v28 = vpop.f32.mrb[14].mxu1  ;;  %v2916_v47 = vpop.f32.mrb[15].mxu0 }
 0x448   : > { %v3702_v22 = vmax.f32 %v3264_v63, 0.0  ;;  %v3701_v53 = vmax.f32 %v2913_v52, 0.0  ;;  %v3268_v34 = vadd.f32 %v3267_v28, %v6845_v21  ;;  %v2917_v16 = vadd.f32 %v2916_v47, %v6849_v19  ;;  %v3269_v56 = vpop.f32.mrb[15].mxu1 }
 0x449   : > { %v4377_v57 = vmax.f32 %v4376_v10, %v3700_v13  ;;  %v3703_v27 = vmax.f32 %v3266_v20, 0.0  ;;  %v3708_v38 = vmax.f32 %v2915_v35, 0.0  ;;  %v3270_v45 = vadd.f32 %v3269_v56, %v6853_v24 }
 0x44a   : > { %v4403_v23 = vmax.f32 %v4402_v12, %v3702_v22  ;;  %v4390_v14 = vmax.f32 %v4389_v11, %v3701_v53  ;;  %v3710_v49 = vmax.f32 %v3268_v34, 0.0  ;;  %v3709_v37 = vmax.f32 %v2917_v16, 0.0 }
 0x44b   : > { %v4416_v62 = vmax.f32 %v4415_v46, %v3703_v27  ;;  %v4378_v3 = vmax.f32 %v4377_v57, %v3708_v38  ;;  %v3711_v41 = vmax.f32 %v3270_v45, 0.0 }
 0x44c   : > { %v4404_v40 = vmax.f32 %v4403_v23, %v3710_v49  ;;  %v4391_v43 = vmax.f32 %v4390_v14, %v3709_v37  ;;  %v2920_v39 = vpop.f32.mrb[16].mxu0 }
 0x44d   : > { %v4379_v42 = vrot.slane %v4378_v3, 4  ;;  %v4417_v30 = vmax.f32 %v4416_v62, %v3711_v41  ;;  %v2921_v17 = vadd.f32 %v2920_v39, %v6841_v61  ;;  %v3273_v15 = vpop.f32.mrb[16].mxu1  ;;  %v2922_v6 = vpop.f32.mrb[17].mxu0 }
 0x44e   : > { %v4405_v32 = vrot.slane %v4404_v40, 4  ;;  %v4392_v51 = vrot.slane %v4391_v43, 4  ;;  %v3274_v1 = vadd.f32 %v3273_v15, %v6845_v21  ;;  %v2923_v18 = vadd.f32 %v2922_v6, %v6849_v19  ;;  %v3275_v58 = vpop.f32.mrb[17].mxu1  ;;  %v2924_v2 = vpop.f32.mrb[18].mxu0 }
 0x44f   : > { %v4380_v36 = vmax.f32 %v4378_v3, %v4379_v42  ;;  %v4418_v8 = vrot.slane %v4417_v30, 4  ;;  %v3716_v59 = vmax.f32 %v2921_v17, 0.0  ;;  %v3276_v25 = vadd.f32 %v3275_v58, %v6853_v24  ;;  %v3277_v48 = vpop.f32.mrb[18].mxu1  ;;  %v2926_v29 = vpop.f32.mrb[19].mxu0 }
 0x450   : > { %v4406_v31 = vmax.f32 %v4404_v40, %v4405_v32  ;;  %v4393_v33 = vmax.f32 %v4391_v43, %v4392_v51  ;;  %v3718_v44 = vmax.f32 %v3274_v1, 0.0  ;;  %v3717_v10 = vmax.f32 %v2923_v18, 0.0  ;;  %v3279_v50 = vpop.f32.mrb[19].mxu1 }
 0x451   : > { %v4381_v55 = vrot.slane %v4380_v36, 2  ;;  %v4419_v0 = vmax.f32 %v4417_v30, %v4418_v8  ;;  %v3719_v26 = vmax.f32 %v3276_v25, 0.0  ;;  %v2925_v12 = vadd.f32 %v2924_v2, %v6841_v61 }
 0x452   : > { %v4407_v11 = vrot.slane %v4406_v31, 2  ;;  %v4394_v63 = vrot.slane %v4393_v33, 2  ;;  %v3278_v52 = vadd.f32 %v3277_v48, %v6845_v21  ;;  %v2927_v60 = vadd.f32 %v2926_v29, %v6849_v19 }
 0x453   : > { %v4382_v7 = vmax.f32 %v4380_v36, %v4381_v55  ;;  %v4420_v46 = vrot.slane %v4419_v0, 2  ;;  %v3724_v13 = vmax.f32 %v2925_v12, 0.0  ;;  %v3280_v20 = vadd.f32 %v3279_v50, %v6853_v24 }
 0x454   : > { %v4408_v35 = vmax.f32 %v4406_v31, %v4407_v11  ;;  %v4395_v28 = vmax.f32 %v4393_v33, %v4394_v63  ;;  %v3726_v47 = vmax.f32 %v3278_v52, 0.0  ;;  %v3725_v22 = vmax.f32 %v2927_v60, 0.0  ;;  %v2930_v53 = vpop.f32.mrb[20].mxu0 }
 0x455   : > { %v4383_v34 = vrot.slane %v4382_v7, 1  ;;  %v4421_v16 = vmax.f32 %v4419_v0, %v4420_v46  ;;  %v4476_v56 = vmax.f32 %v3716_v59, %v3724_v13  ;;  %v3727_v57 = vmax.f32 %v3280_v20, 0.0  ;;  %v3283_v27 = vpop.f32.mrb[20].mxu1  ;;  %v2932_v38 = vpop.f32.mrb[21].mxu0 }
 0x456   : > { %v4409_v45 = vrot.slane %v4408_v35, 1  ;;  %v4396_v23 = vrot.slane %v4395_v28, 1  ;;  %v4502_v14 = vmax.f32 %v3718_v44, %v3726_v47  ;;  %v4489_v49 = vmax.f32 %v3717_v10, %v3725_v22  ;;  %v3285_v37 = vpop.f32.mrb[21].mxu1  ;;  %v2934_v62 = vpop.f32.mrb[22].mxu0 }
 0x457   : > { %v4384_v3 = vmax.f32 %v4382_v7, %v4383_v34  ;;  %v4422_v41 = vrot.slane %v4421_v16, 1  ;;  %v4515_v40 = vmax.f32 %v3719_v26, %v3727_v57  ;;  %v2931_v43 = vadd.f32 %v2930_v53, %v6841_v61  ;;  %v3287_v39 = vpop.f32.mrb[22].mxu1  ;;  %v2936_v42 = vpop.f32.mrb[23].mxu0 }
 0x458   : > { %v4410_v30 = vmax.f32 %v4408_v35, %v4409_v45  ;;  %v4397_v17 = vmax.f32 %v4395_v28, %v4396_v23  ;;  %v3284_v15 = vadd.f32 %v3283_v27, %v6845_v21  ;;  %v2933_v6 = vadd.f32 %v2932_v38, %v6849_v19  ;;  %v3289_v32 = vpop.f32.mrb[23].mxu1 }
 0x459   : > { %v7146_v51 = vsel %vm4806_vm6, %v4384_v3, %v7098_v54  ;;  %v4423_v1 = vmax.f32 %v4421_v16, %v4422_v41  ;;  %v3732_v18 = vmax.f32 %v2931_v43, 0.0  ;;  %v3286_v58 = vadd.f32 %v3285_v37, %v6853_v24 }
 0x45a   : > { %v7151_v2 = vsel %vm4806_vm6, %v4410_v30, %v7103_v9  ;;  %v7155_v36 = vsel %vm4806_vm6, %v4397_v17, %v7107_v4  ;;  %v3734_v8 = vmax.f32 %v3284_v15, 0.0  ;;  %v3733_v59 = vmax.f32 %v2933_v6, 0.0 }
 0x45b   : > { %v7159_v25 = vsel %vm4806_vm6, %v4423_v1, %v7111_v5  ;;  %v4477_v54 = vmax.f32 %v4476_v56, %v3732_v18  ;;  %v3735_v48 = vmax.f32 %v3286_v58, 0.0  ;;  %v2935_v29 = vadd.f32 %v2934_v62, %v6841_v61 }
 0x45c   : > { %v4503_v31 = vmax.f32 %v4502_v14, %v3734_v8  ;;  %v4490_v33 = vmax.f32 %v4489_v49, %v3733_v59  ;;  %v3288_v44 = vadd.f32 %v3287_v39, %v6845_v21  ;;  %v2937_v9 = vadd.f32 %v2936_v42, %v6849_v19  ;;  %v2940_v10 = vpop.f32.mrb[24].mxu0 }
 0x45d   : > { %v4516_v50 = vmax.f32 %v4515_v40, %v3735_v48  ;;  %v3740_v4 = vmax.f32 %v2935_v29, 0.0  ;;  %v3290_v55 = vadd.f32 %v3289_v32, %v6853_v24  ;;  %v2941_v0 = vadd.f32 %v2940_v10, %v6841_v61  ;;  %v3293_v26 = vpop.f32.mrb[24].mxu1  ;;  %v2942_v5 = vpop.f32.mrb[25].mxu0 }
 0x45e   : > { %v3742_v12 = vmax.f32 %v3288_v44, 0.0  ;;  %v3741_v11 = vmax.f32 %v2937_v9, 0.0  ;;  %v3294_v63 = vadd.f32 %v3293_v26, %v6845_v21  ;;  %v2943_v52 = vadd.f32 %v2942_v5, %v6849_v19  ;;  %v3295_v60 = vpop.f32.mrb[25].mxu1  ;;  %v2944_v7 = vpop.f32.mrb[26].mxu0 }
 0x45f   : > { %v4478_v46 = vmax.f32 %v4477_v54, %v3740_v4  ;;  %v3743_v13 = vmax.f32 %v3290_v55, 0.0  ;;  %v3748_v20 = vmax.f32 %v2941_v0, 0.0  ;;  %v3296_v35 = vadd.f32 %v3295_v60, %v6853_v24  ;;  %v3297_v28 = vpop.f32.mrb[26].mxu1  ;;  %v2946_v47 = vpop.f32.mrb[27].mxu0 }
 0x460   : > { %v4504_v22 = vmax.f32 %v4503_v31, %v3742_v12  ;;  %v4491_v53 = vmax.f32 %v4490_v33, %v3741_v11  ;;  %v3750_v34 = vmax.f32 %v3294_v63, 0.0  ;;  %v3749_v16 = vmax.f32 %v2943_v52, 0.0  ;;  %v3299_v56 = vpop.f32.mrb[27].mxu1 }
 0x461   : > { %v4517_v57 = vmax.f32 %v4516_v50, %v3743_v13  ;;  %v4479_v27 = vmax.f32 %v4478_v46, %v3748_v20  ;;  %v3751_v38 = vmax.f32 %v3296_v35, 0.0  ;;  %v2945_v45 = vadd.f32 %v2944_v7, %v6841_v61 }
 0x462   : > { %v4505_v23 = vmax.f32 %v4504_v22, %v3750_v34  ;;  %v4492_v14 = vmax.f32 %v4491_v53, %v3749_v16  ;;  %v3298_v49 = vadd.f32 %v3297_v28, %v6845_v21  ;;  %v2947_v37 = vadd.f32 %v2946_v47, %v6849_v19 }
 0x463   : > { %v4518_v62 = vmax.f32 %v4517_v57, %v3751_v38  ;;  %v3756_v3 = vmax.f32 %v2945_v45, 0.0  ;;  %v3300_v41 = vadd.f32 %v3299_v56, %v6853_v24 }
 0x464   : > { %v3758_v40 = vmax.f32 %v3298_v49, 0.0  ;;  %v3757_v43 = vmax.f32 %v2947_v37, 0.0  ;;  %v2950_v39 = vpop.f32.mrb[28].mxu0 }
 0x465   : > { %v4480_v42 = vmax.f32 %v4479_v27, %v3756_v3  ;;  %v3759_v30 = vmax.f32 %v3300_v41, 0.0  ;;  %v2951_v17 = vadd.f32 %v2950_v39, %v6841_v61  ;;  %v3303_v15 = vpop.f32.mrb[28].mxu1  ;;  %v2952_v6 = vpop.f32.mrb[29].mxu0 }
 0x466   : > { %v4506_v32 = vmax.f32 %v4505_v23, %v3758_v40  ;;  %v4493_v1 = vmax.f32 %v4492_v14, %v3757_v43  ;;  %v3304_v18 = vadd.f32 %v3303_v15, %v6845_v21  ;;  %v2953_v58 = vadd.f32 %v2952_v6, %v6849_v19  ;;  %v3305_v8 = vpop.f32.mrb[29].mxu1  ;;  %v2954_v59 = vpop.f32.mrb[30].mxu0 }
 0x467   : > { %v4519_v54 = vmax.f32 %v4518_v62, %v3759_v30  ;;  %v3764_v48 = vmax.f32 %v2951_v17, 0.0  ;;  %v3306_v29 = vadd.f32 %v3305_v8, %v6853_v24  ;;  %v2955_v31 = vadd.f32 %v2954_v59, %v6841_v61  ;;  %v3307_v33 = vpop.f32.mrb[30].mxu1  ;;  %v2956_v44 = vpop.f32.mrb[31].mxu0 }
 0x468   : > { %v3766_v9 = vmax.f32 %v3304_v18, 0.0  ;;  %v3765_v10 = vmax.f32 %v2953_v58, 0.0  ;;  %v3308_v50 = vadd.f32 %v3307_v33, %v6845_v21  ;;  %v2957_v4 = vadd.f32 %v2956_v44, %v6849_v19  ;;  %v3309_v55 = vpop.f32.mrb[31].mxu1 }
 0x469   : > { %v4481_v0 = vmax.f32 %v4480_v42, %v3764_v48  ;;  %v3767_v26 = vmax.f32 %v3306_v29, 0.0  ;;  %v3772_v5 = vmax.f32 %v2955_v31, 0.0  ;;  %v3310_v12 = vadd.f32 %v3309_v55, %v6853_v24 }
 0x46a   : > { %v4507_v11 = vmax.f32 %v4506_v32, %v3766_v9  ;;  %v4494_v63 = vmax.f32 %v4493_v1, %v3765_v10  ;;  %v3774_v52 = vmax.f32 %v3308_v50, 0.0  ;;  %v3773_v60 = vmax.f32 %v2957_v4, 0.0 }
 0x46b   : > { %v4520_v7 = vmax.f32 %v4519_v54, %v3767_v26  ;;  %v4482_v46 = vmax.f32 %v4481_v0, %v3772_v5  ;;  %v3775_v13 = vmax.f32 %v3310_v12, 0.0 }
 0x46c   : > { %v4508_v20 = vmax.f32 %v4507_v11, %v3774_v52  ;;  %v4495_v35 = vmax.f32 %v4494_v63, %v3773_v60  ;;  %v2960_v28 = vpop.f32.mrb[32].mxu0 }
 0x46d   : > { %v4483_v47 = vrot.slane %v4482_v46, 4  ;;  %v4521_v22 = vmax.f32 %v4520_v7, %v3775_v13  ;;  %v2961_v53 = vadd.f32 %v2960_v28, %v6841_v61  ;;  %v3313_v34 = vpop.f32.mrb[32].mxu1  ;;  %v2962_v16 = vpop.f32.mrb[33].mxu0 }
 0x46e   : > { %v4509_v56 = vrot.slane %v4508_v20, 4  ;;  %v4496_v57 = vrot.slane %v4495_v35, 4  ;;  %v3314_v27 = vadd.f32 %v3313_v34, %v6845_v21  ;;  %v2963_v38 = vadd.f32 %v2962_v16, %v6849_v19  ;;  %v3315_v45 = vpop.f32.mrb[33].mxu1  ;;  %v2964_v23 = vpop.f32.mrb[34].mxu0 }
 0x46f   : > { %v4484_v14 = vmax.f32 %v4482_v46, %v4483_v47  ;;  %v4522_v49 = vrot.slane %v4521_v22, 4  ;;  %v3780_v37 = vmax.f32 %v2961_v53, 0.0  ;;  %v3316_v62 = vadd.f32 %v3315_v45, %v6853_v24  ;;  %v3317_v3 = vpop.f32.mrb[34].mxu1  ;;  %v2966_v41 = vpop.f32.mrb[35].mxu0 }
 0x470   : > { %v4510_v40 = vmax.f32 %v4508_v20, %v4509_v56  ;;  %v4497_v43 = vmax.f32 %v4495_v35, %v4496_v57  ;;  %v3782_v39 = vmax.f32 %v3314_v27, 0.0  ;;  %v3781_v42 = vmax.f32 %v2963_v38, 0.0  ;;  %v3319_v30 = vpop.f32.mrb[35].mxu1 }
 0x471   : > { %v4485_v17 = vrot.slane %v4484_v14, 2  ;;  %v4523_v15 = vmax.f32 %v4521_v22, %v4522_v49  ;;  %v3783_v6 = vmax.f32 %v3316_v62, 0.0  ;;  %v2965_v32 = vadd.f32 %v2964_v23, %v6841_v61 }
 0x472   : > { %v4511_v1 = vrot.slane %v4510_v40, 2  ;;  %v4498_v18 = vrot.slane %v4497_v43, 2  ;;  %v3318_v58 = vadd.f32 %v3317_v3, %v6845_v21  ;;  %v2967_v8 = vadd.f32 %v2966_v41, %v6849_v19 }
 0x473   : > { %v4486_v59 = vmax.f32 %v4484_v14, %v4485_v17  ;;  %v4524_v54 = vrot.slane %v4523_v15, 2  ;;  %v3788_v48 = vmax.f32 %v2965_v32, 0.0  ;;  %v3320_v29 = vadd.f32 %v3319_v30, %v6853_v24 }
 0x474   : > { %v4512_v31 = vmax.f32 %v4510_v40, %v4511_v1  ;;  %v4499_v33 = vmax.f32 %v4497_v43, %v4498_v18  ;;  %v3790_v44 = vmax.f32 %v3318_v58, 0.0  ;;  %v3789_v9 = vmax.f32 %v2967_v8, 0.0  ;;  %v2970_v10 = vpop.f32.mrb[36].mxu0 }
 0x475   : > { %v4487_v50 = vrot.slane %v4486_v59, 1  ;;  %v4525_v4 = vmax.f32 %v4523_v15, %v4524_v54  ;;  %v4580_v55 = vmax.f32 %v3780_v37, %v3788_v48  ;;  %v3791_v0 = vmax.f32 %v3320_v29, 0.0  ;;  %v3323_v26 = vpop.f32.mrb[36].mxu1  ;;  %v2972_v5 = vpop.f32.mrb[37].mxu0 }
 0x476   : > { %v4513_v12 = vrot.slane %v4512_v31, 1  ;;  %v4500_v11 = vrot.slane %v4499_v33, 1  ;;  %v4606_v63 = vmax.f32 %v3782_v39, %v3790_v44  ;;  %v4593_v52 = vmax.f32 %v3781_v42, %v3789_v9  ;;  %v3325_v60 = vpop.f32.mrb[37].mxu1  ;;  %v2974_v7 = vpop.f32.mrb[38].mxu0 }
 0x477   : > { %v4488_v46 = vmax.f32 %v4486_v59, %v4487_v50  ;;  %v4526_v13 = vrot.slane %v4525_v4, 1  ;;  %v4619_v20 = vmax.f32 %v3783_v6, %v3791_v0  ;;  %v2971_v35 = vadd.f32 %v2970_v10, %v6841_v61  ;;  %v3327_v28 = vpop.f32.mrb[38].mxu1  ;;  %v2976_v47 = vpop.f32.mrb[39].mxu0 }
 0x478   : > { %v4514_v22 = vmax.f32 %v4512_v31, %v4513_v12  ;;  %v4501_v53 = vmax.f32 %v4499_v33, %v4500_v11  ;;  %v3324_v34 = vadd.f32 %v3323_v26, %v6845_v21  ;;  %v2973_v16 = vadd.f32 %v2972_v5, %v6849_v19  ;;  %v3329_v56 = vpop.f32.mrb[39].mxu1 }
 0x479   : > { %v7194_v57 = vsel %vm4808_vm7, %v4488_v46, %v7146_v51  ;;  %v4527_v27 = vmax.f32 %v4525_v4, %v4526_v13  ;;  %v3796_v38 = vmax.f32 %v2971_v35, 0.0  ;;  %v3326_v45 = vadd.f32 %v3325_v60, %v6853_v24 }
 0x47a   : > { %v7199_v23 = vsel %vm4808_vm7, %v4514_v22, %v7151_v2  ;;  %v7203_v14 = vsel %vm4808_vm7, %v4501_v53, %v7155_v36  ;;  %v3798_v49 = vmax.f32 %v3324_v34, 0.0  ;;  %v3797_v37 = vmax.f32 %v2973_v16, 0.0 }
 0x47b   : > { %v7207_v62 = vsel %vm4808_vm7, %v4527_v27, %v7159_v25  ;;  %v4581_v51 = vmax.f32 %v4580_v55, %v3796_v38  ;;  %v3799_v3 = vmax.f32 %v3326_v45, 0.0  ;;  %v2975_v41 = vadd.f32 %v2974_v7, %v6841_v61 }
 0x47c   : > { %v4607_v40 = vmax.f32 %v4606_v63, %v3798_v49  ;;  %v4594_v43 = vmax.f32 %v4593_v52, %v3797_v37  ;;  %v3328_v39 = vadd.f32 %v3327_v28, %v6845_v21  ;;  %v2977_v2 = vadd.f32 %v2976_v47, %v6849_v19  ;;  %v2980_v42 = vpop.f32.mrb[40].mxu0 }
 0x47d   : > { %v4620_v30 = vmax.f32 %v4619_v20, %v3799_v3  ;;  %v3804_v36 = vmax.f32 %v2975_v41, 0.0  ;;  %v3330_v17 = vadd.f32 %v3329_v56, %v6853_v24  ;;  %v2981_v15 = vadd.f32 %v2980_v42, %v6841_v61  ;;  %v3333_v6 = vpop.f32.mrb[40].mxu1  ;;  %v2982_v25 = vpop.f32.mrb[41].mxu0 }
 0x47e   : > { %v3806_v32 = vmax.f32 %v3328_v39, 0.0  ;;  %v3805_v1 = vmax.f32 %v2977_v2, 0.0  ;;  %v3334_v18 = vadd.f32 %v3333_v6, %v6845_v21  ;;  %v2983_v58 = vadd.f32 %v2982_v25, %v6849_v19  ;;  %v3335_v8 = vpop.f32.mrb[41].mxu1  ;;  %v2984_v59 = vpop.f32.mrb[42].mxu0 }
 0x47f   : > { %v4582_v54 = vmax.f32 %v4581_v51, %v3804_v36  ;;  %v3807_v48 = vmax.f32 %v3330_v17, 0.0  ;;  %v3812_v29 = vmax.f32 %v2981_v15, 0.0  ;;  %v3336_v31 = vadd.f32 %v3335_v8, %v6853_v24  ;;  %v3337_v33 = vpop.f32.mrb[42].mxu1  ;;  %v2986_v44 = vpop.f32.mrb[43].mxu0 }
 0x480   : > { %v4608_v9 = vmax.f32 %v4607_v40, %v3806_v32  ;;  %v4595_v10 = vmax.f32 %v4594_v43, %v3805_v1  ;;  %v3814_v50 = vmax.f32 %v3334_v18, 0.0  ;;  %v3813_v4 = vmax.f32 %v2983_v58, 0.0  ;;  %v3339_v55 = vpop.f32.mrb[43].mxu1 }
 0x481   : > { %v4621_v0 = vmax.f32 %v4620_v30, %v3807_v48  ;;  %v4583_v26 = vmax.f32 %v4582_v54, %v3812_v29  ;;  %v3815_v5 = vmax.f32 %v3336_v31, 0.0  ;;  %v2985_v12 = vadd.f32 %v2984_v59, %v6841_v61 }
 0x482   : > { %v4609_v11 = vmax.f32 %v4608_v9, %v3814_v50  ;;  %v4596_v63 = vmax.f32 %v4595_v10, %v3813_v4  ;;  %v3338_v52 = vadd.f32 %v3337_v33, %v6845_v21  ;;  %v2987_v60 = vadd.f32 %v2986_v44, %v6849_v19 }
 0x483   : > { %v4622_v7 = vmax.f32 %v4621_v0, %v3815_v5  ;;  %v3820_v46 = vmax.f32 %v2985_v12, 0.0  ;;  %v3340_v13 = vadd.f32 %v3339_v55, %v6853_v24 }
 0x484   : > { %v3822_v20 = vmax.f32 %v3338_v52, 0.0  ;;  %v3821_v35 = vmax.f32 %v2987_v60, 0.0  ;;  %v2990_v28 = vpop.f32.mrb[44].mxu0 }
 0x485   : > { %v4584_v47 = vmax.f32 %v4583_v26, %v3820_v46  ;;  %v3823_v22 = vmax.f32 %v3340_v13, 0.0  ;;  %v2991_v53 = vadd.f32 %v2990_v28, %v6841_v61  ;;  %v3343_v34 = vpop.f32.mrb[44].mxu1  ;;  %v2992_v16 = vpop.f32.mrb[45].mxu0 }
 0x486   : > { %v4610_v56 = vmax.f32 %v4609_v11, %v3822_v20  ;;  %v4597_v27 = vmax.f32 %v4596_v63, %v3821_v35  ;;  %v3344_v38 = vadd.f32 %v3343_v34, %v6845_v21  ;;  %v2993_v45 = vadd.f32 %v2992_v16, %v6849_v19  ;;  %v3345_v49 = vpop.f32.mrb[45].mxu1  ;;  %v2994_v37 = vpop.f32.mrb[46].mxu0 }
 0x487   : > { %v4623_v51 = vmax.f32 %v4622_v7, %v3823_v22  ;;  %v3828_v3 = vmax.f32 %v2991_v53, 0.0  ;;  %v3346_v41 = vadd.f32 %v3345_v49, %v6853_v24  ;;  %v2995_v40 = vadd.f32 %v2994_v37, %v6841_v61  ;;  %v3347_v43 = vpop.f32.mrb[46].mxu1  ;;  %v2996_v39 = vpop.f32.mrb[47].mxu0 }
 0x488   : > { %v3830_v2 = vmax.f32 %v3344_v38, 0.0  ;;  %v3829_v42 = vmax.f32 %v2993_v45, 0.0  ;;  %v3348_v30 = vadd.f32 %v3347_v43, %v6845_v21  ;;  %v2997_v36 = vadd.f32 %v2996_v39, %v6849_v19  ;;  %v3349_v17 = vpop.f32.mrb[47].mxu1 }
 0x489   : > { %v4585_v15 = vmax.f32 %v4584_v47, %v3828_v3  ;;  %v3831_v6 = vmax.f32 %v3346_v41, 0.0  ;;  %v3836_v25 = vmax.f32 %v2995_v40, 0.0  ;;  %v3350_v32 = vadd.f32 %v3349_v17, %v6853_v24 }
 0x48a   : > { %v4611_v1 = vmax.f32 %v4610_v56, %v3830_v2  ;;  %v4598_v18 = vmax.f32 %v4597_v27, %v3829_v42  ;;  %v3838_v58 = vmax.f32 %v3348_v30, 0.0  ;;  %v3837_v8 = vmax.f32 %v2997_v36, 0.0 }
 0x48b   : > { %v4624_v59 = vmax.f32 %v4623_v51, %v3831_v6  ;;  %v4586_v54 = vmax.f32 %v4585_v15, %v3836_v25  ;;  %v3839_v48 = vmax.f32 %v3350_v32, 0.0 }
 0x48c   : > { %v4612_v29 = vmax.f32 %v4611_v1, %v3838_v58  ;;  %v4599_v31 = vmax.f32 %v4598_v18, %v3837_v8  ;;  %v3000_v33 = vpop.f32.mrb[48].mxu0 }
 0x48d   : > { %v4587_v44 = vrot.slane %v4586_v54, 4  ;;  %v4625_v9 = vmax.f32 %v4624_v59, %v3839_v48  ;;  %v3001_v10 = vadd.f32 %v3000_v33, %v6841_v61  ;;  %v3353_v50 = vpop.f32.mrb[48].mxu1  ;;  %v3002_v4 = vpop.f32.mrb[49].mxu0 }
 0x48e   : > { %v4613_v55 = vrot.slane %v4612_v29, 4  ;;  %v4600_v0 = vrot.slane %v4599_v31, 4  ;;  %v3354_v26 = vadd.f32 %v3353_v50, %v6845_v21  ;;  %v3003_v5 = vadd.f32 %v3002_v4, %v6849_v19  ;;  %v3355_v12 = vpop.f32.mrb[49].mxu1  ;;  %v3004_v11 = vpop.f32.mrb[50].mxu0 }
 0x48f   : > { %v4588_v63 = vmax.f32 %v4586_v54, %v4587_v44  ;;  %v4626_v52 = vrot.slane %v4625_v9, 4  ;;  %v3844_v60 = vmax.f32 %v3001_v10, 0.0  ;;  %v3356_v7 = vadd.f32 %v3355_v12, %v6853_v24  ;;  %v3357_v46 = vpop.f32.mrb[50].mxu1  ;;  %v3006_v13 = vpop.f32.mrb[51].mxu0 }
 0x490   : > { %v4614_v20 = vmax.f32 %v4612_v29, %v4613_v55  ;;  %v4601_v35 = vmax.f32 %v4599_v31, %v4600_v0  ;;  %v3846_v28 = vmax.f32 %v3354_v26, 0.0  ;;  %v3845_v47 = vmax.f32 %v3003_v5, 0.0  ;;  %v3359_v22 = vpop.f32.mrb[51].mxu1 }
 0x491   : > { %v4589_v53 = vrot.slane %v4588_v63, 2  ;;  %v4627_v34 = vmax.f32 %v4625_v9, %v4626_v52  ;;  %v3847_v16 = vmax.f32 %v3356_v7, 0.0  ;;  %v3005_v56 = vadd.f32 %v3004_v11, %v6841_v61 }
 0x492   : > { %v4615_v27 = vrot.slane %v4614_v20, 2  ;;  %v4602_v38 = vrot.slane %v4601_v35, 2  ;;  %v3358_v45 = vadd.f32 %v3357_v46, %v6845_v21  ;;  %v3007_v49 = vadd.f32 %v3006_v13, %v6849_v19 }
 0x493   : > { %v4590_v37 = vmax.f32 %v4588_v63, %v4589_v53  ;;  %v4628_v51 = vrot.slane %v4627_v34, 2  ;;  %v3852_v3 = vmax.f32 %v3005_v56, 0.0  ;;  %v3360_v41 = vadd.f32 %v3359_v22, %v6853_v24 }
 0x494   : > { %v4616_v40 = vmax.f32 %v4614_v20, %v4615_v27  ;;  %v4603_v43 = vmax.f32 %v4601_v35, %v4602_v38  ;;  %v3854_v39 = vmax.f32 %v3358_v45, 0.0  ;;  %v3853_v2 = vmax.f32 %v3007_v49, 0.0  ;;  %v3010_v42 = vpop.f32.mrb[52].mxu0 }
 0x495   : > { %v4591_v30 = vrot.slane %v4590_v37, 1  ;;  %v4629_v36 = vmax.f32 %v4627_v34, %v4628_v51  ;;  %v4684_v17 = vmax.f32 %v3844_v60, %v3852_v3  ;;  %v3855_v15 = vmax.f32 %v3360_v41, 0.0  ;;  %v3363_v6 = vpop.f32.mrb[52].mxu1  ;;  %v3012_v25 = vpop.f32.mrb[53].mxu0 }
 0x496   : > { %v4617_v32 = vrot.slane %v4616_v40, 1  ;;  %v4604_v1 = vrot.slane %v4603_v43, 1  ;;  %v4710_v18 = vmax.f32 %v3846_v28, %v3854_v39  ;;  %v4697_v58 = vmax.f32 %v3845_v47, %v3853_v2  ;;  %v3365_v8 = vpop.f32.mrb[53].mxu1  ;;  %v3014_v59 = vpop.f32.mrb[54].mxu0 }
 0x497   : > { %v4592_v54 = vmax.f32 %v4590_v37, %v4591_v30  ;;  %v4630_v48 = vrot.slane %v4629_v36, 1  ;;  %v4723_v29 = vmax.f32 %v3847_v16, %v3855_v15  ;;  %v3011_v31 = vadd.f32 %v3010_v42, %v6841_v61  ;;  %v3367_v33 = vpop.f32.mrb[54].mxu1  ;;  %v3016_v44 = vpop.f32.mrb[55].mxu0 }
 0x498   : > { %v4618_v9 = vmax.f32 %v4616_v40, %v4617_v32  ;;  %v4605_v10 = vmax.f32 %v4603_v43, %v4604_v1  ;;  %v3364_v50 = vadd.f32 %v3363_v6, %v6845_v21  ;;  %v3013_v4 = vadd.f32 %v3012_v25, %v6849_v19  ;;  %v3369_v55 = vpop.f32.mrb[55].mxu1 }
 0x499   : > { %v7242_v0 = vsel %vm4810_vm8, %v4592_v54, %v7194_v57  ;;  %v4631_v26 = vmax.f32 %v4629_v36, %v4630_v48  ;;  %v3860_v5 = vmax.f32 %v3011_v31, 0.0  ;;  %v3366_v12 = vadd.f32 %v3365_v8, %v6853_v24 }
 0x49a   : > { %v7247_v11 = vsel %vm4810_vm8, %v4618_v9, %v7199_v23  ;;  %v7251_v63 = vsel %vm4810_vm8, %v4605_v10, %v7203_v14  ;;  %v3862_v52 = vmax.f32 %v3364_v50, 0.0  ;;  %v3861_v60 = vmax.f32 %v3013_v4, 0.0 }
 0x49b   : > { %v7255_v7 = vsel %vm4810_vm8, %v4631_v26, %v7207_v62  ;;  %v4685_v57 = vmax.f32 %v4684_v17, %v3860_v5  ;;  %v3863_v46 = vmax.f32 %v3366_v12, 0.0  ;;  %v3015_v13 = vadd.f32 %v3014_v59, %v6841_v61 }
 0x49c   : > { %v4711_v20 = vmax.f32 %v4710_v18, %v3862_v52  ;;  %v4698_v35 = vmax.f32 %v4697_v58, %v3861_v60  ;;  %v3368_v28 = vadd.f32 %v3367_v33, %v6845_v21  ;;  %v3017_v23 = vadd.f32 %v3016_v44, %v6849_v19  ;;  %v3020_v47 = vpop.f32.mrb[56].mxu0 }
 0x49d   : > { %v4724_v22 = vmax.f32 %v4723_v29, %v3863_v46  ;;  %v3868_v14 = vmax.f32 %v3015_v13, 0.0  ;;  %v3370_v53 = vadd.f32 %v3369_v55, %v6853_v24  ;;  %v3021_v34 = vadd.f32 %v3020_v47, %v6841_v61  ;;  %v3373_v16 = vpop.f32.mrb[56].mxu1  ;;  %v3022_v62 = vpop.f32.mrb[57].mxu0 }
 0x49e   : > { %v3870_v56 = vmax.f32 %v3368_v28, 0.0  ;;  %v3869_v27 = vmax.f32 %v3017_v23, 0.0  ;;  %v3374_v38 = vadd.f32 %v3373_v16, %v6845_v21  ;;  %v3023_v45 = vadd.f32 %v3022_v62, %v6849_v19  ;;  %v3375_v49 = vpop.f32.mrb[57].mxu1  ;;  %v3024_v37 = vpop.f32.mrb[58].mxu0 }
 0x49f   : > { %v4686_v51 = vmax.f32 %v4685_v57, %v3868_v14  ;;  %v3871_v3 = vmax.f32 %v3370_v53, 0.0  ;;  %v3876_v41 = vmax.f32 %v3021_v34, 0.0  ;;  %v3376_v40 = vadd.f32 %v3375_v49, %v6853_v24  ;;  %v3377_v43 = vpop.f32.mrb[58].mxu1  ;;  %v3026_v39 = vpop.f32.mrb[59].mxu0 }
 0x4a0   : > { %v4712_v2 = vmax.f32 %v4711_v20, %v3870_v56  ;;  %v4699_v42 = vmax.f32 %v4698_v35, %v3869_v27  ;;  %v3878_v30 = vmax.f32 %v3374_v38, 0.0  ;;  %v3877_v36 = vmax.f32 %v3023_v45, 0.0  ;;  %v3379_v17 = vpop.f32.mrb[59].mxu1 }
 0x4a1   : > { %v4725_v15 = vmax.f32 %v4724_v22, %v3871_v3  ;;  %v4687_v6 = vmax.f32 %v4686_v51, %v3876_v41  ;;  %v3879_v25 = vmax.f32 %v3376_v40, 0.0  ;;  %v3025_v32 = vadd.f32 %v3024_v37, %v6841_v61 }
 0x4a2   : > { %v4713_v1 = vmax.f32 %v4712_v2, %v3878_v30  ;;  %v4700_v18 = vmax.f32 %v4699_v42, %v3877_v36  ;;  %v3378_v58 = vadd.f32 %v3377_v43, %v6845_v21  ;;  %v3027_v8 = vadd.f32 %v3026_v39, %v6849_v19 }
 0x4a3   : > { %v4726_v59 = vmax.f32 %v4725_v15, %v3879_v25  ;;  %v3884_v54 = vmax.f32 %v3025_v32, 0.0  ;;  %v3380_v48 = vadd.f32 %v3379_v17, %v6853_v24 }
 0x4a4   : > { %v3886_v29 = vmax.f32 %v3378_v58, 0.0  ;;  %v3885_v31 = vmax.f32 %v3027_v8, 0.0  ;;  %v3030_v33 = vpop.f32.mrb[60].mxu0 }
 0x4a5   : > { %v4688_v44 = vmax.f32 %v4687_v6, %v3884_v54  ;;  %v3887_v9 = vmax.f32 %v3380_v48, 0.0  ;;  %v3031_v10 = vadd.f32 %v3030_v33, %v6841_v61  ;;  %v3383_v50 = vpop.f32.mrb[60].mxu1  ;;  %v3032_v4 = vpop.f32.mrb[61].mxu0 }
 0x4a6   : > { %v4714_v55 = vmax.f32 %v4713_v1, %v3886_v29  ;;  %v4701_v26 = vmax.f32 %v4700_v18, %v3885_v31  ;;  %v3384_v5 = vadd.f32 %v3383_v50, %v6845_v21  ;;  %v3033_v12 = vadd.f32 %v3032_v4, %v6849_v19  ;;  %v3385_v52 = vpop.f32.mrb[61].mxu1  ;;  %v3034_v60 = vpop.f32.mrb[62].mxu0 }
 0x4a7   : > { %v4727_v57 = vmax.f32 %v4726_v59, %v3887_v9  ;;  %v3892_v46 = vmax.f32 %v3031_v10, 0.0  ;;  %v3386_v13 = vadd.f32 %v3385_v52, %v6853_v24  ;;  %v3035_v20 = vadd.f32 %v3034_v60, %v6841_v61  ;;  %v3387_v35 = vpop.f32.mrb[62].mxu1  ;;  %v3036_v28 = vpop.f32.mrb[63].mxu0 }
 0x4a8   : > { %v3894_v23 = vmax.f32 %v3384_v5, 0.0  ;;  %v3893_v47 = vmax.f32 %v3033_v12, 0.0  ;;  %v3388_v22 = vadd.f32 %v3387_v35, %v6845_v21  ;;  %v3037_v14 = vadd.f32 %v3036_v28, %v6849_v19  ;;  %v3389_v53 = vpop.f32.mrb[63].mxu1 }
 0x4a9   : > { %v4689_v34 = vmax.f32 %v4688_v44, %v3892_v46  ;;  %v3895_v16 = vmax.f32 %v3386_v13, 0.0  ;;  %v3900_v62 = vmax.f32 %v3035_v20, 0.0  ;;  %v3390_v56 = vadd.f32 %v3389_v53, %v6853_v24 }
 0x4aa   : > { %v4715_v27 = vmax.f32 %v4714_v55, %v3894_v23  ;;  %v4702_v38 = vmax.f32 %v4701_v26, %v3893_v47  ;;  %v3902_v45 = vmax.f32 %v3388_v22, 0.0  ;;  %v3901_v49 = vmax.f32 %v3037_v14, 0.0 }
 0x4ab   : > { %v4728_v37 = vmax.f32 %v4727_v57, %v3895_v16  ;;  %v4690_v61 = vmax.f32 %v4689_v34, %v3900_v62  ;;  %v3903_v51 = vmax.f32 %v3390_v56, 0.0 }
 0x4ac   : > { %v4716_v3 = vmax.f32 %v4715_v27, %v3902_v45  ;;  %v4703_v41 = vmax.f32 %v4702_v38, %v3901_v49 }
 0x4ad   : > { %v4691_v40 = vrot.slane %v4690_v61, 4  ;;  %v4729_v43 = vmax.f32 %v4728_v37, %v3903_v51 }
 0x4ae   : > { %v4717_v21 = vrot.slane %v4716_v3, 4  ;;  %v4704_v39 = vrot.slane %v4703_v41, 4 }
 0x4af   : > { %v4692_v19 = vmax.f32 %v4690_v61, %v4691_v40  ;;  %v4730_v2 = vrot.slane %v4729_v43, 4 }
 0x4b0   : > { %v4718_v42 = vmax.f32 %v4716_v3, %v4717_v21  ;;  %v4705_v30 = vmax.f32 %v4703_v41, %v4704_v39 }
 0x4b1   : > { %v4693_v24 = vrot.slane %v4692_v19, 2  ;;  %v4731_v36 = vmax.f32 %v4729_v43, %v4730_v2 }
 0x4b2   : > { %v4719_v17 = vrot.slane %v4718_v42, 2  ;;  %v4706_v15 = vrot.slane %v4705_v30, 2 }
 0x4b3   : > { %v4694_v6 = vmax.f32 %v4692_v19, %v4693_v24  ;;  %v4732_v25 = vrot.slane %v4731_v36, 2 }
 0x4b4   : > { %v4720_v32 = vmax.f32 %v4718_v42, %v4719_v17  ;;  %v4707_v1 = vmax.f32 %v4705_v30, %v4706_v15 }
 0x4b5   : > { %v4695_v18 = vrot.slane %v4694_v6, 1  ;;  %v4733_v58 = vmax.f32 %v4731_v36, %v4732_v25 }
 0x4b6   : > { %v4721_v8 = vrot.slane %v4720_v32, 1  ;;  %v4708_v59 = vrot.slane %v4707_v1, 1 }
 0x4b7   : > { %v4696_v54 = vmax.f32 %v4694_v6, %v4695_v18  ;;  %v4734_v48 = vrot.slane %v4733_v58, 1 }
 0x4b8   : > { %v4722_v29 = vmax.f32 %v4720_v32, %v4721_v8  ;;  %v4709_v31 = vmax.f32 %v4707_v1, %v4708_v59 }
 0x4b9   : > { %v4841_v33 = vsel %vm4812_vm9, %v4696_v54, %v7242_v0  ;;  %v4735_v44 = vmax.f32 %v4733_v58, %v4734_v48 }
 0x4ba   : > { %4875 = vst [vmem:[%s6894_s9 + $0x20] sm:$0xff] %v4841_v33  ;;  %v4855_v9 = vsel %vm4812_vm9, %v4722_v29, %v7247_v11  ;;  %v4848_v10 = vsel %vm4812_vm9, %v4709_v31, %v7251_v63 }
 0x4bb   : > { %4877 = vst [vmem:[%s6894_s9 + $0x30] sm:$0xff] %v4855_v9  ;;  %4876 = vst [vmem:[%s6894_s9 + $0x28] sm:$0xff] %v4848_v10  ;;  %v4862_v0 = vsel %vm4812_vm9, %v4735_v44, %v7255_v7 }
 0x4bc   : > { %4878 = vst [vmem:[%s6894_s9 + $0x38] sm:$0xff] %v4862_v0 }
 0x4bd   : > { %5464 = shalt.err (!%p5461_p3)
}
 0x4be   : > { %s5465_s21 = scalar_lea.hbm %s7289_s17, 1024  ;;  %s5469_s8 = scalar_lea.hbm %s7345_s7, 2048 }
 0x4bf   : > { %p5466_p4 = scmp.ne.s32.totalorder %s7289_s17, %s5465_s21  ;;  %p5470_p9 = scmp.lt.u32.totalorder %s7289_s17, %s7345_s7 }
 0x4c0   : > { %p5471_p10 = scmp.lt.u32.totalorder %s5469_s8, %s5465_s21  ;;  %p5473_p12 = scmp.lt.u32.totalorder %s5465_s21, %s7289_s17 }
 0x4c1   : > { %p5467_p7 = pnand %p5466_p4, %p5595_p5 }
 0x4c2   : > { %p5472_p11 = por %p5471_p10, %p5470_p9 }
 0x4c3   : > { %p5468_p8 = pneg %p5467_p7 }
 0x4c4   : > { %p5474_p13 = por %p5473_p12, %p5472_p11 }
 0x4c6   : > { %p5475_p0 = pnand %p5474_p13, %p5468_p8 }
 0x4c8   : > { %5478 = shalt.err (!%p5475_p0)
}
 0x4c9   : > { %5406 = dma.vmem_to_hbm [thread:$0]  (%p5595_p5), %s7291_s14, 1024, %s7289_s17, %s4880_s28  }
 0x4ca PF: > { %p5412_p1 = scmp.ge.s32.totalorder %s5513_s27, 2  ;;  %s4906_s15 = sand.u32 1, %s5501_s24  }
 0x4cb   : > { %s4907_s16 = scalar_lea.sflag [#allocation3], %s4906_s15 }
 0x4cc   : > { %p5409_p2 = pnand %p5412_p1, %p5599_p6 }
 0x4ce   : > { %5496 = dma.done.wait (!%p5409_p2), %s4907_s16, 1024  }
 0x4cf   : > { %5498 = vsyncadd (!%p5409_p2), %s4907_s16, 4294966272  ;;  %p17_p3 = scmp.ge.s32.totalorder %s5582_s30, 4   ;;  %s7391_s24 = smov %s5505_s25 }
 0x4d0   : > { %s7392_s25 = smov %s5509_s26  ;;  %s7393_s26 = smov %s5593_s10 }
 0x4d1   : > { %s7394_s27 = smov %s5582_s30  ;;  %19 = sbr.rel (!%p17_p3) target bundleno = 3 (0x3), region = 83 }
 0x4d8   :  { %4912 = vsyncpa [#allocation3], 1 }
 0x4d9   :  { %4914 = vsyncpa [#allocation3 + $0x1], 1 }

</bundles_post_ra>
